<compile_context>
chip_gen: v7x
topology: tpu7x:2x2x1
jax: 0.10.0
libtpu: 0.0.40
codegen_flags: <defaults>
</compile_context>

<pallas_src>
import functools

import jax
import jax.numpy as jnp
from jax import lax
from jax.experimental import pallas as pl
from jax.experimental.pallas import tpu as pltpu

# Contract the LAST dim of both operands (RHS kept in natural (out, in) layout).
_NT_DIMS = (((1,), (1,)), ((), ()))


# ---------------------------------------------------------------------------
# Kernel 1: conv1 (1->32, 3x3, pad 1) + bias + ReLU + 2x2 max-pool, fused.
#   p_ref : (1, 4, 9, S*T)  pool-group-ordered 3x3 taps of the padded image
#   w_ref : (32, 9)         b_ref : (32, 1)
#   o_ref : (1, 32, S*T)    max-pooled conv1 activations, channel-major
# Cin=1 and K=9, so the taps stay on the VPU as lane-dense broadcast FMAs.
# ---------------------------------------------------------------------------
def _conv1_relu_maxpool_kernel(p_ref, w_ref, b_ref, o_ref):
    w = w_ref[...]            # (32, 9)
    b = b_ref[...]            # (32, 1)

    def conv_group(q):
        pg = p_ref[0, q]                          # (9, N)   N = S*T lanes
        acc = w[:, 0:1] * pg[0:1, :]              # (32, N)  lane-dense VPU FMA
        for t in range(1, 9):
            acc = acc + w[:, t:t + 1] * pg[t:t + 1, :]
        return jnp.maximum(acc + b, 0.0)          # bias + ReLU

    out = conv_group(0)
    for q in range(1, 4):                         # 2x2 max-pool = max over 4 group members
        out = jnp.maximum(out, conv_group(q))
    o_ref[0] = out


# ---------------------------------------------------------------------------
# Kernel 2: conv2 (32->64, 3x3, pad 1) as im2col matmul + bias + adaptive
# average pool to 16x16, fused.  Channel-major output == PyTorch flatten order.
#   p_ref : (1, ng, 288, 256)  avg-pool-group-ordered patches, ng=(S/16)*(T/16)
#   w_ref : (64, 288)          b_ref : (64, 1)
#   o_ref : (1, 64, 256)
# ---------------------------------------------------------------------------
def _conv2_avgpool_kernel(p_ref, w_ref, b_ref, o_ref, *, n_groups):
    w = w_ref[...]                                                     # (64, 288)
    acc = jnp.dot(w, p_ref[0, 0], preferred_element_type=jnp.float32)  # MXU
    for g in range(1, n_groups):
        acc = acc + jnp.dot(w, p_ref[0, g], preferred_element_type=jnp.float32)
    o_ref[0] = acc * (1.0 / n_groups) + b_ref[...]


# ---------------------------------------------------------------------------
# Kernel 3: stats_fc + ReLU + fusion Linear (concat removed by weight split).
# Gridded over K-tiles of the flattened image features; the fusion weight is
# consumed in its natural (128, K) layout via an NT matmul; the f32 output
# block is the resident accumulator.
# ---------------------------------------------------------------------------
def _fusion_kernel(x_ref, wf_ref, stats_ref, ws_ref, bs_ref, wfs_ref, bf_ref,
                   o_ref):
    k = pl.program_id(0)

    @pl.when(k == 0)
    def _():
        stats = stats_ref[...]            # (Bp, 6)
        ws = ws_ref[...]                  # (6, 16)
        s = stats[:, 0:1] * ws[0:1, :]    # tiny K -> VPU broadcast FMAs, not MXU
        for i in range(1, ws.shape[0]):
            s = s + stats[:, i:i + 1] * ws[i:i + 1, :]
        s = jnp.maximum(s + bs_ref[...], 0.0)          # (Bp, 16) = relu(stats_fc)
        wfs = wfs_ref[...]                # (16, 128)
        acc = s[:, 0:1] * wfs[0:1, :]
        for j in range(1, wfs.shape[0]):
            acc = acc + s[:, j:j + 1] * wfs[j:j + 1, :]
        o_ref[...] = acc + bf_ref[...]                 # bias + stats contribution

    # image-feature K tile: x (Bp, tk) @ wf_tile (128, tk)^T  on the MXU
    o_ref[...] += lax.dot_general(x_ref[...], wf_ref[...], _NT_DIMS,
                                  preferred_element_type=jnp.float32)


# ---------------------------------------------------------------------------
# Wrapper: layout-only prep + three pallas_calls.
# ---------------------------------------------------------------------------
def eog_branch_forward(img, stats, params, *, k_tile=4096):
    f32 = jnp.float32
    img = img.astype(f32)
    stats = stats.astype(f32)

    B, H, W = img.shape
    assert H % 2 == 0 and W % 2 == 0
    S, T = H // 2, W // 2                       # spatial size after MaxPool2d(2)
    assert S % 16 == 0 and T % 16 == 0, (
        "AdaptiveAvgPool2d((16,16)) handled for post-pool spatial dims divisible by 16")
    fh, fw = S // 16, T // 16
    ng = fh * fw

    # -------- conv1 taps, 2x2-pool-group ordered, spatial-on-lanes (layout only) -----
    xp = jnp.pad(img, ((0, 0), (1, 1), (1, 1)))
    p1 = jnp.stack([xp[:, kh:kh + H, kw:kw + W]
                    for kh in range(3) for kw in range(3)], axis=1)       # (B,9,H,W)
    p1 = p1.reshape(B, 9, S, 2, T, 2).transpose(0, 3, 5, 1, 2, 4)         # (B,2,2,9,S,T)
    p1 = p1.reshape(B, 4, 9, S * T)

    w1m = params["w1"].reshape(32, 9)
    b1m = params["b1"].reshape(32, 1)

    y1 = pl.pallas_call(
        _conv1_relu_maxpool_kernel,
        out_shape=jax.ShapeDtypeStruct((B, 32, S * T), f32),
        grid=(B,),
        in_specs=[
            pl.BlockSpec((1, 4, 9, S * T), lambda b: (b, 0, 0, 0)),
            pl.BlockSpec((32, 9), lambda b: (0, 0)),
            pl.BlockSpec((32, 1), lambda b: (0, 0)),
        ],
        out_specs=pl.BlockSpec((1, 32, S * T), lambda b: (b, 0, 0)),
        compiler_params=pltpu.CompilerParams(dimension_semantics=("parallel",)),
    )(p1, w1m, b1m)

    # -------- conv2 im2col patches, avg-pool-group ordered (layout only) --------
    m = y1.reshape(B, 32, S, T)
    mp = jnp.pad(m, ((0, 0), (0, 0), (1, 1), (1, 1)))
    p2 = jnp.concatenate([mp[:, :, kh:kh + S, kw:kw + T]
                          for kh in range(3) for kw in range(3)], axis=1)  # (B,288,S,T)
    p2 = p2.reshape(B, 288, 16, fh, 16, fw).transpose(0, 3, 5, 1, 2, 4)    # (B,fh,fw,288,16,16)
    p2 = p2.reshape(B, ng, 288, 256)

    w2m = jnp.transpose(params["w2"], (0, 2, 3, 1)).reshape(64, 9 * 32)    # (64, 288)
    b2m = params["b2"].reshape(64, 1)

    y2 = pl.pallas_call(
        functools.partial(_conv2_avgpool_kernel, n_groups=ng),
        out_shape=jax.ShapeDtypeStruct((B, 64, 256), f32),
        grid=(B,),
        in_specs=[
            pl.BlockSpec((1, ng, 288, 256), lambda b: (b, 0, 0, 0)),
            pl.BlockSpec((64, 288), lambda b: (0, 0)),
            pl.BlockSpec((64, 1), lambda b: (0, 0)),
        ],
        out_specs=pl.BlockSpec((1, 64, 256), lambda b: (b, 0, 0)),
        compiler_params=pltpu.CompilerParams(dimension_semantics=("parallel",)),
    )(p2, w2m, b2m)

    # Channel-major output -> PyTorch flatten(1) of (B,64,16,16) is a free reshape.
    k_img = 64 * 256
    img_flat = y2.reshape(B, k_img)

    # -------- stats_fc + fusion Linear in one gridded Pallas kernel --------
    wf = params["wf"]                                   # (128, 16400) natural layout (no big transpose)
    wfs_t = jnp.transpose(wf[:, k_img:])                # (16, 128)  tiny (8 KiB)
    ws_t = jnp.transpose(params["ws"])                  # (6, 16)    tiny
    bs_m = params["bs"].reshape(1, 16)
    bf_m = params["bf"].reshape(1, 128)

    Bp = B + (-B) % 8                                   # pad batch rows to a sublane group
    img_flat_p = jnp.pad(img_flat, ((0, Bp - B), (0, 0)))
    stats_p = jnp.pad(stats, ((0, Bp - B), (0, 0)))

    assert k_img % k_tile == 0
    nk = k_img // k_tile
    cost = pl.CostEstimate(
        flops=2 * Bp * (k_img + 16) * 128 + 2 * Bp * 6 * 16,
        transcendentals=0,
        bytes_accessed=4 * (Bp * k_img + 128 * (k_img + 16) + Bp * 128
                            + Bp * 6 + 6 * 16 + 16 * 128 + 16 + 128),
    )

    out = pl.pallas_call(
        _fusion_kernel,
        out_shape=jax.ShapeDtypeStruct((Bp, 128), f32),
        grid=(nk,),
        in_specs=[
            pl.BlockSpec((Bp, k_tile), lambda k: (0, k)),     # image features, K tile
            pl.BlockSpec((128, k_tile), lambda k: (0, k)),    # fusion weight, natural layout
            pl.BlockSpec((Bp, 6), lambda k: (0, 0)),
            pl.BlockSpec((6, 16), lambda k: (0, 0)),
            pl.BlockSpec((1, 16), lambda k: (0, 0)),
            pl.BlockSpec((16, 128), lambda k: (0, 0)),
            pl.BlockSpec((1, 128), lambda k: (0, 0)),
        ],
        out_specs=pl.BlockSpec((Bp, 128), lambda k: (0, 0)),
        compiler_params=pltpu.CompilerParams(dimension_semantics=("arbitrary",)),
        cost_estimate=cost,
    )(img_flat_p, wf, stats_p, ws_t, bs_m, wfs_t, bf_m)

    return out[:B]


# ---------------------------------------------------------------------------
# Pure-JAX reference mirroring the PyTorch module (for the self-check).
# ---------------------------------------------------------------------------
def _reference_forward(img, stats, params):
    x = img[:, None, :, :].astype(jnp.float32)
    y = lax.conv_general_dilated(
        x, params["w1"], window_strides=(1, 1), padding="SAME",
        dimension_numbers=("NCHW", "OIHW", "NCHW"),
        precision=lax.Precision.HIGHEST)
    y = jnp.maximum(y + params["b1"][None, :, None, None], 0.0)
    B, C, H, W = y.shape
    y = y.reshape(B, C, H // 2, 2, W // 2, 2).max(axis=(3, 5))           # MaxPool2d(2)
    y = lax.conv_general_dilated(
        y, params["w2"], window_strides=(1, 1), padding="SAME",
        dimension_numbers=("NCHW", "OIHW", "NCHW"),
        precision=lax.Precision.HIGHEST)
    y = y + params["b2"][None, :, None, None]
    B, C, Sh, Sw = y.shape
    y = y.reshape(B, C, 16, Sh // 16, 16, Sw // 16).mean(axis=(3, 5))    # AdaptiveAvgPool2d((16,16))
    img_feat = y.reshape(B, -1)
    s = jnp.maximum(
        jnp.dot(stats, params["ws"].T, precision=lax.Precision.HIGHEST) + params["bs"], 0.0)
    fused = jnp.concatenate([img_feat, s], axis=1)
    return jnp.dot(fused, params["wf"].T, precision=lax.Precision.HIGHEST) + params["bf"]


def init_params(key):
    keys = jax.random.split(key, 8)

    def uniform(k, shape, fan_in):
        bound = fan_in ** -0.5
        return jax.random.uniform(k, shape, jnp.float32, -bound, bound)

    k_fuse_in = 64 * 16 * 16 + 16
    return {
        "w1": uniform(keys[0], (32, 1, 3, 3), 1 * 3 * 3),
        "b1": uniform(keys[1], (32,), 1 * 3 * 3),
        "w2": uniform(keys[2], (64, 32, 3, 3), 32 * 3 * 3),
        "b2": uniform(keys[3], (64,), 32 * 3 * 3),
        "ws": uniform(keys[4], (16, 6), 6),
        "bs": uniform(keys[5], (16,), 6),
        "wf": uniform(keys[6], (128, k_fuse_in), k_fuse_in),
        "bf": uniform(keys[7], (128,), k_fuse_in),
    }


if __name__ == "__main__":
    key = jax.random.PRNGKey(0)
    key_p, key_img, key_stats = jax.random.split(key, 3)
    params = init_params(key_p)

    # 32x32 image -> 16x16 after the max-pool, so AdaptiveAvgPool2d((16,16)) is exact.
    B, H, W = 2, 32, 32
    img = jax.random.normal(key_img, (B, H, W), dtype=jnp.float32)
    stats = jax.random.normal(key_stats, (B, 6), dtype=jnp.float32)

    out = jax.jit(eog_branch_forward)(img, stats, params)
    out = jax.block_until_ready(out)
    assert out.shape == (B, 128), out.shape

    ref = jax.block_until_ready(_reference_forward(img, stats, params))
    max_err = float(jnp.max(jnp.abs(out - ref)))
    assert max_err < 1e-2, f"Pallas forward mismatch vs reference: max abs err = {max_err}"

    print("KERNEL_OK")
</pallas_src>

<mosaic_0001>
module attributes {stable_mosaic.version = 11 : i64} {
  func.func @_conv1_relu_maxpool_kernel(%arg0: i32, %arg1: memref<1x4x9x256xf32, #tpu.memory_space<vmem>>, %arg2: memref<32x9xf32, #tpu.memory_space<vmem>>, %arg3: memref<32x1xf32, #tpu.memory_space<vmem>>, %arg4: memref<1x32x256xf32, #tpu.memory_space<vmem>>) attributes {dimension_semantics = [#tpu.dimension_semantics<parallel>], iteration_bounds = array<i64: 2>, scalar_prefetch = 0 : i64, scratch_operands = 0 : i64, tpu.core_type = #tpu.core_type<tc>, window_params = [{transform_indices = @transform_0, window_bounds = array<i64: 1, 4, 9, 256>}, {pipeline_mode = #tpu.pipeline_mode<synchronous>, transform_indices = @transform_1, window_bounds = array<i64: 32, 9>}, {pipeline_mode = #tpu.pipeline_mode<synchronous>, transform_indices = @transform_2, window_bounds = array<i64: 32, 1>}, {transform_indices = @transform_3, window_bounds = array<i64: 1, 32, 256>}]} {
    %c0 = arith.constant 0 : index
    %c0_0 = arith.constant 0 : index
    %0 = vector.load %arg2[%c0, %c0_0] : memref<32x9xf32, #tpu.memory_space<vmem>>, vector<32x9xf32>
    %c0_1 = arith.constant 0 : index
    %c0_2 = arith.constant 0 : index
    %1 = vector.load %arg3[%c0_1, %c0_2] : memref<32x1xf32, #tpu.memory_space<vmem>>, vector<32x1xf32>
    %c0_3 = arith.constant 0 : index
    %c0_4 = arith.constant 0 : index
    %c0_5 = arith.constant 0 : index
    %c0_6 = arith.constant 0 : index
    %2 = vector.load %arg1[%c0_3, %c0_4, %c0_5, %c0_6] : memref<1x4x9x256xf32, #tpu.memory_space<vmem>>, vector<1x1x9x256xf32>
    %3 = vector.shape_cast %2 : vector<1x1x9x256xf32> to vector<9x256xf32>
    %4 = vector.extract_strided_slice %0 {offsets = [0, 0], sizes = [32, 1], strides = [1, 1]} : vector<32x9xf32> to vector<32x1xf32>
    %5 = vector.extract_strided_slice %3 {offsets = [0, 0], sizes = [1, 256], strides = [1, 1]} : vector<9x256xf32> to vector<1x256xf32>
    %6 = vector.broadcast %4 : vector<32x1xf32> to vector<32x256xf32>
    %7 = vector.broadcast %5 : vector<1x256xf32> to vector<32x256xf32>
    %8 = arith.mulf %6, %7 : vector<32x256xf32>
    %9 = vector.extract_strided_slice %0 {offsets = [0, 1], sizes = [32, 1], strides = [1, 1]} : vector<32x9xf32> to vector<32x1xf32>
    %10 = vector.extract_strided_slice %3 {offsets = [1, 0], sizes = [1, 256], strides = [1, 1]} : vector<9x256xf32> to vector<1x256xf32>
    %11 = vector.broadcast %9 : vector<32x1xf32> to vector<32x256xf32>
    %12 = vector.broadcast %10 : vector<1x256xf32> to vector<32x256xf32>
    %13 = arith.mulf %11, %12 : vector<32x256xf32>
    %14 = arith.addf %8, %13 : vector<32x256xf32>
    %15 = vector.extract_strided_slice %0 {offsets = [0, 2], sizes = [32, 1], strides = [1, 1]} : vector<32x9xf32> to vector<32x1xf32>
    %16 = vector.extract_strided_slice %3 {offsets = [2, 0], sizes = [1, 256], strides = [1, 1]} : vector<9x256xf32> to vector<1x256xf32>
    %17 = vector.broadcast %15 : vector<32x1xf32> to vector<32x256xf32>
    %18 = vector.broadcast %16 : vector<1x256xf32> to vector<32x256xf32>
    %19 = arith.mulf %17, %18 : vector<32x256xf32>
    %20 = arith.addf %14, %19 : vector<32x256xf32>
    %21 = vector.extract_strided_slice %0 {offsets = [0, 3], sizes = [32, 1], strides = [1, 1]} : vector<32x9xf32> to vector<32x1xf32>
    %22 = vector.extract_strided_slice %3 {offsets = [3, 0], sizes = [1, 256], strides = [1, 1]} : vector<9x256xf32> to vector<1x256xf32>
    %23 = vector.broadcast %21 : vector<32x1xf32> to vector<32x256xf32>
    %24 = vector.broadcast %22 : vector<1x256xf32> to vector<32x256xf32>
    %25 = arith.mulf %23, %24 : vector<32x256xf32>
    %26 = arith.addf %20, %25 : vector<32x256xf32>
    %27 = vector.extract_strided_slice %0 {offsets = [0, 4], sizes = [32, 1], strides = [1, 1]} : vector<32x9xf32> to vector<32x1xf32>
    %28 = vector.extract_strided_slice %3 {offsets = [4, 0], sizes = [1, 256], strides = [1, 1]} : vector<9x256xf32> to vector<1x256xf32>
    %29 = vector.broadcast %27 : vector<32x1xf32> to vector<32x256xf32>
    %30 = vector.broadcast %28 : vector<1x256xf32> to vector<32x256xf32>
    %31 = arith.mulf %29, %30 : vector<32x256xf32>
    %32 = arith.addf %26, %31 : vector<32x256xf32>
    %33 = vector.extract_strided_slice %0 {offsets = [0, 5], sizes = [32, 1], strides = [1, 1]} : vector<32x9xf32> to vector<32x1xf32>
    %34 = vector.extract_strided_slice %3 {offsets = [5, 0], sizes = [1, 256], strides = [1, 1]} : vector<9x256xf32> to vector<1x256xf32>
    %35 = vector.broadcast %33 : vector<32x1xf32> to vector<32x256xf32>
    %36 = vector.broadcast %34 : vector<1x256xf32> to vector<32x256xf32>
    %37 = arith.mulf %35, %36 : vector<32x256xf32>
    %38 = arith.addf %32, %37 : vector<32x256xf32>
    %39 = vector.extract_strided_slice %0 {offsets = [0, 6], sizes = [32, 1], strides = [1, 1]} : vector<32x9xf32> to vector<32x1xf32>
    %40 = vector.extract_strided_slice %3 {offsets = [6, 0], sizes = [1, 256], strides = [1, 1]} : vector<9x256xf32> to vector<1x256xf32>
    %41 = vector.broadcast %39 : vector<32x1xf32> to vector<32x256xf32>
    %42 = vector.broadcast %40 : vector<1x256xf32> to vector<32x256xf32>
    %43 = arith.mulf %41, %42 : vector<32x256xf32>
    %44 = arith.addf %38, %43 : vector<32x256xf32>
    %45 = vector.extract_strided_slice %0 {offsets = [0, 7], sizes = [32, 1], strides = [1, 1]} : vector<32x9xf32> to vector<32x1xf32>
    %46 = vector.extract_strided_slice %3 {offsets = [7, 0], sizes = [1, 256], strides = [1, 1]} : vector<9x256xf32> to vector<1x256xf32>
    %47 = vector.broadcast %45 : vector<32x1xf32> to vector<32x256xf32>
    %48 = vector.broadcast %46 : vector<1x256xf32> to vector<32x256xf32>
    %49 = arith.mulf %47, %48 : vector<32x256xf32>
    %50 = arith.addf %44, %49 : vector<32x256xf32>
    %51 = vector.extract_strided_slice %0 {offsets = [0, 8], sizes = [32, 1], strides = [1, 1]} : vector<32x9xf32> to vector<32x1xf32>
    %52 = vector.extract_strided_slice %3 {offsets = [8, 0], sizes = [1, 256], strides = [1, 1]} : vector<9x256xf32> to vector<1x256xf32>
    %53 = vector.broadcast %51 : vector<32x1xf32> to vector<32x256xf32>
    %54 = vector.broadcast %52 : vector<1x256xf32> to vector<32x256xf32>
    %55 = arith.mulf %53, %54 : vector<32x256xf32>
    %56 = arith.addf %50, %55 : vector<32x256xf32>
    %57 = vector.broadcast %1 : vector<32x1xf32> to vector<32x256xf32>
    %58 = arith.addf %56, %57 : vector<32x256xf32>
    %cst = arith.constant 0.000000e+00 : f32
    %59 = vector.broadcast %cst : f32 to vector<32x256xf32>
    %60 = arith.maximumf %58, %59 : vector<32x256xf32>
    %c0_7 = arith.constant 0 : index
    %c1 = arith.constant 1 : index
    %c0_8 = arith.constant 0 : index
    %c0_9 = arith.constant 0 : index
    %61 = vector.load %arg1[%c0_7, %c1, %c0_8, %c0_9] : memref<1x4x9x256xf32, #tpu.memory_space<vmem>>, vector<1x1x9x256xf32>
    %62 = vector.shape_cast %61 : vector<1x1x9x256xf32> to vector<9x256xf32>
    %63 = vector.extract_strided_slice %0 {offsets = [0, 0], sizes = [32, 1], strides = [1, 1]} : vector<32x9xf32> to vector<32x1xf32>
    %64 = vector.extract_strided_slice %62 {offsets = [0, 0], sizes = [1, 256], strides = [1, 1]} : vector<9x256xf32> to vector<1x256xf32>
    %65 = vector.broadcast %63 : vector<32x1xf32> to vector<32x256xf32>
    %66 = vector.broadcast %64 : vector<1x256xf32> to vector<32x256xf32>
    %67 = arith.mulf %65, %66 : vector<32x256xf32>
    %68 = vector.extract_strided_slice %0 {offsets = [0, 1], sizes = [32, 1], strides = [1, 1]} : vector<32x9xf32> to vector<32x1xf32>
    %69 = vector.extract_strided_slice %62 {offsets = [1, 0], sizes = [1, 256], strides = [1, 1]} : vector<9x256xf32> to vector<1x256xf32>
    %70 = vector.broadcast %68 : vector<32x1xf32> to vector<32x256xf32>
    %71 = vector.broadcast %69 : vector<1x256xf32> to vector<32x256xf32>
    %72 = arith.mulf %70, %71 : vector<32x256xf32>
    %73 = arith.addf %67, %72 : vector<32x256xf32>
    %74 = vector.extract_strided_slice %0 {offsets = [0, 2], sizes = [32, 1], strides = [1, 1]} : vector<32x9xf32> to vector<32x1xf32>
    %75 = vector.extract_strided_slice %62 {offsets = [2, 0], sizes = [1, 256], strides = [1, 1]} : vector<9x256xf32> to vector<1x256xf32>
    %76 = vector.broadcast %74 : vector<32x1xf32> to vector<32x256xf32>
    %77 = vector.broadcast %75 : vector<1x256xf32> to vector<32x256xf32>
    %78 = arith.mulf %76, %77 : vector<32x256xf32>
    %79 = arith.addf %73, %78 : vector<32x256xf32>
    %80 = vector.extract_strided_slice %0 {offsets = [0, 3], sizes = [32, 1], strides = [1, 1]} : vector<32x9xf32> to vector<32x1xf32>
    %81 = vector.extract_strided_slice %62 {offsets = [3, 0], sizes = [1, 256], strides = [1, 1]} : vector<9x256xf32> to vector<1x256xf32>
    %82 = vector.broadcast %80 : vector<32x1xf32> to vector<32x256xf32>
    %83 = vector.broadcast %81 : vector<1x256xf32> to vector<32x256xf32>
    %84 = arith.mulf %82, %83 : vector<32x256xf32>
    %85 = arith.addf %79, %84 : vector<32x256xf32>
    %86 = vector.extract_strided_slice %0 {offsets = [0, 4], sizes = [32, 1], strides = [1, 1]} : vector<32x9xf32> to vector<32x1xf32>
    %87 = vector.extract_strided_slice %62 {offsets = [4, 0], sizes = [1, 256], strides = [1, 1]} : vector<9x256xf32> to vector<1x256xf32>
    %88 = vector.broadcast %86 : vector<32x1xf32> to vector<32x256xf32>
    %89 = vector.broadcast %87 : vector<1x256xf32> to vector<32x256xf32>
    %90 = arith.mulf %88, %89 : vector<32x256xf32>
    %91 = arith.addf %85, %90 : vector<32x256xf32>
    %92 = vector.extract_strided_slice %0 {offsets = [0, 5], sizes = [32, 1], strides = [1, 1]} : vector<32x9xf32> to vector<32x1xf32>
    %93 = vector.extract_strided_slice %62 {offsets = [5, 0], sizes = [1, 256], strides = [1, 1]} : vector<9x256xf32> to vector<1x256xf32>
    %94 = vector.broadcast %92 : vector<32x1xf32> to vector<32x256xf32>
    %95 = vector.broadcast %93 : vector<1x256xf32> to vector<32x256xf32>
    %96 = arith.mulf %94, %95 : vector<32x256xf32>
    %97 = arith.addf %91, %96 : vector<32x256xf32>
    %98 = vector.extract_strided_slice %0 {offsets = [0, 6], sizes = [32, 1], strides = [1, 1]} : vector<32x9xf32> to vector<32x1xf32>
    %99 = vector.extract_strided_slice %62 {offsets = [6, 0], sizes = [1, 256], strides = [1, 1]} : vector<9x256xf32> to vector<1x256xf32>
    %100 = vector.broadcast %98 : vector<32x1xf32> to vector<32x256xf32>
    %101 = vector.broadcast %99 : vector<1x256xf32> to vector<32x256xf32>
    %102 = arith.mulf %100, %101 : vector<32x256xf32>
    %103 = arith.addf %97, %102 : vector<32x256xf32>
    %104 = vector.extract_strided_slice %0 {offsets = [0, 7], sizes = [32, 1], strides = [1, 1]} : vector<32x9xf32> to vector<32x1xf32>
    %105 = vector.extract_strided_slice %62 {offsets = [7, 0], sizes = [1, 256], strides = [1, 1]} : vector<9x256xf32> to vector<1x256xf32>
    %106 = vector.broadcast %104 : vector<32x1xf32> to vector<32x256xf32>
    %107 = vector.broadcast %105 : vector<1x256xf32> to vector<32x256xf32>
    %108 = arith.mulf %106, %107 : vector<32x256xf32>
    %109 = arith.addf %103, %108 : vector<32x256xf32>
    %110 = vector.extract_strided_slice %0 {offsets = [0, 8], sizes = [32, 1], strides = [1, 1]} : vector<32x9xf32> to vector<32x1xf32>
    %111 = vector.extract_strided_slice %62 {offsets = [8, 0], sizes = [1, 256], strides = [1, 1]} : vector<9x256xf32> to vector<1x256xf32>
    %112 = vector.broadcast %110 : vector<32x1xf32> to vector<32x256xf32>
    %113 = vector.broadcast %111 : vector<1x256xf32> to vector<32x256xf32>
    %114 = arith.mulf %112, %113 : vector<32x256xf32>
    %115 = arith.addf %109, %114 : vector<32x256xf32>
    %116 = vector.broadcast %1 : vector<32x1xf32> to vector<32x256xf32>
    %117 = arith.addf %115, %116 : vector<32x256xf32>
    %cst_10 = arith.constant 0.000000e+00 : f32
    %118 = vector.broadcast %cst_10 : f32 to vector<32x256xf32>
    %119 = arith.maximumf %117, %118 : vector<32x256xf32>
    %120 = arith.maximumf %60, %119 : vector<32x256xf32>
    %c0_11 = arith.constant 0 : index
    %c2 = arith.constant 2 : index
    %c0_12 = arith.constant 0 : index
    %c0_13 = arith.constant 0 : index
    %121 = vector.load %arg1[%c0_11, %c2, %c0_12, %c0_13] : memref<1x4x9x256xf32, #tpu.memory_space<vmem>>, vector<1x1x9x256xf32>
    %122 = vector.shape_cast %121 : vector<1x1x9x256xf32> to vector<9x256xf32>
    %123 = vector.extract_strided_slice %0 {offsets = [0, 0], sizes = [32, 1], strides = [1, 1]} : vector<32x9xf32> to vector<32x1xf32>
    %124 = vector.extract_strided_slice %122 {offsets = [0, 0], sizes = [1, 256], strides = [1, 1]} : vector<9x256xf32> to vector<1x256xf32>
    %125 = vector.broadcast %123 : vector<32x1xf32> to vector<32x256xf32>
    %126 = vector.broadcast %124 : vector<1x256xf32> to vector<32x256xf32>
    %127 = arith.mulf %125, %126 : vector<32x256xf32>
    %128 = vector.extract_strided_slice %0 {offsets = [0, 1], sizes = [32, 1], strides = [1, 1]} : vector<32x9xf32> to vector<32x1xf32>
    %129 = vector.extract_strided_slice %122 {offsets = [1, 0], sizes = [1, 256], strides = [1, 1]} : vector<9x256xf32> to vector<1x256xf32>
    %130 = vector.broadcast %128 : vector<32x1xf32> to vector<32x256xf32>
    %131 = vector.broadcast %129 : vector<1x256xf32> to vector<32x256xf32>
    %132 = arith.mulf %130, %131 : vector<32x256xf32>
    %133 = arith.addf %127, %132 : vector<32x256xf32>
    %134 = vector.extract_strided_slice %0 {offsets = [0, 2], sizes = [32, 1], strides = [1, 1]} : vector<32x9xf32> to vector<32x1xf32>
    %135 = vector.extract_strided_slice %122 {offsets = [2, 0], sizes = [1, 256], strides = [1, 1]} : vector<9x256xf32> to vector<1x256xf32>
    %136 = vector.broadcast %134 : vector<32x1xf32> to vector<32x256xf32>
    %137 = vector.broadcast %135 : vector<1x256xf32> to vector<32x256xf32>
    %138 = arith.mulf %136, %137 : vector<32x256xf32>
    %139 = arith.addf %133, %138 : vector<32x256xf32>
    %140 = vector.extract_strided_slice %0 {offsets = [0, 3], sizes = [32, 1], strides = [1, 1]} : vector<32x9xf32> to vector<32x1xf32>
    %141 = vector.extract_strided_slice %122 {offsets = [3, 0], sizes = [1, 256], strides = [1, 1]} : vector<9x256xf32> to vector<1x256xf32>
    %142 = vector.broadcast %140 : vector<32x1xf32> to vector<32x256xf32>
    %143 = vector.broadcast %141 : vector<1x256xf32> to vector<32x256xf32>
    %144 = arith.mulf %142, %143 : vector<32x256xf32>
    %145 = arith.addf %139, %144 : vector<32x256xf32>
    %146 = vector.extract_strided_slice %0 {offsets = [0, 4], sizes = [32, 1], strides = [1, 1]} : vector<32x9xf32> to vector<32x1xf32>
    %147 = vector.extract_strided_slice %122 {offsets = [4, 0], sizes = [1, 256], strides = [1, 1]} : vector<9x256xf32> to vector<1x256xf32>
    %148 = vector.broadcast %146 : vector<32x1xf32> to vector<32x256xf32>
    %149 = vector.broadcast %147 : vector<1x256xf32> to vector<32x256xf32>
    %150 = arith.mulf %148, %149 : vector<32x256xf32>
    %151 = arith.addf %145, %150 : vector<32x256xf32>
    %152 = vector.extract_strided_slice %0 {offsets = [0, 5], sizes = [32, 1], strides = [1, 1]} : vector<32x9xf32> to vector<32x1xf32>
    %153 = vector.extract_strided_slice %122 {offsets = [5, 0], sizes = [1, 256], strides = [1, 1]} : vector<9x256xf32> to vector<1x256xf32>
    %154 = vector.broadcast %152 : vector<32x1xf32> to vector<32x256xf32>
    %155 = vector.broadcast %153 : vector<1x256xf32> to vector<32x256xf32>
    %156 = arith.mulf %154, %155 : vector<32x256xf32>
    %157 = arith.addf %151, %156 : vector<32x256xf32>
    %158 = vector.extract_strided_slice %0 {offsets = [0, 6], sizes = [32, 1], strides = [1, 1]} : vector<32x9xf32> to vector<32x1xf32>
    %159 = vector.extract_strided_slice %122 {offsets = [6, 0], sizes = [1, 256], strides = [1, 1]} : vector<9x256xf32> to vector<1x256xf32>
    %160 = vector.broadcast %158 : vector<32x1xf32> to vector<32x256xf32>
    %161 = vector.broadcast %159 : vector<1x256xf32> to vector<32x256xf32>
    %162 = arith.mulf %160, %161 : vector<32x256xf32>
    %163 = arith.addf %157, %162 : vector<32x256xf32>
    %164 = vector.extract_strided_slice %0 {offsets = [0, 7], sizes = [32, 1], strides = [1, 1]} : vector<32x9xf32> to vector<32x1xf32>
    %165 = vector.extract_strided_slice %122 {offsets = [7, 0], sizes = [1, 256], strides = [1, 1]} : vector<9x256xf32> to vector<1x256xf32>
    %166 = vector.broadcast %164 : vector<32x1xf32> to vector<32x256xf32>
    %167 = vector.broadcast %165 : vector<1x256xf32> to vector<32x256xf32>
    %168 = arith.mulf %166, %167 : vector<32x256xf32>
    %169 = arith.addf %163, %168 : vector<32x256xf32>
    %170 = vector.extract_strided_slice %0 {offsets = [0, 8], sizes = [32, 1], strides = [1, 1]} : vector<32x9xf32> to vector<32x1xf32>
    %171 = vector.extract_strided_slice %122 {offsets = [8, 0], sizes = [1, 256], strides = [1, 1]} : vector<9x256xf32> to vector<1x256xf32>
    %172 = vector.broadcast %170 : vector<32x1xf32> to vector<32x256xf32>
    %173 = vector.broadcast %171 : vector<1x256xf32> to vector<32x256xf32>
    %174 = arith.mulf %172, %173 : vector<32x256xf32>
    %175 = arith.addf %169, %174 : vector<32x256xf32>
    %176 = vector.broadcast %1 : vector<32x1xf32> to vector<32x256xf32>
    %177 = arith.addf %175, %176 : vector<32x256xf32>
    %cst_14 = arith.constant 0.000000e+00 : f32
    %178 = vector.broadcast %cst_14 : f32 to vector<32x256xf32>
    %179 = arith.maximumf %177, %178 : vector<32x256xf32>
    %180 = arith.maximumf %120, %179 : vector<32x256xf32>
    %c0_15 = arith.constant 0 : index
    %c3 = arith.constant 3 : index
    %c0_16 = arith.constant 0 : index
    %c0_17 = arith.constant 0 : index
    %181 = vector.load %arg1[%c0_15, %c3, %c0_16, %c0_17] : memref<1x4x9x256xf32, #tpu.memory_space<vmem>>, vector<1x1x9x256xf32>
    %182 = vector.shape_cast %181 : vector<1x1x9x256xf32> to vector<9x256xf32>
    %183 = vector.extract_strided_slice %0 {offsets = [0, 0], sizes = [32, 1], strides = [1, 1]} : vector<32x9xf32> to vector<32x1xf32>
    %184 = vector.extract_strided_slice %182 {offsets = [0, 0], sizes = [1, 256], strides = [1, 1]} : vector<9x256xf32> to vector<1x256xf32>
    %185 = vector.broadcast %183 : vector<32x1xf32> to vector<32x256xf32>
    %186 = vector.broadcast %184 : vector<1x256xf32> to vector<32x256xf32>
    %187 = arith.mulf %185, %186 : vector<32x256xf32>
    %188 = vector.extract_strided_slice %0 {offsets = [0, 1], sizes = [32, 1], strides = [1, 1]} : vector<32x9xf32> to vector<32x1xf32>
    %189 = vector.extract_strided_slice %182 {offsets = [1, 0], sizes = [1, 256], strides = [1, 1]} : vector<9x256xf32> to vector<1x256xf32>
    %190 = vector.broadcast %188 : vector<32x1xf32> to vector<32x256xf32>
    %191 = vector.broadcast %189 : vector<1x256xf32> to vector<32x256xf32>
    %192 = arith.mulf %190, %191 : vector<32x256xf32>
    %193 = arith.addf %187, %192 : vector<32x256xf32>
    %194 = vector.extract_strided_slice %0 {offsets = [0, 2], sizes = [32, 1], strides = [1, 1]} : vector<32x9xf32> to vector<32x1xf32>
    %195 = vector.extract_strided_slice %182 {offsets = [2, 0], sizes = [1, 256], strides = [1, 1]} : vector<9x256xf32> to vector<1x256xf32>
    %196 = vector.broadcast %194 : vector<32x1xf32> to vector<32x256xf32>
    %197 = vector.broadcast %195 : vector<1x256xf32> to vector<32x256xf32>
    %198 = arith.mulf %196, %197 : vector<32x256xf32>
    %199 = arith.addf %193, %198 : vector<32x256xf32>
    %200 = vector.extract_strided_slice %0 {offsets = [0, 3], sizes = [32, 1], strides = [1, 1]} : vector<32x9xf32> to vector<32x1xf32>
    %201 = vector.extract_strided_slice %182 {offsets = [3, 0], sizes = [1, 256], strides = [1, 1]} : vector<9x256xf32> to vector<1x256xf32>
    %202 = vector.broadcast %200 : vector<32x1xf32> to vector<32x256xf32>
    %203 = vector.broadcast %201 : vector<1x256xf32> to vector<32x256xf32>
    %204 = arith.mulf %202, %203 : vector<32x256xf32>
    %205 = arith.addf %199, %204 : vector<32x256xf32>
    %206 = vector.extract_strided_slice %0 {offsets = [0, 4], sizes = [32, 1], strides = [1, 1]} : vector<32x9xf32> to vector<32x1xf32>
    %207 = vector.extract_strided_slice %182 {offsets = [4, 0], sizes = [1, 256], strides = [1, 1]} : vector<9x256xf32> to vector<1x256xf32>
    %208 = vector.broadcast %206 : vector<32x1xf32> to vector<32x256xf32>
    %209 = vector.broadcast %207 : vector<1x256xf32> to vector<32x256xf32>
    %210 = arith.mulf %208, %209 : vector<32x256xf32>
    %211 = arith.addf %205, %210 : vector<32x256xf32>
    %212 = vector.extract_strided_slice %0 {offsets = [0, 5], sizes = [32, 1], strides = [1, 1]} : vector<32x9xf32> to vector<32x1xf32>
    %213 = vector.extract_strided_slice %182 {offsets = [5, 0], sizes = [1, 256], strides = [1, 1]} : vector<9x256xf32> to vector<1x256xf32>
    %214 = vector.broadcast %212 : vector<32x1xf32> to vector<32x256xf32>
    %215 = vector.broadcast %213 : vector<1x256xf32> to vector<32x256xf32>
    %216 = arith.mulf %214, %215 : vector<32x256xf32>
    %217 = arith.addf %211, %216 : vector<32x256xf32>
    %218 = vector.extract_strided_slice %0 {offsets = [0, 6], sizes = [32, 1], strides = [1, 1]} : vector<32x9xf32> to vector<32x1xf32>
    %219 = vector.extract_strided_slice %182 {offsets = [6, 0], sizes = [1, 256], strides = [1, 1]} : vector<9x256xf32> to vector<1x256xf32>
    %220 = vector.broadcast %218 : vector<32x1xf32> to vector<32x256xf32>
    %221 = vector.broadcast %219 : vector<1x256xf32> to vector<32x256xf32>
    %222 = arith.mulf %220, %221 : vector<32x256xf32>
    %223 = arith.addf %217, %222 : vector<32x256xf32>
    %224 = vector.extract_strided_slice %0 {offsets = [0, 7], sizes = [32, 1], strides = [1, 1]} : vector<32x9xf32> to vector<32x1xf32>
    %225 = vector.extract_strided_slice %182 {offsets = [7, 0], sizes = [1, 256], strides = [1, 1]} : vector<9x256xf32> to vector<1x256xf32>
    %226 = vector.broadcast %224 : vector<32x1xf32> to vector<32x256xf32>
    %227 = vector.broadcast %225 : vector<1x256xf32> to vector<32x256xf32>
    %228 = arith.mulf %226, %227 : vector<32x256xf32>
    %229 = arith.addf %223, %228 : vector<32x256xf32>
    %230 = vector.extract_strided_slice %0 {offsets = [0, 8], sizes = [32, 1], strides = [1, 1]} : vector<32x9xf32> to vector<32x1xf32>
    %231 = vector.extract_strided_slice %182 {offsets = [8, 0], sizes = [1, 256], strides = [1, 1]} : vector<9x256xf32> to vector<1x256xf32>
    %232 = vector.broadcast %230 : vector<32x1xf32> to vector<32x256xf32>
    %233 = vector.broadcast %231 : vector<1x256xf32> to vector<32x256xf32>
    %234 = arith.mulf %232, %233 : vector<32x256xf32>
    %235 = arith.addf %229, %234 : vector<32x256xf32>
    %236 = vector.broadcast %1 : vector<32x1xf32> to vector<32x256xf32>
    %237 = arith.addf %235, %236 : vector<32x256xf32>
    %cst_18 = arith.constant 0.000000e+00 : f32
    %238 = vector.broadcast %cst_18 : f32 to vector<32x256xf32>
    %239 = arith.maximumf %237, %238 : vector<32x256xf32>
    %240 = arith.maximumf %180, %239 : vector<32x256xf32>
    %c0_19 = arith.constant 0 : index
    %c0_20 = arith.constant 0 : index
    %c0_21 = arith.constant 0 : index
    %241 = vector.load %arg4[%c0_19, %c0_20, %c0_21] : memref<1x32x256xf32, #tpu.memory_space<vmem>>, vector<1x32x256xf32>
    %242 = vector.shape_cast %241 : vector<1x32x256xf32> to vector<32x256xf32>
    %243 = vector.shape_cast %240 : vector<32x256xf32> to vector<1x32x256xf32>
    tpu.vector_store %arg4[%c0_19, %c0_20, %c0_21], %243 {strides = array<i32>} : memref<1x32x256xf32, #tpu.memory_space<vmem>>, vector<1x32x256xf32>,
    return
  }
  func.func @transform_0(%arg0: i32) -> (i32, i32, i32, i32) {
    %c0_i32 = arith.constant 0 : i32
    %c0_i32_0 = arith.constant 0 : i32
    %c0_i32_1 = arith.constant 0 : i32
    %c0_i32_2 = arith.constant 0 : i32
    return %arg0, %c0_i32, %c0_i32_0, %c0_i32_1 : i32, i32, i32, i32
  }
  func.func @transform_1(%arg0: i32) -> (i32, i32) {
    %c0_i32 = arith.constant 0 : i32
    %c0_i32_0 = arith.constant 0 : i32
    %c0_i32_1 = arith.constant 0 : i32
    return %c0_i32, %c0_i32_0 : i32, i32
  }
  func.func @transform_2(%arg0: i32) -> (i32, i32) {
    %c0_i32 = arith.constant 0 : i32
    %c0_i32_0 = arith.constant 0 : i32
    %c0_i32_1 = arith.constant 0 : i32
    return %c0_i32, %c0_i32_0 : i32, i32
  }
  func.func @transform_3(%arg0: i32) -> (i32, i32, i32) {
    %c0_i32 = arith.constant 0 : i32
    %c0_i32_0 = arith.constant 0 : i32
    %c0_i32_1 = arith.constant 0 : i32
    return %arg0, %c0_i32, %c0_i32_0 : i32, i32, i32
  }
}

module attributes {stable_mosaic.version = 11 : i64} {
  func.func @_conv2_avgpool_kernel(%arg0: i32, %arg1: memref<1x1x288x256xf32, #tpu.memory_space<vmem>>, %arg2: memref<64x288xf32, #tpu.memory_space<vmem>>, %arg3: memref<64x1xf32, #tpu.memory_space<vmem>>, %arg4: memref<1x64x256xf32, #tpu.memory_space<vmem>>) attributes {dimension_semantics = [#tpu.dimension_semantics<parallel>], iteration_bounds = array<i64: 2>, scalar_prefetch = 0 : i64, scratch_operands = 0 : i64, tpu.core_type = #tpu.core_type<tc>, window_params = [{transform_indices = @transform_0, window_bounds = array<i64: 1, 1, 288, 256>}, {pipeline_mode = #tpu.pipeline_mode<synchronous>, transform_indices = @transform_1, window_bounds = array<i64: 64, 288>}, {pipeline_mode = #tpu.pipeline_mode<synchronous>, transform_indices = @transform_2, window_bounds = array<i64: 64, 1>}, {transform_indices = @transform_3, window_bounds = array<i64: 1, 64, 256>}]} {
    %c0 = arith.constant 0 : index
    %c0_0 = arith.constant 0 : index
    %0 = vector.load %arg2[%c0, %c0_0] : memref<64x288xf32, #tpu.memory_space<vmem>>, vector<64x288xf32>
    %c0_1 = arith.constant 0 : index
    %c0_2 = arith.constant 0 : index
    %c0_3 = arith.constant 0 : index
    %c0_4 = arith.constant 0 : index
    %1 = vector.load %arg1[%c0_1, %c0_2, %c0_3, %c0_4] : memref<1x1x288x256xf32, #tpu.memory_space<vmem>>, vector<1x1x288x256xf32>
    %2 = vector.shape_cast %1 : vector<1x1x288x256xf32> to vector<288x256xf32>
    %cst = arith.constant dense<0.000000e+00> : vector<64x256xf32>
    %3 = tpu.matmul %0, %2, %cst {dimension_numbers = #tpu.dot_dimension_numbers<[1], [0], [0], [1], [0, 0, 1, 1], [], []>} : vector<64x288xf32>, vector<288x256xf32>, vector<64x256xf32> -> vector<64x256xf32>
    %cst_5 = arith.constant 1.000000e+00 : f32
    %4 = vector.broadcast %cst_5 : f32 to vector<64x256xf32>
    %5 = arith.mulf %3, %4 : vector<64x256xf32>
    %c0_6 = arith.constant 0 : index
    %c0_7 = arith.constant 0 : index
    %6 = vector.load %arg3[%c0_6, %c0_7] : memref<64x1xf32, #tpu.memory_space<vmem>>, vector<64x1xf32>
    %7 = vector.broadcast %6 : vector<64x1xf32> to vector<64x256xf32>
    %8 = arith.addf %5, %7 : vector<64x256xf32>
    %c0_8 = arith.constant 0 : index
    %c0_9 = arith.constant 0 : index
    %c0_10 = arith.constant 0 : index
    %9 = vector.load %arg4[%c0_8, %c0_9, %c0_10] : memref<1x64x256xf32, #tpu.memory_space<vmem>>, vector<1x64x256xf32>
    %10 = vector.shape_cast %9 : vector<1x64x256xf32> to vector<64x256xf32>
    %11 = vector.shape_cast %8 : vector<64x256xf32> to vector<1x64x256xf32>
    tpu.vector_store %arg4[%c0_8, %c0_9, %c0_10], %11 {strides = array<i32>} : memref<1x64x256xf32, #tpu.memory_space<vmem>>, vector<1x64x256xf32>,
    return
  }
  func.func @transform_0(%arg0: i32) -> (i32, i32, i32, i32) {
    %c0_i32 = arith.constant 0 : i32
    %c0_i32_0 = arith.constant 0 : i32
    %c0_i32_1 = arith.constant 0 : i32
    %c0_i32_2 = arith.constant 0 : i32
    return %arg0, %c0_i32, %c0_i32_0, %c0_i32_1 : i32, i32, i32, i32
  }
  func.func @transform_1(%arg0: i32) -> (i32, i32) {
    %c0_i32 = arith.constant 0 : i32
    %c0_i32_0 = arith.constant 0 : i32
    %c0_i32_1 = arith.constant 0 : i32
    return %c0_i32, %c0_i32_0 : i32, i32
  }
  func.func @transform_2(%arg0: i32) -> (i32, i32) {
    %c0_i32 = arith.constant 0 : i32
    %c0_i32_0 = arith.constant 0 : i32
    %c0_i32_1 = arith.constant 0 : i32
    return %c0_i32, %c0_i32_0 : i32, i32
  }
  func.func @transform_3(%arg0: i32) -> (i32, i32, i32) {
    %c0_i32 = arith.constant 0 : i32
    %c0_i32_0 = arith.constant 0 : i32
    %c0_i32_1 = arith.constant 0 : i32
    return %arg0, %c0_i32, %c0_i32_0 : i32, i32, i32
  }
}

module attributes {stable_mosaic.version = 11 : i64} {
  func.func @_fusion_kernel(%arg0: i32, %arg1: memref<8x4096xf32, #tpu.memory_space<vmem>>, %arg2: memref<128x4096xf32, #tpu.memory_space<vmem>>, %arg3: memref<8x6xf32, #tpu.memory_space<vmem>>, %arg4: memref<6x16xf32, #tpu.memory_space<vmem>>, %arg5: memref<1x16xf32, #tpu.memory_space<vmem>>, %arg6: memref<16x128xf32, #tpu.memory_space<vmem>>, %arg7: memref<1x128xf32, #tpu.memory_space<vmem>>, %arg8: memref<8x128xf32, #tpu.memory_space<vmem>>) attributes {dimension_semantics = [#tpu.dimension_semantics<arbitrary>], iteration_bounds = array<i64: 4>, scalar_prefetch = 0 : i64, scratch_operands = 0 : i64, tpu.core_type = #tpu.core_type<tc>, window_params = [{transform_indices = @transform_0, window_bounds = array<i64: 8, 4096>}, {transform_indices = @transform_1, window_bounds = array<i64: 128, 4096>}, {pipeline_mode = #tpu.pipeline_mode<synchronous>, transform_indices = @transform_2, window_bounds = array<i64: 8, 6>}, {pipeline_mode = #tpu.pipeline_mode<synchronous>, transform_indices = @transform_3, window_bounds = array<i64: 6, 16>}, {pipeline_mode = #tpu.pipeline_mode<synchronous>, transform_indices = @transform_4, window_bounds = array<i64: 1, 16>}, {pipeline_mode = #tpu.pipeline_mode<synchronous>, transform_indices = @transform_5, window_bounds = array<i64: 16, 128>}, {pipeline_mode = #tpu.pipeline_mode<synchronous>, transform_indices = @transform_6, window_bounds = array<i64: 1, 128>}, {pipeline_mode = #tpu.pipeline_mode<synchronous>, transform_indices = @transform_7, window_bounds = array<i64: 8, 128>}]} {
    %c0_i32 = arith.constant 0 : i32
    %0 = arith.cmpi eq, %arg0, %c0_i32 : i32
    %1 = arith.extui %0 : i1 to i32
    %c0_i32_0 = arith.constant 0 : i32
    %2 = arith.cmpi ne, %1, %c0_i32_0 : i32
    scf.if %2 {
      %c0_8 = arith.constant 0 : index
      %c0_9 = arith.constant 0 : index
      %9 = vector.load %arg3[%c0_8, %c0_9] : memref<8x6xf32, #tpu.memory_space<vmem>>, vector<8x6xf32>
      %c0_10 = arith.constant 0 : index
      %c0_11 = arith.constant 0 : index
      %10 = vector.load %arg4[%c0_10, %c0_11] : memref<6x16xf32, #tpu.memory_space<vmem>>, vector<6x16xf32>
      %11 = vector.extract_strided_slice %9 {offsets = [0, 0], sizes = [8, 1], strides = [1, 1]} : vector<8x6xf32> to vector<8x1xf32>
      %12 = vector.extract_strided_slice %10 {offsets = [0, 0], sizes = [1, 16], strides = [1, 1]} : vector<6x16xf32> to vector<1x16xf32>
      %13 = vector.broadcast %11 : vector<8x1xf32> to vector<8x16xf32>
      %14 = vector.broadcast %12 : vector<1x16xf32> to vector<8x16xf32>
      %15 = arith.mulf %13, %14 : vector<8x16xf32>
      %16 = vector.extract_strided_slice %9 {offsets = [0, 1], sizes = [8, 1], strides = [1, 1]} : vector<8x6xf32> to vector<8x1xf32>
      %17 = vector.extract_strided_slice %10 {offsets = [1, 0], sizes = [1, 16], strides = [1, 1]} : vector<6x16xf32> to vector<1x16xf32>
      %18 = vector.broadcast %16 : vector<8x1xf32> to vector<8x16xf32>
      %19 = vector.broadcast %17 : vector<1x16xf32> to vector<8x16xf32>
      %20 = arith.mulf %18, %19 : vector<8x16xf32>
      %21 = arith.addf %15, %20 : vector<8x16xf32>
      %22 = vector.extract_strided_slice %9 {offsets = [0, 2], sizes = [8, 1], strides = [1, 1]} : vector<8x6xf32> to vector<8x1xf32>
      %23 = vector.extract_strided_slice %10 {offsets = [2, 0], sizes = [1, 16], strides = [1, 1]} : vector<6x16xf32> to vector<1x16xf32>
      %24 = vector.broadcast %22 : vector<8x1xf32> to vector<8x16xf32>
      %25 = vector.broadcast %23 : vector<1x16xf32> to vector<8x16xf32>
      %26 = arith.mulf %24, %25 : vector<8x16xf32>
      %27 = arith.addf %21, %26 : vector<8x16xf32>
      %28 = vector.extract_strided_slice %9 {offsets = [0, 3], sizes = [8, 1], strides = [1, 1]} : vector<8x6xf32> to vector<8x1xf32>
      %29 = vector.extract_strided_slice %10 {offsets = [3, 0], sizes = [1, 16], strides = [1, 1]} : vector<6x16xf32> to vector<1x16xf32>
      %30 = vector.broadcast %28 : vector<8x1xf32> to vector<8x16xf32>
      %31 = vector.broadcast %29 : vector<1x16xf32> to vector<8x16xf32>
      %32 = arith.mulf %30, %31 : vector<8x16xf32>
      %33 = arith.addf %27, %32 : vector<8x16xf32>
      %34 = vector.extract_strided_slice %9 {offsets = [0, 4], sizes = [8, 1], strides = [1, 1]} : vector<8x6xf32> to vector<8x1xf32>
      %35 = vector.extract_strided_slice %10 {offsets = [4, 0], sizes = [1, 16], strides = [1, 1]} : vector<6x16xf32> to vector<1x16xf32>
      %36 = vector.broadcast %34 : vector<8x1xf32> to vector<8x16xf32>
      %37 = vector.broadcast %35 : vector<1x16xf32> to vector<8x16xf32>
      %38 = arith.mulf %36, %37 : vector<8x16xf32>
      %39 = arith.addf %33, %38 : vector<8x16xf32>
      %40 = vector.extract_strided_slice %9 {offsets = [0, 5], sizes = [8, 1], strides = [1, 1]} : vector<8x6xf32> to vector<8x1xf32>
      %41 = vector.extract_strided_slice %10 {offsets = [5, 0], sizes = [1, 16], strides = [1, 1]} : vector<6x16xf32> to vector<1x16xf32>
      %42 = vector.broadcast %40 : vector<8x1xf32> to vector<8x16xf32>
      %43 = vector.broadcast %41 : vector<1x16xf32> to vector<8x16xf32>
      %44 = arith.mulf %42, %43 : vector<8x16xf32>
      %45 = arith.addf %39, %44 : vector<8x16xf32>
      %c0_12 = arith.constant 0 : index
      %c0_13 = arith.constant 0 : index
      %46 = vector.load %arg5[%c0_12, %c0_13] : memref<1x16xf32, #tpu.memory_space<vmem>>, vector<1x16xf32>
      %47 = vector.broadcast %46 : vector<1x16xf32> to vector<8x16xf32>
      %48 = arith.addf %45, %47 : vector<8x16xf32>
      %cst_14 = arith.constant 0.000000e+00 : f32
      %49 = vector.broadcast %cst_14 : f32 to vector<8x16xf32>
      %50 = arith.maximumf %48, %49 : vector<8x16xf32>
      %c0_15 = arith.constant 0 : index
      %c0_16 = arith.constant 0 : index
      %51 = vector.load %arg6[%c0_15, %c0_16] : memref<16x128xf32, #tpu.memory_space<vmem>>, vector<16x128xf32>
      %52 = vector.extract_strided_slice %50 {offsets = [0, 0], sizes = [8, 1], strides = [1, 1]} : vector<8x16xf32> to vector<8x1xf32>
      %53 = vector.extract_strided_slice %51 {offsets = [0, 0], sizes = [1, 128], strides = [1, 1]} : vector<16x128xf32> to vector<1x128xf32>
      %54 = vector.broadcast %52 : vector<8x1xf32> to vector<8x128xf32>
      %55 = vector.broadcast %53 : vector<1x128xf32> to vector<8x128xf32>
      %56 = arith.mulf %54, %55 : vector<8x128xf32>
      %57 = vector.extract_strided_slice %50 {offsets = [0, 1], sizes = [8, 1], strides = [1, 1]} : vector<8x16xf32> to vector<8x1xf32>
      %58 = vector.extract_strided_slice %51 {offsets = [1, 0], sizes = [1, 128], strides = [1, 1]} : vector<16x128xf32> to vector<1x128xf32>
      %59 = vector.broadcast %57 : vector<8x1xf32> to vector<8x128xf32>
      %60 = vector.broadcast %58 : vector<1x128xf32> to vector<8x128xf32>
      %61 = arith.mulf %59, %60 : vector<8x128xf32>
      %62 = arith.addf %56, %61 : vector<8x128xf32>
      %63 = vector.extract_strided_slice %50 {offsets = [0, 2], sizes = [8, 1], strides = [1, 1]} : vector<8x16xf32> to vector<8x1xf32>
      %64 = vector.extract_strided_slice %51 {offsets = [2, 0], sizes = [1, 128], strides = [1, 1]} : vector<16x128xf32> to vector<1x128xf32>
      %65 = vector.broadcast %63 : vector<8x1xf32> to vector<8x128xf32>
      %66 = vector.broadcast %64 : vector<1x128xf32> to vector<8x128xf32>
      %67 = arith.mulf %65, %66 : vector<8x128xf32>
      %68 = arith.addf %62, %67 : vector<8x128xf32>
      %69 = vector.extract_strided_slice %50 {offsets = [0, 3], sizes = [8, 1], strides = [1, 1]} : vector<8x16xf32> to vector<8x1xf32>
      %70 = vector.extract_strided_slice %51 {offsets = [3, 0], sizes = [1, 128], strides = [1, 1]} : vector<16x128xf32> to vector<1x128xf32>
      %71 = vector.broadcast %69 : vector<8x1xf32> to vector<8x128xf32>
      %72 = vector.broadcast %70 : vector<1x128xf32> to vector<8x128xf32>
      %73 = arith.mulf %71, %72 : vector<8x128xf32>
      %74 = arith.addf %68, %73 : vector<8x128xf32>
      %75 = vector.extract_strided_slice %50 {offsets = [0, 4], sizes = [8, 1], strides = [1, 1]} : vector<8x16xf32> to vector<8x1xf32>
      %76 = vector.extract_strided_slice %51 {offsets = [4, 0], sizes = [1, 128], strides = [1, 1]} : vector<16x128xf32> to vector<1x128xf32>
      %77 = vector.broadcast %75 : vector<8x1xf32> to vector<8x128xf32>
      %78 = vector.broadcast %76 : vector<1x128xf32> to vector<8x128xf32>
      %79 = arith.mulf %77, %78 : vector<8x128xf32>
      %80 = arith.addf %74, %79 : vector<8x128xf32>
      %81 = vector.extract_strided_slice %50 {offsets = [0, 5], sizes = [8, 1], strides = [1, 1]} : vector<8x16xf32> to vector<8x1xf32>
      %82 = vector.extract_strided_slice %51 {offsets = [5, 0], sizes = [1, 128], strides = [1, 1]} : vector<16x128xf32> to vector<1x128xf32>
      %83 = vector.broadcast %81 : vector<8x1xf32> to vector<8x128xf32>
      %84 = vector.broadcast %82 : vector<1x128xf32> to vector<8x128xf32>
      %85 = arith.mulf %83, %84 : vector<8x128xf32>
      %86 = arith.addf %80, %85 : vector<8x128xf32>
      %87 = vector.extract_strided_slice %50 {offsets = [0, 6], sizes = [8, 1], strides = [1, 1]} : vector<8x16xf32> to vector<8x1xf32>
      %88 = vector.extract_strided_slice %51 {offsets = [6, 0], sizes = [1, 128], strides = [1, 1]} : vector<16x128xf32> to vector<1x128xf32>
      %89 = vector.broadcast %87 : vector<8x1xf32> to vector<8x128xf32>
      %90 = vector.broadcast %88 : vector<1x128xf32> to vector<8x128xf32>
      %91 = arith.mulf %89, %90 : vector<8x128xf32>
      %92 = arith.addf %86, %91 : vector<8x128xf32>
      %93 = vector.extract_strided_slice %50 {offsets = [0, 7], sizes = [8, 1], strides = [1, 1]} : vector<8x16xf32> to vector<8x1xf32>
      %94 = vector.extract_strided_slice %51 {offsets = [7, 0], sizes = [1, 128], strides = [1, 1]} : vector<16x128xf32> to vector<1x128xf32>
      %95 = vector.broadcast %93 : vector<8x1xf32> to vector<8x128xf32>
      %96 = vector.broadcast %94 : vector<1x128xf32> to vector<8x128xf32>
      %97 = arith.mulf %95, %96 : vector<8x128xf32>
      %98 = arith.addf %92, %97 : vector<8x128xf32>
      %99 = vector.extract_strided_slice %50 {offsets = [0, 8], sizes = [8, 1], strides = [1, 1]} : vector<8x16xf32> to vector<8x1xf32>
      %100 = vector.extract_strided_slice %51 {offsets = [8, 0], sizes = [1, 128], strides = [1, 1]} : vector<16x128xf32> to vector<1x128xf32>
      %101 = vector.broadcast %99 : vector<8x1xf32> to vector<8x128xf32>
      %102 = vector.broadcast %100 : vector<1x128xf32> to vector<8x128xf32>
      %103 = arith.mulf %101, %102 : vector<8x128xf32>
      %104 = arith.addf %98, %103 : vector<8x128xf32>
      %105 = vector.extract_strided_slice %50 {offsets = [0, 9], sizes = [8, 1], strides = [1, 1]} : vector<8x16xf32> to vector<8x1xf32>
      %106 = vector.extract_strided_slice %51 {offsets = [9, 0], sizes = [1, 128], strides = [1, 1]} : vector<16x128xf32> to vector<1x128xf32>
      %107 = vector.broadcast %105 : vector<8x1xf32> to vector<8x128xf32>
      %108 = vector.broadcast %106 : vector<1x128xf32> to vector<8x128xf32>
      %109 = arith.mulf %107, %108 : vector<8x128xf32>
      %110 = arith.addf %104, %109 : vector<8x128xf32>
      %111 = vector.extract_strided_slice %50 {offsets = [0, 10], sizes = [8, 1], strides = [1, 1]} : vector<8x16xf32> to vector<8x1xf32>
      %112 = vector.extract_strided_slice %51 {offsets = [10, 0], sizes = [1, 128], strides = [1, 1]} : vector<16x128xf32> to vector<1x128xf32>
      %113 = vector.broadcast %111 : vector<8x1xf32> to vector<8x128xf32>
      %114 = vector.broadcast %112 : vector<1x128xf32> to vector<8x128xf32>
      %115 = arith.mulf %113, %114 : vector<8x128xf32>
      %116 = arith.addf %110, %115 : vector<8x128xf32>
      %117 = vector.extract_strided_slice %50 {offsets = [0, 11], sizes = [8, 1], strides = [1, 1]} : vector<8x16xf32> to vector<8x1xf32>
      %118 = vector.extract_strided_slice %51 {offsets = [11, 0], sizes = [1, 128], strides = [1, 1]} : vector<16x128xf32> to vector<1x128xf32>
      %119 = vector.broadcast %117 : vector<8x1xf32> to vector<8x128xf32>
      %120 = vector.broadcast %118 : vector<1x128xf32> to vector<8x128xf32>
      %121 = arith.mulf %119, %120 : vector<8x128xf32>
      %122 = arith.addf %116, %121 : vector<8x128xf32>
      %123 = vector.extract_strided_slice %50 {offsets = [0, 12], sizes = [8, 1], strides = [1, 1]} : vector<8x16xf32> to vector<8x1xf32>
      %124 = vector.extract_strided_slice %51 {offsets = [12, 0], sizes = [1, 128], strides = [1, 1]} : vector<16x128xf32> to vector<1x128xf32>
      %125 = vector.broadcast %123 : vector<8x1xf32> to vector<8x128xf32>
      %126 = vector.broadcast %124 : vector<1x128xf32> to vector<8x128xf32>
      %127 = arith.mulf %125, %126 : vector<8x128xf32>
      %128 = arith.addf %122, %127 : vector<8x128xf32>
      %129 = vector.extract_strided_slice %50 {offsets = [0, 13], sizes = [8, 1], strides = [1, 1]} : vector<8x16xf32> to vector<8x1xf32>
      %130 = vector.extract_strided_slice %51 {offsets = [13, 0], sizes = [1, 128], strides = [1, 1]} : vector<16x128xf32> to vector<1x128xf32>
      %131 = vector.broadcast %129 : vector<8x1xf32> to vector<8x128xf32>
      %132 = vector.broadcast %130 : vector<1x128xf32> to vector<8x128xf32>
      %133 = arith.mulf %131, %132 : vector<8x128xf32>
      %134 = arith.addf %128, %133 : vector<8x128xf32>
      %135 = vector.extract_strided_slice %50 {offsets = [0, 14], sizes = [8, 1], strides = [1, 1]} : vector<8x16xf32> to vector<8x1xf32>
      %136 = vector.extract_strided_slice %51 {offsets = [14, 0], sizes = [1, 128], strides = [1, 1]} : vector<16x128xf32> to vector<1x128xf32>
      %137 = vector.broadcast %135 : vector<8x1xf32> to vector<8x128xf32>
      %138 = vector.broadcast %136 : vector<1x128xf32> to vector<8x128xf32>
      %139 = arith.mulf %137, %138 : vector<8x128xf32>
      %140 = arith.addf %134, %139 : vector<8x128xf32>
      %141 = vector.extract_strided_slice %50 {offsets = [0, 15], sizes = [8, 1], strides = [1, 1]} : vector<8x16xf32> to vector<8x1xf32>
      %142 = vector.extract_strided_slice %51 {offsets = [15, 0], sizes = [1, 128], strides = [1, 1]} : vector<16x128xf32> to vector<1x128xf32>
      %143 = vector.broadcast %141 : vector<8x1xf32> to vector<8x128xf32>
      %144 = vector.broadcast %142 : vector<1x128xf32> to vector<8x128xf32>
      %145 = arith.mulf %143, %144 : vector<8x128xf32>
      %146 = arith.addf %140, %145 : vector<8x128xf32>
      %c0_17 = arith.constant 0 : index
      %c0_18 = arith.constant 0 : index
      %147 = vector.load %arg7[%c0_17, %c0_18] : memref<1x128xf32, #tpu.memory_space<vmem>>, vector<1x128xf32>
      %148 = vector.broadcast %147 : vector<1x128xf32> to vector<8x128xf32>
      %149 = arith.addf %146, %148 : vector<8x128xf32>
      %c0_19 = arith.constant 0 : index
      %c0_20 = arith.constant 0 : index
      %150 = vector.load %arg8[%c0_19, %c0_20] : memref<8x128xf32, #tpu.memory_space<vmem>>, vector<8x128xf32>
      tpu.vector_store %arg8[%c0_19, %c0_20], %149 {strides = array<i32>} : memref<8x128xf32, #tpu.memory_space<vmem>>, vector<8x128xf32>,
    } else {
    }
    %c0 = arith.constant 0 : index
    %c0_1 = arith.constant 0 : index
    %3 = vector.load %arg8[%c0, %c0_1] : memref<8x128xf32, #tpu.memory_space<vmem>>, vector<8x128xf32>
    %c0_2 = arith.constant 0 : index
    %c0_3 = arith.constant 0 : index
    %4 = vector.load %arg1[%c0_2, %c0_3] : memref<8x4096xf32, #tpu.memory_space<vmem>>, vector<8x4096xf32>
    %c0_4 = arith.constant 0 : index
    %c0_5 = arith.constant 0 : index
    %5 = vector.load %arg2[%c0_4, %c0_5] : memref<128x4096xf32, #tpu.memory_space<vmem>>, vector<128x4096xf32>
    %cst = arith.constant dense<0.000000e+00> : vector<8x128xf32>
    %6 = tpu.matmul %4, %5, %cst {dimension_numbers = #tpu.dot_dimension_numbers<[1], [1], [0], [0], [0, 0, 1, 0], [], []>} : vector<8x4096xf32>, vector<128x4096xf32>, vector<8x128xf32> -> vector<8x128xf32>
    %7 = arith.addf %3, %6 : vector<8x128xf32>
    %c0_6 = arith.constant 0 : index
    %c0_7 = arith.constant 0 : index
    %8 = vector.load %arg8[%c0_6, %c0_7] : memref<8x128xf32, #tpu.memory_space<vmem>>, vector<8x128xf32>
    tpu.vector_store %arg8[%c0_6, %c0_7], %7 {strides = array<i32>} : memref<8x128xf32, #tpu.memory_space<vmem>>, vector<8x128xf32>,
    return
  }
  func.func @transform_0(%arg0: i32) -> (i32, i32) {
    %c0_i32 = arith.constant 0 : i32
    %c0_i32_0 = arith.constant 0 : i32
    return %c0_i32, %arg0 : i32, i32
  }
  func.func @transform_1(%arg0: i32) -> (i32, i32) {
    %c0_i32 = arith.constant 0 : i32
    %c0_i32_0 = arith.constant 0 : i32
    return %c0_i32, %arg0 : i32, i32
  }
  func.func @transform_2(%arg0: i32) -> (i32, i32) {
    %c0_i32 = arith.constant 0 : i32
    %c0_i32_0 = arith.constant 0 : i32
    %c0_i32_1 = arith.constant 0 : i32
    return %c0_i32, %c0_i32_0 : i32, i32
  }
  func.func @transform_3(%arg0: i32) -> (i32, i32) {
    %c0_i32 = arith.constant 0 : i32
    %c0_i32_0 = arith.constant 0 : i32
    %c0_i32_1 = arith.constant 0 : i32
    return %c0_i32, %c0_i32_0 : i32, i32
  }
  func.func @transform_4(%arg0: i32) -> (i32, i32) {
    %c0_i32 = arith.constant 0 : i32
    %c0_i32_0 = arith.constant 0 : i32
    %c0_i32_1 = arith.constant 0 : i32
    return %c0_i32, %c0_i32_0 : i32, i32
  }
  func.func @transform_5(%arg0: i32) -> (i32, i32) {
    %c0_i32 = arith.constant 0 : i32
    %c0_i32_0 = arith.constant 0 : i32
    %c0_i32_1 = arith.constant 0 : i32
    return %c0_i32, %c0_i32_0 : i32, i32
  }
  func.func @transform_6(%arg0: i32) -> (i32, i32) {
    %c0_i32 = arith.constant 0 : i32
    %c0_i32_0 = arith.constant 0 : i32
    %c0_i32_1 = arith.constant 0 : i32
    return %c0_i32, %c0_i32_0 : i32, i32
  }
  func.func @transform_7(%arg0: i32) -> (i32, i32) {
    %c0_i32 = arith.constant 0 : i32
    %c0_i32_0 = arith.constant 0 : i32
    %c0_i32_1 = arith.constant 0 : i32
    return %c0_i32, %c0_i32_0 : i32, i32
  }
}

</mosaic_0001>

<bundles_post_ra>
// kernel: eog_branch_forward.3
= control target key start
LH: loop header
LB: loop body
LE: loop exit
PB: predicated region body
PF: predicated region fallthrough
CT: control target
= control target key end

     0   :  { %s1456_s12 = smov 0   ;;  %s2680_s0 = inlined_call_operand.vmem [shape: f32[2,4,9,256], index: 0, kind: input, shape index: {}]   ;;  %s2681_s1 = inlined_call_operand.vmem [shape: f32[32,9], index: 1, kind: input, shape index: {}]   ;;  %s2682_s2 = inlined_call_operand.vmem [shape: f32[32,1], index: 2, kind: input, shape index: {}]   ;;  %s2683_s3 = inlined_call_operand.vmem [shape: f32[2,32,256], index: 3, kind: output, shape index: {}]  }
   0x1 LB: > { %s1349_s13 = sadd.s32 4294967295, %s1425_s12   ;;  %p1353_p0 = scmp.ge.s32.totalorder %s1425_s12, 1  ;;  %s1425_s12 = sphi %s1456_s12, %s13_s12  }
   0x2   : > { %p137_p1 = scmp.lt.s32.totalorder %s1425_s12, 3 }
   0x4   : > { %p138_p2 = pnand %p1353_p0, %p137_p1 }
   0x6   : > { %141 = sbr.rel (%p138_p2) target bundleno = 315 (0x13b), region = 32 }
   0xd   : > { %v1467_v0 = vld [vmem:[%s2681_s1 + $0x10] sm:$0xff]  ;;  %v1472_v1 = vld [vmem:[%s2681_s1] sm:$0xff]  ;;  %v1427_v2 = vmov 0   ;;  %v1481_v3 = vld [vmem:[%s2681_s1 + $0x18] sm:$0xff]  ;;  %v1428_v5 = vmov 1   ;;  %v1429_v6 = vmov 2   ;;  %v203_v17 = vlaneseq }
   0xe   : > { %1400 = vset.pattern.permute.xlu1 %v1427_v2  ;;  %1399 = vset.pattern.permute.xlu0 %v1427_v2  ;;  %v172_v4 = vld [vmem:[%s2681_s1 + $0x8] sm:$0xff]  ;;  %v1430_v7 = vmov 3   ;;  %v1431_v8 = vmov 4   ;;  %v1432_v9 = vmov 5   ;;  %v1433_v10 = vmov 6   ;;  %v175_v13 = vld [vmem:[%s2682_s2] sm:$0xff] }
   0xf   : > { %195 = vperm.xlu1 %1400, %v1467_v0   ;;  %185 = vperm.xlu0 %1399, %v1472_v1   ;;  %v1434_v11 = vmov 7   ;;  %v1435_v12 = vmov 8   ;;  %v178_v14 = vld [vmem:[%s2682_s2 + $0x18] sm:$0xff]  ;;  %v176_v15 = vld [vmem:[%s2682_s2 + $0x8] sm:$0xff]  ;;  %p161_p3 = scmp.lt.s32.totalorder %s1349_s13, 1  ;;  %v177_v16 = vld [vmem:[%s2682_s2 + $0x10] sm:$0xff] }
  0x10   : > { %v204_v18 = vshrl.u32 %v203_v17, 7 }
  0x11   : > { %s2915_s13 = smov (!%p161_p3, %s1349_s13), 1 }
  0x12   : > { %s1380_s30 = sshll.u32 %s2915_s13, 7  ;;  %v205_v19 = vsub.s32 0, %v204_v18  ;;  %v237_v25 = vsub.s32 1, %v204_v18  ;;  %v277_v34 = vsub.s32 2, %v204_v18  ;;  %v317_v42 = vsub.s32 3, %v204_v18  ;;  %s1381_s7 = sshll.u32 %s2915_s13, 6 }
  0x13   : > { %200 = vperm.xlu1 %1400, %v1481_v3   ;;  %190 = vperm.xlu0 %1399, %v172_v4   ;;  %s1535_s6 = scalar_lea.vmem %s2680_s0, %s1380_s30  ;;  %v357_v50 = vsub.s32 4, %v204_v18  ;;  %v397_v58 = vsub.s32 5, %v204_v18  ;;  %s2591_s10 = scalar_lea.vmem %s2683_s3, %s1381_s7 }
  0x14   : > { %v1538_v20 = vld [vmem:[%s1535_s6] sm:$0xff]  ;;  %v1541_v21 = vld [vmem:[%s1535_s6 + $0x8] sm:$0xff] }
  0x15   : > { %v1544_v22 = vld [vmem:[%s1535_s6 + $0x20] sm:$0xff]  ;;  %v1547_v23 = vld [vmem:[%s1535_s6 + $0x28] sm:$0xff]  ;;  %v1562_v29 = vrot.slane %v1538_v20, %v205_v19  ;;  %v1565_v30 = vrot.slane %v1541_v21, %v205_v19  ;;  %v1586_v38 = vrot.slane %v1538_v20, %v237_v25  ;;  %v1589_v39 = vrot.slane %v1541_v21, %v237_v25 }
  0x16   : > { %v1550_v24 = vld [vmem:[%s1535_s6 + $0x40] sm:$0xff]  ;;  %v1553_v26 = vld [vmem:[%s1535_s6 + $0x48] sm:$0xff]  ;;  %v1568_v31 = vrot.slane %v1544_v22, %v205_v19  ;;  %v1571_v32 = vrot.slane %v1547_v23, %v205_v19  ;;  %v1592_v40 = vrot.slane %v1544_v22, %v237_v25  ;;  %v1595_v41 = vrot.slane %v1547_v23, %v237_v25 }
  0x17   : > { %1402 = vset.pattern.permute.xlu1 %v1428_v5  ;;  %1401 = vset.pattern.permute.xlu0 %v1428_v5  ;;  %v1556_v27 = vld [vmem:[%s1535_s6 + $0x60] sm:$0xff]  ;;  %v1559_v28 = vld [vmem:[%s1535_s6 + $0x68] sm:$0xff]  ;;  %v1574_v33 = vrot.slane %v1550_v24, %v205_v19  ;;  %v1577_v35 = vrot.slane %v1553_v26, %v205_v19  ;;  %v1598_v43 = vrot.slane %v1550_v24, %v237_v25 }
  0x18   : > { %224 = vperm.xlu1 %1402, %v172_v4   ;;  %220 = vperm.xlu0 %1401, %v1472_v1   ;;  %v1580_v36 = vrot.slane %v1556_v27, %v205_v19  ;;  %v1583_v37 = vrot.slane %v1559_v28, %v205_v19  ;;  %v1601_v44 = vrot.slane %v1553_v26, %v237_v25 }
  0x19   : > { %v1604_v45 = vrot.slane %v1556_v27, %v237_v25  ;;  %v1607_v46 = vrot.slane %v1559_v28, %v237_v25  ;;  %v1610_v47 = vrot.slane %v1538_v20, %v277_v34  ;;  %v1613_v48 = vrot.slane %v1541_v21, %v277_v34 }
  0x1a   : > { %v1616_v49 = vrot.slane %v1544_v22, %v277_v34  ;;  %v1619_v51 = vrot.slane %v1547_v23, %v277_v34  ;;  %v1622_v52 = vrot.slane %v1550_v24, %v277_v34  ;;  %v1625_v53 = vrot.slane %v1553_v26, %v277_v34 }
  0x1b   : > { %v1628_v54 = vrot.slane %v1556_v27, %v277_v34  ;;  %v1631_v55 = vrot.slane %v1559_v28, %v277_v34  ;;  %v1634_v56 = vrot.slane %v1538_v20, %v317_v42  ;;  %v1637_v57 = vrot.slane %v1541_v21, %v317_v42 }
  0x1c   : > { %228 = vperm.xlu1 %1402, %v1467_v0   ;;  %232 = vperm.xlu0 %1401, %v1481_v3   ;;  %2728 = vst [vmem:[#allocation2_spill] sm:$0xff] %v1625_v53  ;;  %v1640_v59 = vrot.slane %v1544_v22, %v317_v42  ;;  %v1643_v60 = vrot.slane %v1547_v23, %v317_v42 }
  0x1d   : > { %2729 = vst [vmem:[#allocation3_spill] sm:$0xff] %v1628_v54  ;;  %2730 = vst [vmem:[#allocation4_spill] sm:$0xff] %v1631_v55  ;;  %v1646_v61 = vrot.slane %v1550_v24, %v317_v42  ;;  %v1649_v62 = vrot.slane %v1553_v26, %v317_v42  ;;  %v1652_v63 = vrot.slane %v1556_v27, %v317_v42 }
  0x1e   : > { %2731 = vst [vmem:[#allocation5_spill] sm:$0xff] %v1634_v56  ;;  %2732 = vst [vmem:[#allocation6_spill] sm:$0xff] %v1637_v57  ;;  %v1670_v5 = vrot.slane %v1550_v24, %v357_v50  ;;  %v1700_v17 = vrot.slane %v1556_v27, %v397_v58  ;;  %v1703_v19 = vrot.slane %v1559_v28, %v397_v58 }
  0x1f   : > { %2733 = vst [vmem:[#allocation7_spill] sm:$0xff] %v1640_v59  ;;  %2734 = vst [vmem:[#allocation8_spill] sm:$0xff] %v1643_v60 }
  0x20   : > { %1403 = vset.pattern.permute.xlu1 %v1429_v6  ;;  %1404 = vset.pattern.permute.xlu0 %v1429_v6  ;;  %2735 = vst [vmem:[#allocation9_spill] sm:$0xff] %v1646_v61  ;;  %2736 = vst [vmem:[#allocation10_spill] sm:$0xff] %v1649_v62  ;;  %v437_v6 = vsub.s32 6, %v204_v18 }
  0x21   : > { %260 = vperm.xlu1 %1403, %v1472_v1   ;;  %264 = vperm.xlu0 %1404, %v172_v4   ;;  %2737 = vst [vmem:[#allocation11_spill] sm:$0xff] %v1652_v63  ;;  %2743 = vst [vmem:[#allocation17_spill] sm:$0xff] %v1670_v5 }
  0x22   : > { %2753 = vst [vmem:[#allocation27_spill] sm:$0xff] %v1700_v17  ;;  %2754 = vst [vmem:[#allocation28_spill] sm:$0xff] %v1703_v19  ;;  %v1706_v25 = vrot.slane %v1538_v20, %v437_v6  ;;  %v1709_v34 = vrot.slane %v1541_v21, %v437_v6  ;;  %v1721_v17 = vrot.slane %v1553_v26, %v437_v6 }
  0x24   : > { %2755 = vst [vmem:[#allocation29_spill] sm:$0xff] %v1706_v25  ;;  %2756 = vst [vmem:[#allocation30_spill] sm:$0xff] %v1709_v34  ;;  %v1727_v25 = vrot.slane %v1559_v28, %v437_v6 }
  0x25   : > { %268 = vperm.xlu1 %1403, %v1467_v0   ;;  %1405 = vset.pattern.permute.xlu0 %v1430_v7  ;;  %2760 = vst [vmem:[#allocation34_spill] sm:$0xff] %v1721_v17 }
  0x26   : > { %300 = vperm.xlu0 %1405, %v1472_v1   ;;  %2762 = vst [vmem:[#allocation36_spill] sm:$0xff] %v1727_v25 }
  0x29   : > { %272 = vperm.xlu1 %1403, %v1481_v3  }
  0x2a   : > { %312 = vperm.xlu0 %1405, %v1481_v3  }
  0x2d   : > { %1406 = vset.pattern.permute.xlu1 %v1430_v7  ;;  %v1673_v7 = vrot.slane %v1553_v26, %v357_v50 }
  0x2e   : > { %304 = vperm.xlu1 %1406, %v172_v4   ;;  %1408 = vset.pattern.permute.xlu0 %v1431_v8 }
  0x2f   : > { %344 = vperm.xlu0 %1408, %v172_v4   ;;  %2744 = vst [vmem:[#allocation18_spill] sm:$0xff] %v1673_v7 }
  0x32   : > { %308 = vperm.xlu1 %1406, %v1467_v0  }
  0x33   : > { %1409 = vset.pattern.permute.xlu0 %v1432_v9 }
  0x34   : > { %380 = vperm.xlu0 %1409, %v1472_v1  }
  0x36   : > { %1407 = vset.pattern.permute.xlu1 %v1431_v8  ;;  %v1676_v8 = vrot.slane %v1556_v27, %v357_v50 }
  0x37   : > { %340 = vperm.xlu1 %1407, %v1472_v1  }
  0x38   : > { %392 = vperm.xlu0 %1409, %v1481_v3   ;;  %2745 = vst [vmem:[#allocation19_spill] sm:$0xff] %v1676_v8 }
  0x3b   : > { %348 = vperm.xlu1 %1407, %v1467_v0  }
  0x3c   : > { %1412 = vset.pattern.permute.xlu0 %v1433_v10 }
  0x3d   : > { %424 = vperm.xlu0 %1412, %v172_v4  }
  0x3f   : > { %352 = vperm.xlu1 %1407, %v1481_v3  }
  0x41   : > { %1413 = vset.pattern.permute.xlu0 %v1434_v11 }
  0x42   : > { %460 = vperm.xlu0 %1413, %v1472_v1  }
  0x43   : > { %1410 = vset.pattern.permute.xlu1 %v1432_v9  ;;  %v1679_v9 = vrot.slane %v1559_v28, %v357_v50 }
  0x44   : > { %384 = vperm.xlu1 %1410, %v172_v4  }
  0x45   : > { %2746 = vst [vmem:[#allocation20_spill] sm:$0xff] %v1679_v9 }
  0x46   : > { %472 = vperm.xlu0 %1413, %v1481_v3  }
  0x48   : > { %388 = vperm.xlu1 %1410, %v1467_v0  }
  0x4a   : > { %1416 = vset.pattern.permute.xlu0 %v1435_v12 }
  0x4b   : > { %504 = vperm.xlu0 %1416, %v172_v4  }
  0x4c   : > { %1411 = vset.pattern.permute.xlu1 %v1433_v10  ;;  %v1682_v10 = vrot.slane %v1538_v20, %v397_v58 }
  0x4d   : > { %420 = vperm.xlu1 %1411, %v1472_v1  }
  0x4e   : > { %2747 = vst [vmem:[#allocation21_spill] sm:$0xff] %v1682_v10 }
  0x4f   : > { %1417 = vset.pattern.permute.xlu0 %v1427_v2 }
  0x50   : > { %541 = vperm.xlu0 %1417, %v175_v13   ;;  %v1691_v13 = vrot.slane %v1547_v23, %v397_v58 }
  0x51   : > { %428 = vperm.xlu1 %1411, %v1467_v0  }
  0x52   : > { %2750 = vst [vmem:[#allocation24_spill] sm:$0xff] %v1691_v13 }
  0x54   : > { %556 = vperm.xlu0 %1417, %v178_v14   ;;  %v477_v14 = vsub.s32 7, %v204_v18  ;;  %v1712_v18 = vrot.slane %v1544_v22, %v437_v6 }
  0x55   : > { %432 = vperm.xlu1 %1411, %v1481_v3  }
  0x56   : > { %2757 = vst [vmem:[#allocation31_spill] sm:$0xff] %v1712_v18  ;;  %v1730_v34 = vrot.slane %v1538_v20, %v477_v14  ;;  %v1733_v18 = vrot.slane %v1541_v21, %v477_v14  ;;  %v1748_v25 = vrot.slane %v1556_v27, %v477_v14 }
  0x58   : > { %2763 = vst [vmem:[#allocation37_spill] sm:$0xff] %v1730_v34  ;;  %2764 = vst [vmem:[#allocation38_spill] sm:$0xff] %v1733_v18 }
  0x59   : > { %1414 = vset.pattern.permute.xlu1 %v1434_v11  ;;  %v1685_v11 = vrot.slane %v1541_v21, %v397_v58  ;;  %2769 = vst [vmem:[#allocation43_spill] sm:$0xff] %v1748_v25 }
  0x5a   : > { %464 = vperm.xlu1 %1414, %v172_v4   ;;  %v1667_v4 = vrot.slane %v1547_v23, %v357_v50 }
  0x5b   : > { %2748 = vst [vmem:[#allocation22_spill] sm:$0xff] %v1685_v11 }
  0x5c   : > { %2742 = vst [vmem:[#allocation16_spill] sm:$0xff] %v1667_v4 }
  0x5e   : > { %468 = vperm.xlu1 %1414, %v1467_v0  }
  0x62   : > { %1415 = vset.pattern.permute.xlu1 %v1435_v12  ;;  %v1688_v12 = vrot.slane %v1544_v22, %v397_v58 }
  0x63   : > { %500 = vperm.xlu1 %1415, %v1472_v1   ;;  %v1658_v1 = vrot.slane %v1538_v20, %v357_v50  ;;  %v1751_v20 = vrot.slane %v1559_v28, %v477_v14 }
  0x64   : > { %2749 = vst [vmem:[#allocation23_spill] sm:$0xff] %v1688_v12 }
  0x65   : > { %2739 = vst [vmem:[#allocation13_spill] sm:$0xff] %v1658_v1  ;;  %2770 = vst [vmem:[#allocation44_spill] sm:$0xff] %v1751_v20 }
  0x67   : > { %508 = vperm.xlu1 %1415, %v1467_v0   ;;  %v1655_v0 = vrot.slane %v1559_v28, %v317_v42  ;;  %v1715_v42 = vrot.slane %v1547_v23, %v437_v6 }
  0x69   : > { %2738 = vst [vmem:[#allocation12_spill] sm:$0xff] %v1655_v0  ;;  %2758 = vst [vmem:[#allocation32_spill] sm:$0xff] %v1715_v42  ;;  %v1736_v42 = vrot.slane %v1544_v22, %v477_v14 }
  0x6b   : > { %512 = vperm.xlu1 %1415, %v1481_v3   ;;  %v1664_v3 = vrot.slane %v1544_v22, %v357_v50  ;;  %2765 = vst [vmem:[#allocation39_spill] sm:$0xff] %v1736_v42 }
  0x6d   : > { %2741 = vst [vmem:[#allocation15_spill] sm:$0xff] %v1664_v3 }
  0x6f   : > { %1418 = vset.pattern.permute.xlu1 %v1427_v2  ;;  %v1661_v2 = vrot.slane %v1541_v21, %v357_v50  ;;  %v1718_v50 = vrot.slane %v1550_v24, %v437_v6 }
  0x70   : > { %546 = vperm.xlu1 %1418, %v176_v15   ;;  %v1694_v15 = vrot.slane %v1550_v24, %v397_v58 }
  0x71   : > { %2740 = vst [vmem:[#allocation14_spill] sm:$0xff] %v1661_v2  ;;  %2759 = vst [vmem:[#allocation33_spill] sm:$0xff] %v1718_v50  ;;  %v1739_v50 = vrot.slane %v1547_v23, %v477_v14 }
  0x72   : > { %2751 = vst [vmem:[#allocation25_spill] sm:$0xff] %v1694_v15 }
  0x73   : > { %2766 = vst [vmem:[#allocation40_spill] sm:$0xff] %v1739_v50 }
  0x74   : > { %551 = vperm.xlu1 %1418, %v177_v16   ;;  %v1697_v16 = vrot.slane %v1553_v26, %v397_v58  ;;  %v1724_v58 = vrot.slane %v1556_v27, %v437_v6  ;;  %v1745_v6 = vrot.slane %v1553_v26, %v477_v14 }
  0x76   : > { %2752 = vst [vmem:[#allocation26_spill] sm:$0xff] %v1697_v16  ;;  %2761 = vst [vmem:[#allocation35_spill] sm:$0xff] %v1724_v58  ;;  %v1742_v16 = vrot.slane %v1550_v24, %v477_v14 }
  0x77   : > { %2768 = vst [vmem:[#allocation42_spill] sm:$0xff] %v1745_v6 }
  0x78   : > { %2767 = vst [vmem:[#allocation41_spill] sm:$0xff] %v1742_v16 }
  0x8e   : > { %v196_v19 = vpop.permute.xlu1 %195  ;;  %v186_v17 = vpop.permute.xlu0 %185 }
  0x8f   : > { %v1754_v21 = vmul.f32 %v1562_v29, %v196_v19  ;;  %v1757_v22 = vmul.f32 %v1565_v30, %v196_v19  ;;  %v1760_v23 = vmul.f32 %v1568_v31, %v196_v19  ;;  %v1763_v24 = vmul.f32 %v1571_v32, %v196_v19 }
  0x90   : > { %v1766_v26 = vmul.f32 %v1574_v33, %v196_v19  ;;  %v1769_v27 = vmul.f32 %v1577_v35, %v196_v19  ;;  %v1772_v28 = vmul.f32 %v1580_v36, %v196_v19  ;;  %v1775_v14 = vmul.f32 %v1583_v37, %v196_v19 }
  0x91   : > { %v211_v20 = vmul.f32 %v1562_v29, %v186_v17  ;;  %v212_v25 = vmul.f32 %v1565_v30, %v186_v17  ;;  %v588_v6 = vmul.f32 %v1568_v31, %v186_v17  ;;  %v589_v16 = vmul.f32 %v1571_v32, %v186_v17 }
  0x92   : > { %v201_v50 = vpop.permute.xlu1 %200  ;;  %v825_v42 = vmul.f32 %v1574_v33, %v186_v17  ;;  %v826_v18 = vmul.f32 %v1577_v35, %v186_v17  ;;  %v1062_v34 = vmul.f32 %v1580_v36, %v186_v17  ;;  %v1063_v58 = vmul.f32 %v1583_v37, %v186_v17  ;;  %v191_v8 = vpop.permute.xlu0 %190 }
  0x93   : > { %v1786_v19 = vmul.f32 %v1562_v29, %v201_v50  ;;  %v1789_v15 = vmul.f32 %v1565_v30, %v201_v50  ;;  %v1792_v13 = vmul.f32 %v1568_v31, %v201_v50  ;;  %v1795_v12 = vmul.f32 %v1571_v32, %v201_v50 }
  0x94   : > { %v1798_v11 = vmul.f32 %v1574_v33, %v201_v50  ;;  %v1801_v10 = vmul.f32 %v1577_v35, %v201_v50  ;;  %v1804_v17 = vmul.f32 %v1580_v36, %v201_v50  ;;  %v1807_v9 = vmul.f32 %v1583_v37, %v201_v50 }
  0x95   : > { %v213_v7 = vmul.f32 %v1562_v29, %v191_v8  ;;  %v214_v5 = vmul.f32 %v1565_v30, %v191_v8  ;;  %v590_v4 = vmul.f32 %v1568_v31, %v191_v8  ;;  %v591_v3 = vmul.f32 %v1571_v32, %v191_v8 }
  0x96   : > { %v827_v2 = vmul.f32 %v1574_v33, %v191_v8  ;;  %v828_v1 = vmul.f32 %v1577_v35, %v191_v8  ;;  %v1064_v0 = vmul.f32 %v1580_v36, %v191_v8  ;;  %v1065_v63 = vmul.f32 %v1583_v37, %v191_v8 }
  0x97   : > { %v225_v62 = vpop.permute.xlu1 %224  ;;  %v221_v54 = vpop.permute.xlu0 %220 }
  0x98   : > { %v245_v50 = vmul.f32 %v1586_v38, %v225_v62  ;;  %v246_v61 = vmul.f32 %v1589_v39, %v225_v62  ;;  %v606_v29 = vmul.f32 %v1592_v40, %v225_v62  ;;  %v607_v30 = vmul.f32 %v1595_v41, %v225_v62 }
  0x99   : > { %v843_v31 = vmul.f32 %v1598_v43, %v225_v62  ;;  %v844_v32 = vmul.f32 %v1601_v44, %v225_v62  ;;  %v1080_v33 = vmul.f32 %v1604_v45, %v225_v62  ;;  %v1081_v35 = vmul.f32 %v1607_v46, %v225_v62 }
  0x9a   : > { %v1825_v36 = vadd.f32 %v245_v50, %v213_v7  ;;  %v1827_v37 = vadd.f32 %v246_v61, %v214_v5  ;;  %v1829_v8 = vadd.f32 %v606_v29, %v590_v4  ;;  %v1831_v60 = vadd.f32 %v607_v30, %v591_v3 }
  0x9b   : > { %v1833_v59 = vadd.f32 %v843_v31, %v827_v2  ;;  %v1835_v57 = vadd.f32 %v844_v32, %v828_v1  ;;  %v1837_v56 = vadd.f32 %v1080_v33, %v1064_v0  ;;  %v1839_v55 = vadd.f32 %v1081_v35, %v1065_v63  ;;  %v229_v5 = vpop.permute.xlu1 %228 }
  0x9c   : > { %v243_v53 = vmul.f32 %v1586_v38, %v221_v54  ;;  %v244_v62 = vmul.f32 %v1589_v39, %v221_v54  ;;  %v604_v61 = vmul.f32 %v1592_v40, %v221_v54  ;;  %v605_v4 = vmul.f32 %v1595_v41, %v221_v54 }
  0x9d   : > { %2771 = vst [vmem:[#allocation45_spill] sm:$0xff] %v1833_v59  ;;  %2772 = vst [vmem:[#allocation46_spill] sm:$0xff] %v1835_v57  ;;  %v841_v3 = vmul.f32 %v1598_v43, %v221_v54  ;;  %v842_v2 = vmul.f32 %v1601_v44, %v221_v54  ;;  %v1078_v1 = vmul.f32 %v1604_v45, %v221_v54 }
  0x9e   : > { %2773 = vst [vmem:[#allocation47_spill] sm:$0xff] %v1837_v56  ;;  %2774 = vst [vmem:[#allocation48_spill] sm:$0xff] %v1839_v55  ;;  %v1079_v0 = vmul.f32 %v1607_v46, %v221_v54  ;;  %v251_v63 = vadd.f32 %v243_v53, %v211_v20  ;;  %v252_v7 = vadd.f32 %v244_v62, %v212_v25  ;;  %v233_v25 = vpop.permute.xlu0 %232 }
  0x9f   : > { %v612_v50 = vadd.f32 %v604_v61, %v588_v6  ;;  %v613_v29 = vadd.f32 %v605_v4, %v589_v16  ;;  %v849_v30 = vadd.f32 %v841_v3, %v825_v42  ;;  %v850_v31 = vadd.f32 %v842_v2, %v826_v18 }
  0xa0   : > { %v1086_v32 = vadd.f32 %v1078_v1, %v1062_v34  ;;  %v1087_v33 = vadd.f32 %v1079_v0, %v1063_v58  ;;  %v247_v35 = vmul.f32 %v1586_v38, %v229_v5  ;;  %v248_v55 = vmul.f32 %v1589_v39, %v229_v5  ;;  %v261_v6 = vpop.permute.xlu1 %260 }
  0xa1   : > { %v608_v56 = vmul.f32 %v1592_v40, %v229_v5  ;;  %v609_v57 = vmul.f32 %v1595_v41, %v229_v5  ;;  %v845_v59 = vmul.f32 %v1598_v43, %v229_v5  ;;  %v846_v54 = vmul.f32 %v1601_v44, %v229_v5 }
  0xa2   : > { %v1082_v53 = vmul.f32 %v1604_v45, %v229_v5  ;;  %v1083_v16 = vmul.f32 %v1607_v46, %v229_v5  ;;  %v1858_v34 = vadd.f32 %v247_v35, %v1754_v21  ;;  %v1861_v18 = vadd.f32 %v248_v55, %v1757_v22  ;;  %v265_v3 = vpop.permute.xlu0 %264 }
  0xa3   : > { %v1864_v42 = vadd.f32 %v608_v56, %v1760_v23  ;;  %v1867_v58 = vadd.f32 %v609_v57, %v1763_v24  ;;  %v1870_v20 = vadd.f32 %v845_v59, %v1766_v26  ;;  %v1873_v62 = vadd.f32 %v846_v54, %v1769_v27 }
  0xa4   : > { %v1876_v61 = vadd.f32 %v1082_v53, %v1772_v28  ;;  %v1879_v21 = vadd.f32 %v1083_v16, %v1775_v14  ;;  %v249_v55 = vmul.f32 %v1586_v38, %v233_v25  ;;  %v250_v56 = vmul.f32 %v1589_v39, %v233_v25  ;;  %v2775_v14 = vld [vmem:[#allocation2_spill] sm:$0xff] }
  0xa5   : > { %v610_v57 = vmul.f32 %v1592_v40, %v233_v25  ;;  %v611_v22 = vmul.f32 %v1595_v41, %v233_v25  ;;  %v847_v59 = vmul.f32 %v1598_v43, %v233_v25  ;;  %v848_v23 = vmul.f32 %v1601_v44, %v233_v25 }
  0xa6   : > { %v1084_v24 = vmul.f32 %v1604_v45, %v233_v25  ;;  %v1085_v26 = vmul.f32 %v1607_v46, %v233_v25  ;;  %v1890_v27 = vadd.f32 %v249_v55, %v1786_v19  ;;  %v1893_v28 = vadd.f32 %v250_v56, %v1789_v15  ;;  %v269_v15 = vpop.permute.xlu1 %268  ;;  %v2776_v19 = vld [vmem:[#allocation3_spill] sm:$0xff] }
  0xa7   : > { %v1896_v38 = vadd.f32 %v610_v57, %v1792_v13  ;;  %v1899_v39 = vadd.f32 %v611_v22, %v1795_v12  ;;  %v1902_v40 = vadd.f32 %v847_v59, %v1798_v11  ;;  %v1905_v41 = vadd.f32 %v848_v23, %v1801_v10  ;;  %v2779_v23 = vld [vmem:[#allocation46_spill] sm:$0xff] }
  0xa8   : > { %v1908_v43 = vadd.f32 %v1084_v24, %v1804_v17  ;;  %v1911_v44 = vadd.f32 %v1085_v26, %v1807_v9  ;;  %v283_v45 = vmul.f32 %v1610_v47, %v261_v6  ;;  %v284_v46 = vmul.f32 %v1613_v48, %v261_v6  ;;  %v2777_v17 = vld [vmem:[#allocation4_spill] sm:$0xff]  ;;  %v2780_v26 = vld [vmem:[#allocation47_spill] sm:$0xff] }
  0xa9   : > { %v628_v13 = vmul.f32 %v1616_v49, %v261_v6  ;;  %v629_v12 = vmul.f32 %v1619_v51, %v261_v6  ;;  %v865_v11 = vmul.f32 %v1622_v52, %v261_v6  ;;  %v866_v10 = vmul.f32 %v2775_v14, %v261_v6 }
  0xaa   : > { %v1102_v4 = vmul.f32 %v2776_v19, %v261_v6  ;;  %v1103_v5 = vmul.f32 %v2777_v17, %v261_v6  ;;  %v291_v9 = vadd.f32 %v283_v45, %v251_v63  ;;  %v292_v2 = vadd.f32 %v284_v46, %v252_v7 }
  0xab   : > { %v636_v1 = vadd.f32 %v628_v13, %v612_v50  ;;  %v637_v0 = vadd.f32 %v629_v12, %v613_v29  ;;  %v873_v35 = vadd.f32 %v865_v11, %v849_v30  ;;  %v874_v54 = vadd.f32 %v866_v10, %v850_v31 }
  0xac   : > { %v1110_v53 = vadd.f32 %v1102_v4, %v1086_v32  ;;  %v1111_v16 = vadd.f32 %v1103_v5, %v1087_v33  ;;  %v285_v25 = vmul.f32 %v1610_v47, %v265_v3  ;;  %v286_v55 = vmul.f32 %v1613_v48, %v265_v3  ;;  %v273_v32 = vpop.permute.xlu1 %272  ;;  %v2778_v33 = vld [vmem:[#allocation45_spill] sm:$0xff]  ;;  %v301_v5 = vpop.permute.xlu0 %300 }
  0xad   : > { %v630_v56 = vmul.f32 %v1616_v49, %v265_v3  ;;  %v631_v57 = vmul.f32 %v1619_v51, %v265_v3  ;;  %v867_v22 = vmul.f32 %v1622_v52, %v265_v3  ;;  %v868_v6 = vmul.f32 %v2775_v14, %v265_v3 }
  0xae   : > { %v1104_v63 = vmul.f32 %v2776_v19, %v265_v3  ;;  %v1105_v7 = vmul.f32 %v2777_v17, %v265_v3  ;;  %v1930_v50 = vadd.f32 %v285_v25, %v1825_v36  ;;  %v1933_v29 = vadd.f32 %v286_v55, %v1827_v37  ;;  %v2781_v36 = vld [vmem:[#allocation48_spill] sm:$0xff] }
  0xaf   : > { %v1936_v30 = vadd.f32 %v630_v56, %v1829_v8  ;;  %v1939_v31 = vadd.f32 %v631_v57, %v1831_v60  ;;  %v1942_v59 = vadd.f32 %v867_v22, %v2778_v33  ;;  %v1945_v24 = vadd.f32 %v868_v6, %v2779_v23 }
  0xb0   : > { %v1948_v45 = vadd.f32 %v1104_v63, %v2780_v26  ;;  %v1951_v46 = vadd.f32 %v1105_v7, %v2781_v36  ;;  %v287_v37 = vmul.f32 %v1610_v47, %v269_v15  ;;  %v288_v8 = vmul.f32 %v1613_v48, %v269_v15  ;;  %v2787_v63 = vld [vmem:[#allocation6_spill] sm:$0xff]  ;;  %v2788_v7 = vld [vmem:[#allocation7_spill] sm:$0xff]  ;;  %v305_v26 = vpop.permute.xlu1 %304 }
  0xb1   : > { %v632_v60 = vmul.f32 %v1616_v49, %v269_v15  ;;  %v633_v13 = vmul.f32 %v1619_v51, %v269_v15  ;;  %v869_v12 = vmul.f32 %v1622_v52, %v269_v15  ;;  %v870_v11 = vmul.f32 %v2775_v14, %v269_v15 }
  0xb2   : > { %v1106_v10 = vmul.f32 %v2776_v19, %v269_v15  ;;  %v1107_v4 = vmul.f32 %v2777_v17, %v269_v15  ;;  %v1962_v3 = vadd.f32 %v287_v37, %v1858_v34  ;;  %v1965_v25 = vadd.f32 %v288_v8, %v1861_v18  ;;  %v2786_v18 = vld [vmem:[#allocation5_spill] sm:$0xff]  ;;  %v2791_v37 = vld [vmem:[#allocation10_spill] sm:$0xff]  ;;  %v2792_v8 = vld [vmem:[#allocation11_spill] sm:$0xff] }
  0xb3   : > { %v1968_v55 = vadd.f32 %v632_v60, %v1864_v42  ;;  %v1971_v56 = vadd.f32 %v633_v13, %v1867_v58  ;;  %v1974_v57 = vadd.f32 %v869_v12, %v1870_v20  ;;  %v1977_v22 = vadd.f32 %v870_v11, %v1873_v62  ;;  %v2789_v58 = vld [vmem:[#allocation8_spill] sm:$0xff]  ;;  %v2790_v20 = vld [vmem:[#allocation9_spill] sm:$0xff] }
  0xb4   : > { %v1980_v15 = vadd.f32 %v1106_v10, %v1876_v61  ;;  %v1983_v34 = vadd.f32 %v1107_v4, %v1879_v21  ;;  %v323_v6 = vmul.f32 %v2786_v18, %v301_v5  ;;  %v324_v42 = vmul.f32 %v2787_v63, %v301_v5  ;;  %v2793_v61 = vld [vmem:[#allocation12_spill] sm:$0xff] }
  0xb5   : > { %2782 = vst [vmem:[#allocation2_spill] sm:$0xff] %v1974_v57  ;;  %2783 = vst [vmem:[#allocation3_spill] sm:$0xff] %v1977_v22  ;;  %v652_v33 = vmul.f32 %v2788_v7, %v301_v5  ;;  %v653_v23 = vmul.f32 %v2789_v58, %v301_v5  ;;  %v889_v36 = vmul.f32 %v2790_v20, %v301_v5 }
  0xb6   : > { %2784 = vst [vmem:[#allocation4_spill] sm:$0xff] %v1980_v15  ;;  %2785 = vst [vmem:[#allocation45_spill] sm:$0xff] %v1983_v34  ;;  %v890_v62 = vmul.f32 %v2791_v37, %v301_v5  ;;  %v1126_v60 = vmul.f32 %v2792_v8, %v301_v5  ;;  %v1127_v13 = vmul.f32 %v2793_v61, %v301_v5 }
  0xb7   : > { %v1993_v12 = vadd.f32 %v323_v6, %v291_v9  ;;  %v1995_v21 = vadd.f32 %v324_v42, %v292_v2  ;;  %v1997_v11 = vadd.f32 %v652_v33, %v636_v1  ;;  %v1999_v10 = vadd.f32 %v653_v23, %v637_v0 }
  0xb8   : > { %v2001_v4 = vadd.f32 %v889_v36, %v873_v35  ;;  %v2003_v34 = vadd.f32 %v890_v62, %v874_v54  ;;  %v2005_v15 = vadd.f32 %v1126_v60, %v1110_v53  ;;  %v2007_v22 = vadd.f32 %v1127_v13, %v1111_v16  ;;  %v313_v53 = vpop.permute.xlu0 %312 }
  0xb9   : > { %v289_v57 = vmul.f32 %v1610_v47, %v273_v32  ;;  %v290_v5 = vmul.f32 %v1613_v48, %v273_v32  ;;  %v634_v9 = vmul.f32 %v1616_v49, %v273_v32  ;;  %v635_v2 = vmul.f32 %v1619_v51, %v273_v32  ;;  %v2021_v49 = vpop.permute.xlu1 %308 }
  0xba   : > { %v871_v1 = vmul.f32 %v1622_v52, %v273_v32  ;;  %v872_v0 = vmul.f32 %v2775_v14, %v273_v32  ;;  %v1108_v35 = vmul.f32 %v2776_v19, %v273_v32  ;;  %v1109_v54 = vmul.f32 %v2777_v17, %v273_v32 }
  0xbb   : > { %v297_v16 = vadd.f32 %v289_v57, %v1890_v27  ;;  %v298_v6 = vadd.f32 %v290_v5, %v1893_v28  ;;  %v642_v47 = vadd.f32 %v634_v9, %v1896_v38  ;;  %v643_v48 = vadd.f32 %v635_v2, %v1899_v39 }
  0xbc   : > { %v879_v51 = vadd.f32 %v871_v1, %v1902_v40  ;;  %v880_v52 = vadd.f32 %v872_v0, %v1905_v41  ;;  %v1116_v14 = vadd.f32 %v1108_v35, %v1908_v43  ;;  %v1117_v19 = vadd.f32 %v1109_v54, %v1911_v44 }
  0xbd   : > { %v329_v17 = vmul.f32 %v2786_v18, %v313_v53  ;;  %v330_v27 = vmul.f32 %v2787_v63, %v313_v53  ;;  %v658_v28 = vmul.f32 %v2788_v7, %v313_v53  ;;  %v659_v38 = vmul.f32 %v2789_v58, %v313_v53  ;;  %v341_v2 = vpop.permute.xlu1 %340 }
  0xbe   : > { %v895_v39 = vmul.f32 %v2790_v20, %v313_v53  ;;  %v896_v32 = vmul.f32 %v2791_v37, %v313_v53  ;;  %v1132_v40 = vmul.f32 %v2792_v8, %v313_v53  ;;  %v1133_v41 = vmul.f32 %v2793_v61, %v313_v53  ;;  %v345_v53 = vpop.permute.xlu0 %344 }
  0xbf   : > { %v2035_v57 = vadd.f32 %v329_v17, %v297_v16  ;;  %v2037_v43 = vadd.f32 %v330_v27, %v298_v6  ;;  %v2039_v44 = vadd.f32 %v658_v28, %v642_v47  ;;  %v2041_v42 = vadd.f32 %v659_v38, %v643_v48  ;;  %v2794_v17 = vld [vmem:[#allocation13_spill] sm:$0xff]  ;;  %v2796_v38 = vld [vmem:[#allocation15_spill] sm:$0xff] }
  0xc0   : > { %v2043_v33 = vadd.f32 %v895_v39, %v879_v51  ;;  %v2045_v23 = vadd.f32 %v896_v32, %v880_v52  ;;  %v2047_v36 = vadd.f32 %v1132_v40, %v1116_v14  ;;  %v2049_v62 = vadd.f32 %v1133_v41, %v1117_v19  ;;  %v2797_v39 = vld [vmem:[#allocation16_spill] sm:$0xff]  ;;  %v2798_v32 = vld [vmem:[#allocation17_spill] sm:$0xff]  ;;  %v2799_v40 = vld [vmem:[#allocation18_spill] sm:$0xff] }
  0xc1   : > { %v325_v60 = vmul.f32 %v2786_v18, %v305_v26  ;;  %v326_v13 = vmul.f32 %v2787_v63, %v305_v26  ;;  %v654_v5 = vmul.f32 %v2788_v7, %v305_v26  ;;  %v655_v9 = vmul.f32 %v2789_v58, %v305_v26  ;;  %v2800_v41 = vld [vmem:[#allocation19_spill] sm:$0xff] }
  0xc2   : > { %v891_v1 = vmul.f32 %v2790_v20, %v305_v26  ;;  %v892_v0 = vmul.f32 %v2791_v37, %v305_v26  ;;  %v1128_v35 = vmul.f32 %v2792_v8, %v305_v26  ;;  %v1129_v54 = vmul.f32 %v2793_v61, %v305_v26  ;;  %v2795_v26 = vld [vmem:[#allocation14_spill] sm:$0xff] }
  0xc3   : > { %v333_v16 = vadd.f32 %v325_v60, %v1930_v50  ;;  %v334_v6 = vadd.f32 %v326_v13, %v1933_v29  ;;  %v662_v47 = vadd.f32 %v654_v5, %v1936_v30  ;;  %v663_v48 = vadd.f32 %v655_v9, %v1939_v31  ;;  %v2801_v60 = vld [vmem:[#allocation20_spill] sm:$0xff]  ;;  %v2083_v9 = vpop.permute.xlu1 %348 }
  0xc4   : > { %v899_v51 = vadd.f32 %v891_v1, %v1942_v59  ;;  %v900_v52 = vadd.f32 %v892_v0, %v1945_v24  ;;  %v1136_v14 = vadd.f32 %v1128_v35, %v1948_v45  ;;  %v1137_v19 = vadd.f32 %v1129_v54, %v1951_v46 }
  0xc5   : > { %v365_v27 = vmul.f32 %v2794_v17, %v345_v53  ;;  %v366_v28 = vmul.f32 %v2795_v26, %v345_v53  ;;  %v678_v50 = vmul.f32 %v2796_v38, %v345_v53  ;;  %v679_v29 = vmul.f32 %v2797_v39, %v345_v53 }
  0xc6   : > { %v915_v30 = vmul.f32 %v2798_v32, %v345_v53  ;;  %v916_v31 = vmul.f32 %v2799_v40, %v345_v53  ;;  %v1152_v59 = vmul.f32 %v2800_v41, %v345_v53  ;;  %v1153_v24 = vmul.f32 %v2801_v60, %v345_v53 }
  0xc7   : > { %v2075_v13 = vadd.f32 %v365_v27, %v333_v16  ;;  %v2077_v45 = vadd.f32 %v366_v28, %v334_v6  ;;  %v2079_v46 = vadd.f32 %v678_v50, %v662_v47  ;;  %v2081_v5 = vadd.f32 %v679_v29, %v663_v48  ;;  %v2808_v50 = vld [vmem:[#allocation4_spill] sm:$0xff]  ;;  %v2809_v29 = vld [vmem:[#allocation45_spill] sm:$0xff] }
  0xc8   : > { %v2085_v1 = vadd.f32 %v915_v30, %v899_v51  ;;  %v2087_v0 = vadd.f32 %v916_v31, %v900_v52  ;;  %v2089_v35 = vadd.f32 %v1152_v59, %v1136_v14  ;;  %v2091_v54 = vadd.f32 %v1153_v24, %v1137_v19  ;;  %v2806_v19 = vld [vmem:[#allocation2_spill] sm:$0xff]  ;;  %v381_v24 = vpop.permute.xlu0 %380 }
  0xc9   : > { %v327_v53 = vmul.f32 %v2786_v18, %v2021_v49  ;;  %v328_v16 = vmul.f32 %v2787_v63, %v2021_v49  ;;  %v656_v6 = vmul.f32 %v2788_v7, %v2021_v49  ;;  %v657_v47 = vmul.f32 %v2789_v58, %v2021_v49 }
  0xca   : > { %2802 = vst [vmem:[#allocation46_spill] sm:$0xff] %v2085_v1  ;;  %2803 = vst [vmem:[#allocation47_spill] sm:$0xff] %v2087_v0  ;;  %v893_v48 = vmul.f32 %v2790_v20, %v2021_v49  ;;  %v894_v51 = vmul.f32 %v2791_v37, %v2021_v49  ;;  %v1130_v52 = vmul.f32 %v2792_v8, %v2021_v49  ;;  %v2807_v20 = vld [vmem:[#allocation3_spill] sm:$0xff] }
  0xcb   : > { %2804 = vst [vmem:[#allocation48_spill] sm:$0xff] %v2089_v35  ;;  %2805 = vst [vmem:[#allocation5_spill] sm:$0xff] %v2091_v54  ;;  %v1131_v18 = vmul.f32 %v2793_v61, %v2021_v49  ;;  %v335_v63 = vadd.f32 %v327_v53, %v1962_v3  ;;  %v336_v14 = vadd.f32 %v328_v16, %v1965_v25  ;;  %v353_v49 = vpop.permute.xlu1 %352 }
  0xcc   : > { %v664_v7 = vadd.f32 %v656_v6, %v1968_v55  ;;  %v665_v58 = vadd.f32 %v657_v47, %v1971_v56  ;;  %v901_v27 = vadd.f32 %v893_v48, %v2806_v19  ;;  %v902_v28 = vadd.f32 %v894_v51, %v2807_v20  ;;  %v2810_v19 = vld [vmem:[#allocation21_spill] sm:$0xff] }
  0xcd   : > { %v1138_v37 = vadd.f32 %v1130_v52, %v2808_v50  ;;  %v1139_v30 = vadd.f32 %v1131_v18, %v2809_v29  ;;  %v363_v8 = vmul.f32 %v2794_v17, %v341_v2  ;;  %v364_v61 = vmul.f32 %v2795_v26, %v341_v2  ;;  %v2812_v29 = vld [vmem:[#allocation23_spill] sm:$0xff] }
  0xce   : > { %v676_v3 = vmul.f32 %v2796_v38, %v341_v2  ;;  %v677_v25 = vmul.f32 %v2797_v39, %v341_v2  ;;  %v913_v55 = vmul.f32 %v2798_v32, %v341_v2  ;;  %v914_v56 = vmul.f32 %v2799_v40, %v341_v2 }
  0xcf   : > { %v1150_v31 = vmul.f32 %v2800_v41, %v341_v2  ;;  %v1151_v59 = vmul.f32 %v2801_v60, %v341_v2  ;;  %v371_v53 = vadd.f32 %v363_v8, %v1993_v12  ;;  %v372_v16 = vadd.f32 %v364_v61, %v1995_v21  ;;  %v2811_v2 = vld [vmem:[#allocation22_spill] sm:$0xff]  ;;  %v2813_v8 = vld [vmem:[#allocation24_spill] sm:$0xff]  ;;  %v2814_v61 = vld [vmem:[#allocation25_spill] sm:$0xff] }
  0xd0   : > { %v684_v6 = vadd.f32 %v676_v3, %v1997_v11  ;;  %v685_v47 = vadd.f32 %v677_v25, %v1999_v10  ;;  %v921_v48 = vadd.f32 %v913_v55, %v2001_v4  ;;  %v922_v51 = vadd.f32 %v914_v56, %v2003_v34  ;;  %v2815_v3 = vld [vmem:[#allocation26_spill] sm:$0xff]  ;;  %v2816_v25 = vld [vmem:[#allocation27_spill] sm:$0xff]  ;;  %v2817_v55 = vld [vmem:[#allocation28_spill] sm:$0xff] }
  0xd1   : > { %v1158_v52 = vadd.f32 %v1150_v31, %v2005_v15  ;;  %v1159_v18 = vadd.f32 %v1151_v59, %v2007_v22  ;;  %v403_v20 = vmul.f32 %v2810_v19, %v381_v24  ;;  %v404_v50 = vmul.f32 %v2811_v2, %v381_v24  ;;  %v2149_v59 = vpop.permute.xlu1 %384 }
  0xd2   : > { %v700_v12 = vmul.f32 %v2812_v29, %v381_v24  ;;  %v701_v21 = vmul.f32 %v2813_v8, %v381_v24  ;;  %v937_v11 = vmul.f32 %v2814_v61, %v381_v24  ;;  %v938_v10 = vmul.f32 %v2815_v3, %v381_v24 }
  0xd3   : > { %v1174_v4 = vmul.f32 %v2816_v25, %v381_v24  ;;  %v1175_v34 = vmul.f32 %v2817_v55, %v381_v24  ;;  %v2141_v56 = vadd.f32 %v403_v20, %v371_v53  ;;  %v2143_v15 = vadd.f32 %v404_v50, %v372_v16 }
  0xd4   : > { %v2145_v22 = vadd.f32 %v700_v12, %v684_v6  ;;  %v2147_v31 = vadd.f32 %v701_v21, %v685_v47  ;;  %v2151_v54 = vadd.f32 %v937_v11, %v921_v48  ;;  %v2153_v35 = vadd.f32 %v938_v10, %v922_v51 }
  0xd5   : > { %v2155_v0 = vadd.f32 %v1174_v4, %v1158_v52  ;;  %v2157_v1 = vadd.f32 %v1175_v34, %v1159_v18  ;;  %v367_v24 = vmul.f32 %v2794_v17, %v2083_v9  ;;  %v368_v53 = vmul.f32 %v2795_v26, %v2083_v9 }
  0xd6   : > { %v680_v16 = vmul.f32 %v2796_v38, %v2083_v9  ;;  %v681_v6 = vmul.f32 %v2797_v39, %v2083_v9  ;;  %v917_v47 = vmul.f32 %v2798_v32, %v2083_v9  ;;  %v918_v48 = vmul.f32 %v2799_v40, %v2083_v9 }
  0xd7   : > { %v1154_v51 = vmul.f32 %v2800_v41, %v2083_v9  ;;  %v1155_v52 = vmul.f32 %v2801_v60, %v2083_v9  ;;  %v2175_v18 = vadd.f32 %v367_v24, %v335_v63  ;;  %v2177_v20 = vadd.f32 %v368_v53, %v336_v14 }
  0xd8   : > { %v2179_v50 = vadd.f32 %v680_v16, %v664_v7  ;;  %v2181_v12 = vadd.f32 %v681_v6, %v665_v58  ;;  %v2183_v21 = vadd.f32 %v917_v47, %v901_v27  ;;  %v2185_v11 = vadd.f32 %v918_v48, %v902_v28  ;;  %v2195_v7 = vpop.permute.xlu1 %388 }
  0xd9   : > { %v2187_v10 = vadd.f32 %v1154_v51, %v1138_v37  ;;  %v2189_v4 = vadd.f32 %v1155_v52, %v1139_v30  ;;  %v369_v34 = vmul.f32 %v2794_v17, %v353_v49  ;;  %v370_v9 = vmul.f32 %v2795_v26, %v353_v49  ;;  %v393_v30 = vpop.permute.xlu0 %392 }
  0xda   : > { %v682_v63 = vmul.f32 %v2796_v38, %v353_v49  ;;  %v683_v14 = vmul.f32 %v2797_v39, %v353_v49  ;;  %v919_v58 = vmul.f32 %v2798_v32, %v353_v49  ;;  %v920_v27 = vmul.f32 %v2799_v40, %v353_v49 }
  0xdb   : > { %v1156_v28 = vmul.f32 %v2800_v41, %v353_v49  ;;  %v1157_v37 = vmul.f32 %v2801_v60, %v353_v49  ;;  %v377_v24 = vadd.f32 %v369_v34, %v2035_v57  ;;  %v378_v17 = vadd.f32 %v370_v9, %v2037_v43 }
  0xdc   : > { %v690_v26 = vadd.f32 %v682_v63, %v2039_v44  ;;  %v691_v38 = vadd.f32 %v683_v14, %v2041_v42  ;;  %v927_v39 = vadd.f32 %v919_v58, %v2043_v33  ;;  %v928_v53 = vadd.f32 %v920_v27, %v2045_v23  ;;  %v2225_v6 = vpop.permute.xlu1 %420 }
  0xdd   : > { %v1164_v32 = vadd.f32 %v1156_v28, %v2047_v36  ;;  %v1165_v40 = vadd.f32 %v1157_v37, %v2049_v62  ;;  %v409_v41 = vmul.f32 %v2810_v19, %v393_v30  ;;  %v410_v60 = vmul.f32 %v2811_v2, %v393_v30 }
  0xde   : > { %v706_v57 = vmul.f32 %v2812_v29, %v393_v30  ;;  %v707_v43 = vmul.f32 %v2813_v8, %v393_v30  ;;  %v943_v44 = vmul.f32 %v2814_v61, %v393_v30  ;;  %v944_v42 = vmul.f32 %v2815_v3, %v393_v30 }
  0xdf   : > { %v1180_v33 = vmul.f32 %v2816_v25, %v393_v30  ;;  %v1181_v23 = vmul.f32 %v2817_v55, %v393_v30  ;;  %v2217_v49 = vadd.f32 %v409_v41, %v377_v24  ;;  %v2219_v36 = vadd.f32 %v410_v60, %v378_v17  ;;  %v425_v30 = vpop.permute.xlu0 %424  ;;  %v2825_v41 = vld [vmem:[#allocation48_spill] sm:$0xff] }
  0xe0   : > { %v2221_v62 = vadd.f32 %v706_v57, %v690_v26  ;;  %v2223_v16 = vadd.f32 %v707_v43, %v691_v38  ;;  %v2227_v47 = vadd.f32 %v943_v44, %v927_v39  ;;  %v2229_v48 = vadd.f32 %v944_v42, %v928_v53  ;;  %v2823_v39 = vld [vmem:[#allocation46_spill] sm:$0xff]  ;;  %v2826_v57 = vld [vmem:[#allocation5_spill] sm:$0xff] }
  0xe1   : > { %v2231_v51 = vadd.f32 %v1180_v33, %v1164_v32  ;;  %v2233_v52 = vadd.f32 %v1181_v23, %v1165_v40  ;;  %v405_v34 = vmul.f32 %v2810_v19, %v2149_v59  ;;  %v406_v9 = vmul.f32 %v2811_v2, %v2149_v59  ;;  %v2824_v32 = vld [vmem:[#allocation47_spill] sm:$0xff]  ;;  %v2827_v44 = vld [vmem:[#allocation29_spill] sm:$0xff] }
  0xe2   : > { %2818 = vst [vmem:[#allocation6_spill] sm:$0xff] %v2223_v16  ;;  %2819 = vst [vmem:[#allocation7_spill] sm:$0xff] %v2227_v47  ;;  %v702_v63 = vmul.f32 %v2812_v29, %v2149_v59  ;;  %v703_v14 = vmul.f32 %v2813_v8, %v2149_v59  ;;  %v939_v58 = vmul.f32 %v2814_v61, %v2149_v59  ;;  %v2829_v23 = vld [vmem:[#allocation31_spill] sm:$0xff] }
  0xe3   : > { %2820 = vst [vmem:[#allocation8_spill] sm:$0xff] %v2229_v48  ;;  %2821 = vst [vmem:[#allocation9_spill] sm:$0xff] %v2231_v51  ;;  %v940_v27 = vmul.f32 %v2815_v3, %v2149_v59  ;;  %v1176_v28 = vmul.f32 %v2816_v25, %v2149_v59  ;;  %v1177_v37 = vmul.f32 %v2817_v55, %v2149_v59  ;;  %v2828_v59 = vld [vmem:[#allocation30_spill] sm:$0xff] }
  0xe4   : > { %2822 = vst [vmem:[#allocation10_spill] sm:$0xff] %v2233_v52  ;;  %v413_v24 = vadd.f32 %v405_v34, %v2075_v13  ;;  %v414_v17 = vadd.f32 %v406_v9, %v2077_v45  ;;  %v710_v26 = vadd.f32 %v702_v63, %v2079_v46  ;;  %v711_v38 = vadd.f32 %v703_v14, %v2081_v5  ;;  %v2830_v34 = vld [vmem:[#allocation32_spill] sm:$0xff]  ;;  %v2263_v9 = vpop.permute.xlu1 %428  ;;  %v2831_v46 = vld [vmem:[#allocation33_spill] sm:$0xff]  ;;  %v2832_v63 = vld [vmem:[#allocation34_spill] sm:$0xff] }
  0xe5   : > { %v947_v53 = vadd.f32 %v939_v58, %v2823_v39  ;;  %v948_v40 = vadd.f32 %v940_v27, %v2824_v32  ;;  %v1184_v60 = vadd.f32 %v1176_v28, %v2825_v41  ;;  %v1185_v43 = vadd.f32 %v1177_v37, %v2826_v57  ;;  %v2833_v58 = vld [vmem:[#allocation35_spill] sm:$0xff]  ;;  %v2834_v39 = vld [vmem:[#allocation36_spill] sm:$0xff] }
  0xe6   : > { %v445_v42 = vmul.f32 %v2827_v44, %v425_v30  ;;  %v446_v33 = vmul.f32 %v2828_v59, %v425_v30  ;;  %v726_v13 = vmul.f32 %v2829_v23, %v425_v30  ;;  %v727_v45 = vmul.f32 %v2830_v34, %v425_v30 }
  0xe7   : > { %v963_v5 = vmul.f32 %v2831_v46, %v425_v30  ;;  %v964_v14 = vmul.f32 %v2832_v63, %v425_v30  ;;  %v1200_v27 = vmul.f32 %v2833_v58, %v425_v30  ;;  %v1201_v28 = vmul.f32 %v2834_v39, %v425_v30 }
  0xe8   : > { %v2269_v32 = vadd.f32 %v445_v42, %v413_v24  ;;  %v2271_v37 = vadd.f32 %v446_v33, %v414_v17  ;;  %v2273_v41 = vadd.f32 %v726_v13, %v710_v26  ;;  %v2275_v57 = vadd.f32 %v727_v45, %v711_v38 }
  0xe9   : > { %v2277_v52 = vadd.f32 %v963_v5, %v947_v53  ;;  %v2279_v51 = vadd.f32 %v964_v14, %v948_v40  ;;  %v2281_v48 = vadd.f32 %v1200_v27, %v1184_v60  ;;  %v2283_v47 = vadd.f32 %v1201_v28, %v1185_v43  ;;  %v433_v40 = vpop.permute.xlu1 %432  ;;  %v2843_v27 = vld [vmem:[#allocation37_spill] sm:$0xff] }
  0xea   : > { %v407_v16 = vmul.f32 %v2810_v19, %v2195_v7  ;;  %v408_v30 = vmul.f32 %v2811_v2, %v2195_v7  ;;  %v704_v24 = vmul.f32 %v2812_v29, %v2195_v7  ;;  %v705_v17 = vmul.f32 %v2813_v8, %v2195_v7 }
  0xeb   : > { %v941_v26 = vmul.f32 %v2814_v61, %v2195_v7  ;;  %v942_v38 = vmul.f32 %v2815_v3, %v2195_v7  ;;  %v1178_v53 = vmul.f32 %v2816_v25, %v2195_v7  ;;  %v1179_v19 = vmul.f32 %v2817_v55, %v2195_v7 }
  0xec   : > { %v2302_v2 = vadd.f32 %v407_v16, %v2175_v18  ;;  %v2305_v29 = vadd.f32 %v408_v30, %v2177_v20  ;;  %v2308_v8 = vadd.f32 %v704_v24, %v2179_v50  ;;  %v2311_v61 = vadd.f32 %v705_v17, %v2181_v12  ;;  %v461_v16 = vpop.permute.xlu0 %460  ;;  %v2845_v24 = vld [vmem:[#allocation39_spill] sm:$0xff]  ;;  %v2846_v17 = vld [vmem:[#allocation40_spill] sm:$0xff] }
  0xed   : > { %v2314_v3 = vadd.f32 %v941_v26, %v2183_v21  ;;  %v2317_v25 = vadd.f32 %v942_v38, %v2185_v11  ;;  %v2320_v55 = vadd.f32 %v1178_v53, %v2187_v10  ;;  %v2323_v18 = vadd.f32 %v1179_v19, %v2189_v4  ;;  %v465_v26 = vpop.permute.xlu1 %464 }
  0xee   : > { %2835 = vst [vmem:[#allocation11_spill] sm:$0xff] %v2302_v2  ;;  %2836 = vst [vmem:[#allocation12_spill] sm:$0xff] %v2305_v29  ;;  %v443_v20 = vmul.f32 %v2827_v44, %v2225_v6  ;;  %v444_v50 = vmul.f32 %v2828_v59, %v2225_v6  ;;  %v724_v12 = vmul.f32 %v2829_v23, %v2225_v6  ;;  %v2492_v2 = vld [vmem:[%s1535_s6 + $0x70] ss:$0 sm:$0xff] }
  0xef   : > { %2837 = vst [vmem:[#allocation13_spill] sm:$0xff] %v2308_v8  ;;  %2838 = vst [vmem:[#allocation14_spill] sm:$0xff] %v2311_v61  ;;  %v725_v21 = vmul.f32 %v2830_v34, %v2225_v6  ;;  %v961_v11 = vmul.f32 %v2831_v46, %v2225_v6  ;;  %v962_v10 = vmul.f32 %v2832_v63, %v2225_v6  ;;  %v2471_v61 = vld [vmem:[%s1535_s6 + $0x38] ss:$0 sm:$0xff] }
  0xf0   : > { %2839 = vst [vmem:[#allocation15_spill] sm:$0xff] %v2314_v3  ;;  %2840 = vst [vmem:[#allocation16_spill] sm:$0xff] %v2317_v25  ;;  %v1198_v4 = vmul.f32 %v2833_v58, %v2225_v6  ;;  %v1199_v7 = vmul.f32 %v2834_v39, %v2225_v6  ;;  %v451_v60 = vadd.f32 %v443_v20, %v2141_v56  ;;  %v2844_v6 = vld [vmem:[#allocation38_spill] sm:$0xff] }
  0xf1   : > { %2841 = vst [vmem:[#allocation17_spill] sm:$0xff] %v2320_v55  ;;  %2842 = vst [vmem:[#allocation18_spill] sm:$0xff] %v2323_v18  ;;  %v452_v43 = vadd.f32 %v444_v50, %v2143_v15  ;;  %v732_v42 = vadd.f32 %v724_v12, %v2145_v22  ;;  %v733_v33 = vadd.f32 %v725_v21, %v2147_v31  ;;  %v2847_v22 = vld [vmem:[#allocation41_spill] sm:$0xff]  ;;  %v2848_v31 = vld [vmem:[#allocation42_spill] sm:$0xff] }
  0xf2   : > { %v969_v13 = vadd.f32 %v961_v11, %v2151_v54  ;;  %v970_v45 = vadd.f32 %v962_v10, %v2153_v35  ;;  %v1206_v5 = vadd.f32 %v1198_v4, %v2155_v0  ;;  %v1207_v14 = vadd.f32 %v1199_v7, %v2157_v1  ;;  %v2849_v54 = vld [vmem:[#allocation43_spill] sm:$0xff]  ;;  %v2850_v35 = vld [vmem:[#allocation44_spill] sm:$0xff]  ;;  %v2461_v55 = vld [vmem:[%s1535_s6 + $0x18] ss:$0 sm:$0xff] }
  0xf3   : > { %v483_v28 = vmul.f32 %v2843_v27, %v461_v16  ;;  %v484_v30 = vmul.f32 %v2844_v6, %v461_v16  ;;  %v748_v56 = vmul.f32 %v2845_v24, %v461_v16  ;;  %v749_v15 = vmul.f32 %v2846_v17, %v461_v16 }
  0xf4   : > { %v985_v38 = vmul.f32 %v2847_v22, %v461_v16  ;;  %v986_v53 = vmul.f32 %v2848_v31, %v461_v16  ;;  %v1222_v19 = vmul.f32 %v2849_v54, %v461_v16  ;;  %v1223_v20 = vmul.f32 %v2850_v35, %v461_v16 }
  0xf5   : > { %v2357_v0 = vadd.f32 %v483_v28, %v451_v60  ;;  %v2359_v1 = vadd.f32 %v484_v30, %v452_v43  ;;  %v2361_v50 = vadd.f32 %v748_v56, %v732_v42  ;;  %v2363_v12 = vadd.f32 %v749_v15, %v733_v33  ;;  %v469_v15 = vpop.permute.xlu1 %468 }
  0xf6   : > { %v2365_v21 = vadd.f32 %v985_v38, %v969_v13  ;;  %v2367_v11 = vadd.f32 %v986_v53, %v970_v45  ;;  %v2369_v10 = vadd.f32 %v1222_v19, %v1206_v5  ;;  %v2371_v4 = vadd.f32 %v1223_v20, %v1207_v14  ;;  %v473_v5 = vpop.permute.xlu0 %472 }
  0xf7   : > { %v2375_v7 = vmul.f32 %v2827_v44, %v2263_v9  ;;  %v2379_v16 = vmul.f32 %v2828_v59, %v2263_v9  ;;  %v2383_v60 = vmul.f32 %v2829_v23, %v2263_v9  ;;  %v2387_v43 = vmul.f32 %v2830_v34, %v2263_v9 }
  0xf8   : > { %v2391_v42 = vmul.f32 %v2831_v46, %v2263_v9  ;;  %v2395_v33 = vmul.f32 %v2832_v63, %v2263_v9  ;;  %v2399_v13 = vmul.f32 %v2833_v58, %v2263_v9  ;;  %v2403_v45 = vmul.f32 %v2834_v39, %v2263_v9 }
  0xf9   : > { %2851 = vst [vmem:[#allocation19_spill] sm:$0xff] %v2375_v7  ;;  %2852 = vst [vmem:[#allocation20_spill] sm:$0xff] %v2379_v16  ;;  %v2406_v14 = vmul.f32 %v2827_v44, %v433_v40  ;;  %v2409_v28 = vmul.f32 %v2828_v59, %v433_v40  ;;  %v2412_v30 = vmul.f32 %v2829_v23, %v433_v40 }
  0xfa   : > { %2853 = vst [vmem:[#allocation2_spill] sm:$0xff] %v2383_v60  ;;  %2854 = vst [vmem:[#allocation3_spill] sm:$0xff] %v2387_v43  ;;  %v2415_v56 = vmul.f32 %v2830_v34, %v433_v40  ;;  %v2418_v38 = vmul.f32 %v2831_v46, %v433_v40  ;;  %v2421_v9 = vmul.f32 %v2832_v63, %v433_v40  ;;  %v505_v3 = vpop.permute.xlu0 %504  ;;  %v2468_v43 = vld [vmem:[%s1535_s6 + $0x30] ss:$0 sm:$0xff] }
  0xfb   : > { %2855 = vst [vmem:[#allocation4_spill] sm:$0xff] %v2391_v42  ;;  %2856 = vst [vmem:[#allocation45_spill] sm:$0xff] %v2395_v33  ;;  %v2424_v44 = vmul.f32 %v2833_v58, %v433_v40  ;;  %v2427_v59 = vmul.f32 %v2834_v39, %v433_v40  ;;  %v2430_v23 = vmul.f32 %v2843_v27, %v473_v5  ;;  %v2474_v60 = vld [vmem:[%s1535_s6 + $0x50] ss:$0 sm:$0xff] }
  0xfc   : > { %2857 = vst [vmem:[#allocation21_spill] sm:$0xff] %v2399_v13  ;;  %2858 = vst [vmem:[#allocation22_spill] sm:$0xff] %v2403_v45  ;;  %v2433_v34 = vmul.f32 %v2844_v6, %v473_v5  ;;  %v2436_v46 = vmul.f32 %v2845_v24, %v473_v5  ;;  %v2439_v53 = vmul.f32 %v2846_v17, %v473_v5  ;;  %v2458_v13 = vld [vmem:[%s1535_s6 + $0x10] ss:$0 sm:$0xff] }
  0xfd   : > { %2859 = vst [vmem:[#allocation23_spill] sm:$0xff] %v2427_v59  ;;  %v2442_v63 = vmul.f32 %v2847_v22, %v473_v5  ;;  %v2445_v58 = vmul.f32 %v2848_v31, %v473_v5  ;;  %v2448_v39 = vmul.f32 %v2849_v54, %v473_v5  ;;  %v2451_v40 = vmul.f32 %v2850_v35, %v473_v5 }
  0xfe   : > { %v485_v19 = vmul.f32 %v2843_v27, %v465_v26  ;;  %v486_v20 = vmul.f32 %v2844_v6, %v465_v26  ;;  %v750_v45 = vmul.f32 %v2845_v24, %v465_v26  ;;  %v751_v18 = vmul.f32 %v2846_v17, %v465_v26 }
  0xff   : > { %2860 = vst [vmem:[#allocation24_spill] sm:$0xff] %v2448_v39  ;;  %2861 = vst [vmem:[#allocation25_spill] sm:$0xff] %v2451_v40  ;;  %v987_v33 = vmul.f32 %v2847_v22, %v465_v26  ;;  %v988_v5 = vmul.f32 %v2848_v31, %v465_v26  ;;  %v1224_v25 = vmul.f32 %v2849_v54, %v465_v26  ;;  %v2495_v40 = vld [vmem:[%s1535_s6 + $0x78] ss:$0 sm:$0xff]  ;;  %v501_v39 = vpop.permute.xlu1 %500 }
 0x100   : > { %v1225_v42 = vmul.f32 %v2850_v35, %v465_v26  ;;  %v2477_v8 = vadd.f32 %v485_v19, %v2269_v32  ;;  %v2480_v16 = vadd.f32 %v486_v20, %v2271_v37  ;;  %v2483_v29 = vadd.f32 %v750_v45, %v2273_v41  ;;  %v2489_v26 = vld [vmem:[%s1535_s6 + $0x58] ss:$0 sm:$0xff] }
 0x101   : > { %v2486_v7 = vadd.f32 %v751_v18, %v2275_v57  ;;  %v2498_v59 = vadd.f32 %v987_v33, %v2277_v52  ;;  %v2501_v32 = vadd.f32 %v988_v5, %v2279_v51  ;;  %v2504_v37 = vadd.f32 %v1224_v25, %v2281_v48 }
 0x102   : > { %v2507_v41 = vadd.f32 %v1225_v42, %v2283_v47  ;;  %v2510_v57 = vmul.f32 %v2458_v13, %v505_v3  ;;  %v2513_v18 = vmul.f32 %v2461_v55, %v505_v3  ;;  %v2516_v45 = vmul.f32 %v2468_v43, %v505_v3 }
 0x103   : > { %2862 = vst [vmem:[#allocation26_spill] sm:$0xff] %v2504_v37  ;;  %v2519_v52 = vmul.f32 %v2471_v61, %v505_v3  ;;  %v2522_v51 = vmul.f32 %v2474_v60, %v505_v3  ;;  %v2525_v48 = vmul.f32 %v2489_v26, %v505_v3  ;;  %v2528_v47 = vmul.f32 %v2492_v2, %v505_v3 }
 0x104   : > { %2863 = vst [vmem:[#allocation27_spill] sm:$0xff] %v2507_v41  ;;  %v2531_v25 = vmul.f32 %v2495_v40, %v505_v3  ;;  %v2534_v42 = vmul.f32 %v2843_v27, %v469_v15  ;;  %v2537_v33 = vmul.f32 %v2844_v6, %v469_v15  ;;  %v2540_v19 = vmul.f32 %v2845_v24, %v469_v15 }
 0x105   : > { %2864 = vst [vmem:[#allocation28_spill] sm:$0xff] %v2525_v48  ;;  %2865 = vst [vmem:[#allocation46_spill] sm:$0xff] %v2528_v47  ;;  %v2543_v20 = vmul.f32 %v2846_v17, %v469_v15  ;;  %v2546_v5 = vmul.f32 %v2847_v22, %v469_v15  ;;  %v2549_v41 = vmul.f32 %v2848_v31, %v469_v15 }
 0x106   : > { %2866 = vst [vmem:[#allocation47_spill] sm:$0xff] %v2531_v25  ;;  %2867 = vst [vmem:[#allocation48_spill] sm:$0xff] %v2534_v42  ;;  %v2552_v3 = vmul.f32 %v2849_v54, %v469_v15  ;;  %v2555_v27 = vmul.f32 %v2850_v35, %v469_v15  ;;  %v523_v6 = vmul.f32 %v2458_v13, %v501_v39  ;;  %v542_v35 = vpop.permute.xlu0 %541 }
 0x107   : > { %2868 = vst [vmem:[#allocation5_spill] sm:$0xff] %v2537_v33  ;;  %2869 = vst [vmem:[#allocation29_spill] sm:$0xff] %v2540_v19  ;;  %v524_v24 = vmul.f32 %v2461_v55, %v501_v39  ;;  %v772_v19 = vmul.f32 %v2468_v43, %v501_v39  ;;  %v773_v17 = vmul.f32 %v2471_v61, %v501_v39 }
 0x108   : > { %2870 = vst [vmem:[#allocation30_spill] sm:$0xff] %v2543_v20  ;;  %2871 = vst [vmem:[#allocation31_spill] sm:$0xff] %v2546_v5  ;;  %v2561_v20 = vpop.permute.xlu1 %508  ;;  %v1009_v22 = vmul.f32 %v2474_v60, %v501_v39  ;;  %v1010_v31 = vmul.f32 %v2489_v26, %v501_v39  ;;  %v1246_v54 = vmul.f32 %v2492_v2, %v501_v39 }
 0x109   : > { %2872 = vst [vmem:[#allocation32_spill] sm:$0xff] %v2549_v41  ;;  %2873 = vst [vmem:[#allocation33_spill] sm:$0xff] %v2552_v3  ;;  %v1247_v3 = vmul.f32 %v2495_v40, %v501_v39  ;;  %v531_v15 = vadd.f32 %v523_v6, %v2357_v0  ;;  %v780_v41 = vadd.f32 %v772_v19, %v2361_v50 }
 0x10a   : > { %2874 = vst [vmem:[#allocation34_spill] sm:$0xff] %v2555_v27  ;;  %2875 = vst [vmem:[#allocation35_spill] sm:$0xff] %v2561_v20  ;;  %v532_v27 = vadd.f32 %v524_v24, %v2359_v1  ;;  %v781_v5 = vadd.f32 %v773_v17, %v2363_v12  ;;  %v1017_v33 = vadd.f32 %v1009_v22, %v2365_v21 }
 0x10b   : > { %v1018_v42 = vadd.f32 %v1010_v31, %v2367_v11  ;;  %v1254_v20 = vadd.f32 %v1246_v54, %v2369_v10  ;;  %v1255_v25 = vadd.f32 %v1247_v3, %v2371_v4  ;;  %v559_v47 = vadd.f32 %v542_v35, %v531_v15 }
 0x10c   : > { %v560_v37 = vadd.f32 %v542_v35, %v532_v27  ;;  %v788_v39 = vadd.f32 %v780_v41, %v542_v35  ;;  %v789_v48 = vadd.f32 %v781_v5, %v542_v35  ;;  %v1025_v0 = vadd.f32 %v1017_v33, %v542_v35  ;;  %v513_v21 = vpop.permute.xlu1 %512 }
 0x10d   : > { %v1026_v6 = vadd.f32 %v1018_v42, %v542_v35  ;;  %v1262_v1 = vadd.f32 %v1254_v20, %v542_v35  ;;  %v1263_v24 = vadd.f32 %v1255_v25, %v542_v35  ;;  %v567_v50 = vmax.f32 %v559_v47, 0.0  ;;  %v2876_v47 = vld [vmem:[#allocation6_spill] sm:$0xff] }
 0x10e   : > { %v568_v19 = vmax.f32 %v560_v37, 0.0  ;;  %v796_v12 = vmax.f32 %v788_v39, 0.0  ;;  %v797_v17 = vmax.f32 %v789_v48, 0.0  ;;  %v1033_v22 = vmax.f32 %v1025_v0, 0.0  ;;  %v2877_v39 = vld [vmem:[#allocation7_spill] sm:$0xff] }
 0x10f   : > { %v1034_v11 = vmax.f32 %v1026_v6, 0.0  ;;  %v1270_v31 = vmax.f32 %v1262_v1, 0.0  ;;  %v1271_v10 = vmax.f32 %v1263_v24, 0.0  ;;  %v457_v41 = vadd.f32 %v2406_v14, %v2217_v49  ;;  %v557_v49 = vpop.permute.xlu0 %556  ;;  %v2878_v6 = vld [vmem:[#allocation8_spill] sm:$0xff] }
 0x110   : > { %v804_v4 = vmax.f32 %v567_v50, %v796_v12  ;;  %v805_v3 = vmax.f32 %v568_v19, %v797_v17  ;;  %v458_v42 = vadd.f32 %v2409_v28, %v2219_v36  ;;  %v529_v25 = vmul.f32 %v2458_v13, %v513_v21 }
 0x111   : > { %v530_v37 = vmul.f32 %v2461_v55, %v513_v21  ;;  %v738_v48 = vadd.f32 %v2412_v30, %v2221_v62  ;;  %v739_v33 = vadd.f32 %v2415_v56, %v2876_v47  ;;  %v497_v27 = vadd.f32 %v2430_v23, %v457_v41 }
 0x112   : > { %v1041_v20 = vmax.f32 %v804_v4, %v1033_v22  ;;  %v1042_v5 = vmax.f32 %v805_v3, %v1034_v11  ;;  %v498_v54 = vadd.f32 %v2433_v34, %v458_v42  ;;  %v778_v14 = vmul.f32 %v2468_v43, %v513_v21  ;;  %v2881_v4 = vld [vmem:[#allocation23_spill] sm:$0xff] }
 0x113   : > { %v762_v36 = vadd.f32 %v2436_v46, %v738_v48  ;;  %v763_v62 = vadd.f32 %v2439_v53, %v739_v33  ;;  %v779_v28 = vmul.f32 %v2471_v61, %v513_v21  ;;  %v537_v23 = vadd.f32 %v529_v25, %v497_v27  ;;  %v2882_v48 = vld [vmem:[#allocation24_spill] sm:$0xff]  ;;  %v2883_v33 = vld [vmem:[#allocation25_spill] sm:$0xff] }
 0x114   : > { %v1278_v30 = vmax.f32 %v1041_v20, %v1270_v31  ;;  %v1279_v56 = vmax.f32 %v1042_v5, %v1271_v10  ;;  %v538_v34 = vadd.f32 %v530_v37, %v498_v54  ;;  %v975_v0 = vadd.f32 %v2418_v38, %v2877_v39  ;;  %v2879_v38 = vld [vmem:[#allocation9_spill] sm:$0xff] }
 0x115   : > { %v786_v35 = vadd.f32 %v778_v14, %v762_v36  ;;  %v787_v15 = vadd.f32 %v779_v28, %v763_v62  ;;  %v976_v1 = vadd.f32 %v2421_v9, %v2878_v6  ;;  %v565_v46 = vadd.f32 %v557_v49, %v537_v23  ;;  %v2880_v9 = vld [vmem:[#allocation10_spill] sm:$0xff] }
 0x116   : > { %1286 = vst [vmem:[%s2591_s10] sm:$0xff] %v1278_v30  ;;  %1287 = vst [vmem:[%s2591_s10 + $0x8] sm:$0xff] %v1279_v56  ;;  %v566_v53 = vadd.f32 %v557_v49, %v538_v34  ;;  %v1015_v24 = vmul.f32 %v2474_v60, %v513_v21  ;;  %v1016_v50 = vmul.f32 %v2489_v26, %v513_v21 }
 0x117   : > { %v794_v19 = vadd.f32 %v786_v35, %v557_v49  ;;  %v795_v12 = vadd.f32 %v787_v15, %v557_v49  ;;  %v999_v17 = vadd.f32 %v2442_v63, %v975_v0  ;;  %v1000_v22 = vadd.f32 %v2445_v58, %v976_v1 }
 0x118   : > { %v573_v11 = vmax.f32 %v565_v46, 0.0  ;;  %v574_v31 = vmax.f32 %v566_v53, 0.0  ;;  %v1212_v10 = vadd.f32 %v2424_v44, %v2879_v38  ;;  %v1213_v3 = vadd.f32 %v2881_v4, %v2880_v9  ;;  %v547_v44 = vpop.permute.xlu1 %546 }
 0x119   : > { %v802_v41 = vmax.f32 %v794_v19, 0.0  ;;  %v803_v42 = vmax.f32 %v795_v12, 0.0  ;;  %v1023_v25 = vadd.f32 %v1015_v24, %v999_v17  ;;  %v1024_v37 = vadd.f32 %v1016_v50, %v1000_v22  ;;  %v2885_v19 = vld [vmem:[#allocation26_spill] sm:$0xff]  ;;  %v2887_v22 = vld [vmem:[#allocation27_spill] sm:$0xff] }
 0x11a   : > { %v1236_v47 = vadd.f32 %v2882_v48, %v1212_v10  ;;  %v1237_v20 = vadd.f32 %v2883_v33, %v1213_v3  ;;  %v1252_v63 = vmul.f32 %v2492_v2, %v513_v21  ;;  %v1253_v58 = vmul.f32 %v2495_v40, %v513_v21  ;;  %v2886_v12 = vld [vmem:[#allocation46_spill] sm:$0xff]  ;;  %v2893_v33 = vld [vmem:[#allocation35_spill] sm:$0xff] }
 0x11b   : > { %v810_v5 = vmax.f32 %v573_v11, %v802_v41  ;;  %v811_v27 = vmax.f32 %v574_v31, %v803_v42  ;;  %v1031_v54 = vadd.f32 %v1023_v25, %v557_v49  ;;  %v1032_v36 = vadd.f32 %v1024_v37, %v557_v49  ;;  %v2888_v11 = vld [vmem:[#allocation47_spill] sm:$0xff]  ;;  %v2892_v25 = vld [vmem:[#allocation20_spill] sm:$0xff] }
 0x11c   : > { %v1260_v62 = vadd.f32 %v1252_v63, %v1236_v47  ;;  %v1261_v14 = vadd.f32 %v1253_v58, %v1237_v20  ;;  %v533_v28 = vadd.f32 %v2510_v57, %v2477_v8  ;;  %v534_v30 = vadd.f32 %v2513_v18, %v2480_v16 }
 0x11d   : > { %v1039_v56 = vmax.f32 %v1031_v54, 0.0  ;;  %v1040_v23 = vmax.f32 %v1032_v36, 0.0  ;;  %v782_v34 = vadd.f32 %v2516_v45, %v2483_v29  ;;  %v783_v21 = vadd.f32 %v2519_v52, %v2486_v7  ;;  %v2884_v7 = vld [vmem:[#allocation28_spill] sm:$0xff]  ;;  %v2895_v36 = vld [vmem:[#allocation5_spill] sm:$0xff] }
 0x11e   : > { %v1268_v35 = vadd.f32 %v1260_v62, %v557_v49  ;;  %v1269_v15 = vadd.f32 %v1261_v14, %v557_v49  ;;  %v561_v39 = vadd.f32 %v547_v44, %v533_v28  ;;  %v562_v0 = vadd.f32 %v547_v44, %v534_v30  ;;  %v552_v28 = vpop.permute.xlu1 %551  ;;  %v2896_v30 = vld [vmem:[#allocation13_spill] sm:$0xff] }
 0x11f   : > { %v1047_v6 = vmax.f32 %v810_v5, %v1039_v56  ;;  %v1048_v1 = vmax.f32 %v811_v27, %v1040_v23  ;;  %v790_v46 = vadd.f32 %v782_v34, %v547_v44  ;;  %v791_v53 = vadd.f32 %v783_v21, %v547_v44  ;;  %v2894_v27 = vld [vmem:[#allocation48_spill] sm:$0xff]  ;;  %v2897_v56 = vld [vmem:[#allocation2_spill] sm:$0xff]  ;;  %v2899_v21 = vld [vmem:[#allocation3_spill] sm:$0xff] }
 0x120   : > { %v1276_v8 = vmax.f32 %v1268_v35, 0.0  ;;  %v1277_v57 = vmax.f32 %v1269_v15, 0.0  ;;  %v569_v16 = vmax.f32 %v561_v39, 0.0  ;;  %v570_v18 = vmax.f32 %v562_v0, 0.0  ;;  %v2898_v34 = vld [vmem:[#allocation14_spill] sm:$0xff] }
 0x121   : > { %v798_v24 = vmax.f32 %v790_v46, 0.0  ;;  %v799_v50 = vmax.f32 %v791_v53, 0.0  ;;  %v1019_v29 = vadd.f32 %v2522_v51, %v2498_v59  ;;  %v1020_v45 = vadd.f32 %v2884_v7, %v2501_v32  ;;  %v2889_v59 = vld [vmem:[#allocation11_spill] sm:$0xff]  ;;  %v2891_v32 = vld [vmem:[#allocation12_spill] sm:$0xff]  ;;  %v2901_v53 = vld [vmem:[#allocation30_spill] sm:$0xff] }
 0x122   : > { %v1284_v52 = vmax.f32 %v1047_v6, %v1276_v8  ;;  %v1285_v49 = vmax.f32 %v1048_v1, %v1277_v57  ;;  %v1256_v17 = vadd.f32 %v2886_v12, %v2885_v19  ;;  %v1257_v31 = vadd.f32 %v2888_v11, %v2887_v22  ;;  %v2890_v51 = vld [vmem:[#allocation19_spill] sm:$0xff]  ;;  %v2900_v1 = vld [vmem:[#allocation29_spill] sm:$0xff]  ;;  %v2907_v11 = vld [vmem:[#allocation32_spill] sm:$0xff] }
 0x123   : > { %v806_v38 = vmax.f32 %v569_v16, %v798_v24  ;;  %v807_v10 = vmax.f32 %v570_v18, %v799_v50  ;;  %v1027_v9 = vadd.f32 %v1019_v29, %v547_v44  ;;  %v1028_v4 = vadd.f32 %v1020_v45, %v547_v44  ;;  %v2902_v18 = vld [vmem:[#allocation15_spill] sm:$0xff]  ;;  %v2903_v24 = vld [vmem:[#allocation4_spill] sm:$0xff]  ;;  %v2905_v7 = vld [vmem:[#allocation45_spill] sm:$0xff] }
 0x124   : > { %1292 = vst [vmem:[%s2591_s10 + $0x30] sm:$0xff] %v1284_v52  ;;  %1293 = vst [vmem:[%s2591_s10 + $0x38] sm:$0xff] %v1285_v49  ;;  %v1264_v3 = vadd.f32 %v1256_v17, %v547_v44  ;;  %v1265_v41 = vadd.f32 %v1257_v31, %v547_v44  ;;  %v455_v42 = vadd.f32 %v2890_v51, %v2889_v59  ;;  %v2904_v29 = vld [vmem:[#allocation16_spill] sm:$0xff]  ;;  %v2906_v17 = vld [vmem:[#allocation31_spill] sm:$0xff] }
 0x125   : > { %v456_v37 = vadd.f32 %v2892_v25, %v2891_v32  ;;  %v1035_v48 = vmax.f32 %v1027_v9, 0.0  ;;  %v1036_v47 = vmax.f32 %v1028_v4, 0.0  ;;  %v527_v20 = vmul.f32 %v2458_v13, %v2893_v33  ;;  %v2908_v9 = vld [vmem:[#allocation17_spill] sm:$0xff]  ;;  %v2911_v59 = vld [vmem:[#allocation22_spill] sm:$0xff] }
 0x126   : > { %v528_v63 = vmul.f32 %v2461_v55, %v2893_v33  ;;  %v1272_v58 = vmax.f32 %v1264_v3, 0.0  ;;  %v1273_v5 = vmax.f32 %v1265_v41, 0.0  ;;  %v495_v54 = vadd.f32 %v2894_v27, %v455_v42  ;;  %v2909_v4 = vld [vmem:[#allocation21_spill] sm:$0xff]  ;;  %v2910_v41 = vld [vmem:[#allocation18_spill] sm:$0xff] }
 0x127   : > { %v496_v44 = vadd.f32 %v2895_v36, %v456_v37  ;;  %v1043_v62 = vmax.f32 %v806_v38, %v1035_v48  ;;  %v1044_v14 = vmax.f32 %v807_v10, %v1036_v47  ;;  %v736_v23 = vadd.f32 %v2897_v56, %v2896_v30  ;;  %v2912_v48 = vld [vmem:[#allocation33_spill] sm:$0xff] }
 0x128   : > { %v737_v13 = vadd.f32 %v2899_v21, %v2898_v34  ;;  %v535_v35 = vadd.f32 %v527_v20, %v495_v54  ;;  %v776_v55 = vmul.f32 %v2468_v43, %v2893_v33  ;;  %v777_v39 = vmul.f32 %v2471_v61, %v2893_v33  ;;  %v2913_v20 = vld [vmem:[#allocation34_spill] sm:$0xff] }
 0x129   : > { %v536_v15 = vadd.f32 %v528_v63, %v496_v44  ;;  %v1280_v0 = vmax.f32 %v1043_v62, %v1272_v58  ;;  %v1281_v6 = vmax.f32 %v1044_v14, %v1273_v5  ;;  %v760_v46 = vadd.f32 %v2900_v1, %v736_v23 }
 0x12a   : > { %v761_v8 = vadd.f32 %v2901_v53, %v737_v13  ;;  %v563_v57 = vadd.f32 %v552_v28, %v535_v35  ;;  %v973_v50 = vadd.f32 %v2903_v24, %v2902_v18  ;;  %v974_v45 = vadd.f32 %v2905_v7, %v2904_v29 }
 0x12b   : > { %v564_v16 = vadd.f32 %v552_v28, %v536_v15  ;;  %1288 = vst [vmem:[%s2591_s10 + $0x10] sm:$0xff] %v1280_v0  ;;  %1289 = vst [vmem:[%s2591_s10 + $0x18] sm:$0xff] %v1281_v6  ;;  %v784_v43 = vadd.f32 %v776_v55, %v760_v46  ;;  %v1013_v61 = vmul.f32 %v2474_v60, %v2893_v33 }
 0x12c   : > { %v785_v52 = vadd.f32 %v777_v39, %v761_v8  ;;  %v1014_v49 = vmul.f32 %v2489_v26, %v2893_v33  ;;  %v571_v19 = vmax.f32 %v563_v57, 0.0  ;;  %v997_v22 = vadd.f32 %v2906_v17, %v973_v50 }
 0x12d   : > { %v572_v12 = vmax.f32 %v564_v16, 0.0  ;;  %v998_v31 = vadd.f32 %v2907_v11, %v974_v45  ;;  %v792_v38 = vadd.f32 %v784_v43, %v552_v28  ;;  %v1210_v3 = vadd.f32 %v2909_v4, %v2908_v9 }
 0x12e   : > { %v793_v10 = vadd.f32 %v785_v52, %v552_v28  ;;  %v1211_v51 = vadd.f32 %v2911_v59, %v2910_v41  ;;  %v1021_v42 = vadd.f32 %v1013_v61, %v997_v22  ;;  %v1250_v60 = vmul.f32 %v2492_v2, %v2893_v33 }
 0x12f   : > { %v1022_v32 = vadd.f32 %v1014_v49, %v998_v31  ;;  %v1251_v26 = vmul.f32 %v2495_v40, %v2893_v33  ;;  %v800_v25 = vmax.f32 %v792_v38, 0.0  ;;  %v1234_v47 = vadd.f32 %v2912_v48, %v1210_v3 }
 0x130   : > { %v801_v37 = vmax.f32 %v793_v10, 0.0  ;;  %v1235_v63 = vadd.f32 %v2913_v20, %v1211_v51  ;;  %v1029_v58 = vadd.f32 %v1021_v42, %v552_v28 }
 0x131   : > { %v1030_v5 = vadd.f32 %v1022_v32, %v552_v28  ;;  %v808_v27 = vmax.f32 %v571_v19, %v800_v25  ;;  %v1258_v36 = vadd.f32 %v1250_v60, %v1234_v47 }
 0x132   : > { %v809_v54 = vmax.f32 %v572_v12, %v801_v37  ;;  %v1259_v44 = vadd.f32 %v1251_v26, %v1235_v63  ;;  %v1037_v62 = vmax.f32 %v1029_v58, 0.0 }
 0x133   : > { %v1038_v14 = vmax.f32 %v1030_v5, 0.0  ;;  %v1266_v2 = vadd.f32 %v1258_v36, %v552_v28 }
 0x134   : > { %v1267_v30 = vadd.f32 %v1259_v44, %v552_v28  ;;  %v1045_v56 = vmax.f32 %v808_v27, %v1037_v62 }
 0x135   : > { %v1046_v40 = vmax.f32 %v809_v54, %v1038_v14  ;;  %v1274_v33 = vmax.f32 %v1266_v2, 0.0 }
 0x136   : > { %v1275_v23 = vmax.f32 %v1267_v30, 0.0 }
 0x137   : > { %v1282_v34 = vmax.f32 %v1045_v56, %v1274_v33 }
 0x138   : > { %v1283_v21 = vmax.f32 %v1046_v40, %v1275_v23 }
 0x139   : > { %1290 = vst [vmem:[%s2591_s10 + $0x20] sm:$0xff] %v1282_v34 }
 0x13a   : > { %1291 = vst [vmem:[%s2591_s10 + $0x28] sm:$0xff] %v1283_v21 }
 0x13b PF: > { %s13_s12 = sadd.s32 1, %s1425_s12  }
 0x13c   : > { %p10_p4 = scmp.ge.s32.totalorder %s13_s12, 4  }
 0x13e   :  { %12 = sbr.rel (!%p10_p4) target bundleno = 1 (0x1), region = 65 }

// kernel: eog_branch_forward.4
= control target key start
LH: loop header
LB: loop body
LE: loop exit
PB: predicated region body
PF: predicated region fallthrough
CT: control target
= control target key end

     0   :  { %s803_s12 = smov 0   ;;  %s1040_s0 = inlined_call_operand.vmem [shape: f32[2,1,288,256], index: 0, kind: input, shape index: {}]   ;;  %s1041_s1 = inlined_call_operand.vmem [shape: f32[64,288], index: 1, kind: input, shape index: {}]   ;;  %s1042_s2 = inlined_call_operand.vmem [shape: f32[64,1], index: 2, kind: input, shape index: {}]   ;;  %s1043_s3 = inlined_call_operand.vmem [shape: f32[2,64,256], index: 3, kind: output, shape index: {}]  }
   0x1 LB: > { %s637_s13 = sadd.s32 4294967295, %s779_s12   ;;  %p641_p0 = scmp.ge.s32.totalorder %s779_s12, 1  ;;  %s779_s12 = sphi %s803_s12, %s13_s12  }
   0x2   : > { %p137_p1 = scmp.lt.s32.totalorder %s779_s12, 3 }
   0x4   : > { %p138_p2 = pnand %p641_p0, %p137_p1 }
   0x5   : > { %p161_p3 = scmp.lt.s32.totalorder (!%p138_p2), %s637_s13, 1  ;;  %v172_v0 = vld [vmem:[%s1041_s1 + $0x8] sm:$0xff] (!%p138_p2)  ;;  %v781_v1 = vmov (!%p138_p2), 0.0   ;;  %v782_v2 = vmov (!%p138_p2), 0   ;;  %v267_v62 = vld [vmem:[%s1042_s2] sm:$0xff] (!%p138_p2)  ;;  %v269_v63 = vld [vmem:[%s1042_s2 + $0x10] sm:$0xff] (!%p138_p2) }
   0x6   : > { %141 = sbr.rel (%p138_p2) target bundleno = 330 (0x14a), region = 32  ;;  %404 = vmatprep.mubr.f32.mxu1 (!%p138_p2), %v172_v0  ;;  %517 = vmatprep.mubr.f32.mxu0 (!%p138_p2), %v781_v1  ;;  %vm315_vm0 = vcmask (!%p138_p2), 261120  }
   0x7   : > { %771 = vset.pattern.permute.xlu0 (!%p138_p2), %v782_v2  ;;  %772 = vset.pattern.permute.xlu1 (!%p138_p2), %v782_v2 }
   0x8   : > { %277 = vperm.xlu0 (!%p138_p2), %771, %v267_v62   ;;  %287 = vperm.xlu1 (!%p138_p2), %772, %v269_v63  }
   0xd   : > { %s1045_s13 = smov (!%p161_p3, %s637_s13), 1 }
   0xe   : > { %s760_s16 = smul.u32 576, %s1045_s13  ;;  %s655_s6 = sshll.u32 %s1045_s13, 7 }
   0xf   : > { %s1015_s8 = scalar_lea.vmem %s1043_s3, %s655_s6 }
  0x10   : > { %s821_s19 = scalar_lea.vmem %s1040_s0, %s760_s16 }
  0x11   : > { %v196_v3 = vld [vmem:[%s821_s19 + $0x8] sm:$0xff]  ;;  %v198_v4 = vld [vmem:[%s821_s19 + $0x18] sm:$0xff]  ;;  %v195_v5 = vld [vmem:[%s821_s19] sm:$0xff] }
  0x12   : > { %v656_v6 = vpack.c.bf16 %v198_v4, %v196_v3  ;;  %v197_v7 = vld [vmem:[%s821_s19 + $0x10] sm:$0xff]  ;;  %v200_v8 = vld [vmem:[%s821_s19 + $0x28] sm:$0xff]  ;;  %v202_v9 = vld [vmem:[%s821_s19 + $0x38] sm:$0xff] }
  0x13   : > { %v658_v10 = vpack.c.bf16 %v197_v7, %v195_v5  ;;  %v660_v11 = vpack.c.bf16 %v202_v9, %v200_v8  ;;  %v199_v12 = vld [vmem:[%s821_s19 + $0x20] sm:$0xff]  ;;  %v201_v13 = vld [vmem:[%s821_s19 + $0x30] sm:$0xff]  ;;  %v204_v14 = vld [vmem:[%s821_s19 + $0x48] sm:$0xff] }
  0x14   : > { %657 = vmatprep.subr.bf16.mxu1 %v656_v6  ;;  %v206_v15 = vld [vmem:[%s821_s19 + $0x58] sm:$0xff]  ;;  %v662_v16 = vpack.c.bf16 %v201_v13, %v199_v12  ;;  %v203_v18 = vld [vmem:[%s821_s19 + $0x40] sm:$0xff]  ;;  %v205_v19 = vld [vmem:[%s821_s19 + $0x50] sm:$0xff] }
  0x15   : > { %659 = vmatpush1.bf16.msra.mxu1 %v658_v10  ;;  %v664_v17 = vpack.c.bf16 %v206_v15, %v204_v14  ;;  %v208_v20 = vld [vmem:[%s821_s19 + $0x68] sm:$0xff]  ;;  %v210_v21 = vld [vmem:[%s821_s19 + $0x78] sm:$0xff]  ;;  %v666_v22 = vpack.c.bf16 %v205_v19, %v203_v18  ;;  %v207_v24 = vld [vmem:[%s821_s19 + $0x60] sm:$0xff] }
  0x16   : > { %661 = vmatprep.subr.bf16.mxu1 %v660_v11  ;;  %v668_v23 = vpack.c.bf16 %v210_v21, %v208_v20  ;;  %v209_v25 = vld [vmem:[%s821_s19 + $0x70] sm:$0xff]  ;;  %v212_v26 = vld [vmem:[%s821_s19 + $0x88] sm:$0xff]  ;;  %v214_v27 = vld [vmem:[%s821_s19 + $0x98] sm:$0xff] }
  0x17   : > { %v670_v28 = vpack.c.bf16 %v209_v25, %v207_v24  ;;  %v672_v29 = vpack.c.bf16 %v214_v27, %v212_v26  ;;  %v211_v30 = vld [vmem:[%s821_s19 + $0x80] sm:$0xff]  ;;  %v213_v31 = vld [vmem:[%s821_s19 + $0x90] sm:$0xff]  ;;  %v216_v32 = vld [vmem:[%s821_s19 + $0xa8] sm:$0xff] }
  0x18   : > { %v218_v33 = vld [vmem:[%s821_s19 + $0xb8] sm:$0xff]  ;;  %v674_v34 = vpack.c.bf16 %v213_v31, %v211_v30  ;;  %v215_v36 = vld [vmem:[%s821_s19 + $0xa0] sm:$0xff]  ;;  %v217_v37 = vld [vmem:[%s821_s19 + $0xb0] sm:$0xff] }
  0x19   : > { %663 = vmatpush1.bf16.msra.mxu1 %v662_v16  ;;  %v676_v35 = vpack.c.bf16 %v218_v33, %v216_v32  ;;  %v220_v38 = vld [vmem:[%s821_s19 + $0xc8] sm:$0xff]  ;;  %v222_v39 = vld [vmem:[%s821_s19 + $0xd8] sm:$0xff]  ;;  %v678_v40 = vpack.c.bf16 %v217_v37, %v215_v36  ;;  %v259_v43 = vld [vmem:[%s821_s19 + $0x200] sm:$0xff] }
  0x1a   : > { %665 = vmatprep.subr.bf16.mxu1 %v664_v17  ;;  %v260_v41 = vld [vmem:[%s821_s19 + $0x208] sm:$0xff]  ;;  %v262_v42 = vld [vmem:[%s821_s19 + $0x218] sm:$0xff]  ;;  %v680_v44 = vpack.c.bf16 %v222_v39, %v220_v38  ;;  %v219_v45 = vld [vmem:[%s821_s19 + $0xc0] sm:$0xff] }
  0x1b   : > { %v221_v46 = vld [vmem:[%s821_s19 + $0xd0] sm:$0xff]  ;;  %v720_v47 = vpack.c.bf16 %v262_v42, %v260_v41  ;;  %v224_v49 = vld [vmem:[%s821_s19 + $0xe8] sm:$0xff]  ;;  %v226_v50 = vld [vmem:[%s821_s19 + $0xf8] sm:$0xff] }
  0x1c   : > { %v261_v48 = vld [vmem:[%s821_s19 + $0x210] sm:$0xff]  ;;  %v264_v52 = vld [vmem:[%s821_s19 + $0x228] sm:$0xff]  ;;  %v266_v53 = vld [vmem:[%s821_s19 + $0x238] sm:$0xff]  ;;  %v682_v56 = vpack.c.bf16 %v221_v46, %v219_v45  ;;  %v684_v60 = vpack.c.bf16 %v226_v50, %v224_v49 }
  0x1d   : > { %667 = vmatpush1.bf16.msra.mxu1 %v666_v22  ;;  %v722_v51 = vpack.c.bf16 %v261_v48, %v259_v43  ;;  %721 = vmatprep.subr.bf16.mxu0 %v720_v47  ;;  %v263_v54 = vld [vmem:[%s821_s19 + $0x220] sm:$0xff]  ;;  %v265_v55 = vld [vmem:[%s821_s19 + $0x230] sm:$0xff]  ;;  %v724_v58 = vpack.c.bf16 %v266_v53, %v264_v52  ;;  %v228_v0 = vld [vmem:[%s821_s19 + $0x108] sm:$0xff] }
  0x1e   : > { %669 = vmatprep.subr.bf16.mxu1 %v668_v23  ;;  %v223_v57 = vld [vmem:[%s821_s19 + $0xe0] sm:$0xff]  ;;  %v726_v59 = vpack.c.bf16 %v265_v55, %v263_v54  ;;  %v225_v61 = vld [vmem:[%s821_s19 + $0xf0] sm:$0xff]  ;;  %v230_v2 = vld [vmem:[%s821_s19 + $0x118] sm:$0xff] }
  0x1f   : > { %723 = vmatpush1.bf16.msra.mxu0 %v722_v51  ;;  %v268_v3 = vld [vmem:[%s1042_s2 + $0x8] sm:$0xff]  ;;  %v686_v4 = vpack.c.bf16 %v225_v61, %v223_v57  ;;  %v173_v5 = vld [vmem:[%s1041_s1 + $0x10] sm:$0xff]  ;;  %v270_v6 = vld [vmem:[%s1042_s2 + $0x18] sm:$0xff]  ;;  %v688_v7 = vpack.c.bf16 %v230_v2, %v228_v0 }
  0x20   : > { %725 = vmatprep.subr.bf16.mxu0 %v724_v58  ;;  %v227_v8 = vld [vmem:[%s821_s19 + $0x100] sm:$0xff]  ;;  %v229_v9 = vld [vmem:[%s821_s19 + $0x110] sm:$0xff]  ;;  %v232_v10 = vld [vmem:[%s821_s19 + $0x128] sm:$0xff]  ;;  %282 = vperm.xlu0 %771, %v268_v3  }
  0x21   : > { %671 = vmatpush1.bf16.msra.mxu1 %v670_v28  ;;  %v234_v11 = vld [vmem:[%s821_s19 + $0x138] sm:$0xff]  ;;  %292 = vperm.xlu1 %772, %v270_v6   ;;  %v271_v12 = vld [vmem:[%s1042_s2 + $0x20] sm:$0xff]  ;;  %v690_v13 = vpack.c.bf16 %v229_v9, %v227_v8  ;;  %v176_v14 = vld [vmem:[%s1041_s1 + $0x28] sm:$0xff] }
  0x22   : > { %673 = vmatprep.subr.bf16.mxu1 %v672_v29  ;;  %v272_v15 = vld [vmem:[%s1042_s2 + $0x28] sm:$0xff]  ;;  %v692_v16 = vpack.c.bf16 %v234_v11, %v232_v10  ;;  %v231_v17 = vld [vmem:[%s821_s19 + $0x120] sm:$0xff]  ;;  %v233_v18 = vld [vmem:[%s821_s19 + $0x130] sm:$0xff] }
  0x23   : > { %727 = vmatpush1.bf16.msra.mxu0 %v726_v59  ;;  %v236_v19 = vld [vmem:[%s821_s19 + $0x148] sm:$0xff]  ;;  %v238_v20 = vld [vmem:[%s821_s19 + $0x158] sm:$0xff]  ;;  %v273_v21 = vld [vmem:[%s1042_s2 + $0x30] sm:$0xff]  ;;  %v694_v22 = vpack.c.bf16 %v233_v18, %v231_v17 }
  0x24   : > { %297 = vperm.xlu0 %771, %v271_v12   ;;  %v179_v23 = vld [vmem:[%s1041_s1 + $0x40] sm:$0xff]  ;;  %v274_v24 = vld [vmem:[%s1042_s2 + $0x38] sm:$0xff]  ;;  %v696_v25 = vpack.c.bf16 %v238_v20, %v236_v19  ;;  %v237_v27 = vld [vmem:[%s821_s19 + $0x150] sm:$0xff] }
  0x25   : > { %675 = vmatpush1.bf16.msra.mxu1 %v674_v34  ;;  %302 = vperm.xlu1 %772, %v272_v15   ;;  %v235_v26 = vld [vmem:[%s821_s19 + $0x140] sm:$0xff]  ;;  %v240_v28 = vld [vmem:[%s821_s19 + $0x168] sm:$0xff]  ;;  %v242_v29 = vld [vmem:[%s821_s19 + $0x178] sm:$0xff] }
  0x26   : > { %677 = vmatprep.subr.bf16.mxu1 %v676_v35  ;;  %645 = vmatmul.mubr.msk.f32.vlgmr.msra.gmra.mrb[0].mxu0 %vm315_vm0, %v173_v5  ;;  %v698_v30 = vpack.c.bf16 %v237_v27, %v235_v26  ;;  %v182_v31 = vld [vmem:[%s1041_s1 + $0x58] sm:$0xff]  ;;  %v700_v32 = vpack.c.bf16 %v242_v29, %v240_v28  ;;  %v239_v33 = vld [vmem:[%s821_s19 + $0x160] sm:$0xff]  ;;  %v241_v34 = vld [vmem:[%s821_s19 + $0x170] sm:$0xff] }
  0x27   : > { %523 = vmatprep.mubr.f32.mxu0 %v781_v1  ;;  %v244_v35 = vld [vmem:[%s821_s19 + $0x188] sm:$0xff]  ;;  %v246_v36 = vld [vmem:[%s821_s19 + $0x198] sm:$0xff]  ;;  %v702_v37 = vpack.c.bf16 %v241_v34, %v239_v33  ;;  %v185_v38 = vld [vmem:[%s1041_s1 + $0x70] sm:$0xff] }
  0x28   : > { %307 = vperm.xlu0 %771, %v273_v21   ;;  %v704_v39 = vpack.c.bf16 %v246_v36, %v244_v35  ;;  %v245_v41 = vld [vmem:[%s821_s19 + $0x190] sm:$0xff]  ;;  %v248_v42 = vld [vmem:[%s821_s19 + $0x1a8] sm:$0xff]  ;;  %v250_v43 = vld [vmem:[%s821_s19 + $0x1b8] sm:$0xff] }
  0x29   : > { %679 = vmatpush1.bf16.msra.mxu1 %v678_v40  ;;  %312 = vperm.xlu1 %772, %v274_v24   ;;  %v243_v40 = vld [vmem:[%s821_s19 + $0x180] sm:$0xff]  ;;  %v188_v45 = vld [vmem:[%s1041_s1 + $0x88] sm:$0xff]  ;;  %v708_v46 = vpack.c.bf16 %v250_v43, %v248_v42  ;;  %v249_v48 = vld [vmem:[%s821_s19 + $0x1b0] sm:$0xff] }
  0x2a   : > { %681 = vmatprep.subr.bf16.mxu1 %v680_v44  ;;  %646 = vmatmul.mubr.msk.f32.gmra.mrb[2].mxu0 %vm315_vm0, %v176_v14  ;;  %v706_v44 = vpack.c.bf16 %v245_v41, %v243_v40  ;;  %v247_v47 = vld [vmem:[%s821_s19 + $0x1a0] sm:$0xff]  ;;  %v252_v49 = vld [vmem:[%s821_s19 + $0x1c8] sm:$0xff]  ;;  %v254_v50 = vld [vmem:[%s821_s19 + $0x1d8] sm:$0xff] }
  0x2b   : > { %529 = vmatprep.mubr.f32.mxu0 %v781_v1  ;;  %v710_v51 = vpack.c.bf16 %v249_v48, %v247_v47  ;;  %v191_v52 = vld [vmem:[%s1041_s1 + $0xa0] sm:$0xff]  ;;  %v712_v53 = vpack.c.bf16 %v254_v50, %v252_v49  ;;  %v253_v55 = vld [vmem:[%s821_s19 + $0x1d0] sm:$0xff]  ;;  %v258_v57 = vld [vmem:[%s821_s19 + $0x1f8] sm:$0xff] }
  0x2c   : > { %v251_v54 = vld [vmem:[%s821_s19 + $0x1c0] sm:$0xff]  ;;  %v194_v59 = vld [vmem:[%s1041_s1 + $0xb8] sm:$0xff]  ;;  %v257_v62 = vld [vmem:[%s821_s19 + $0x1f0] sm:$0xff] }
  0x2d   : > { %683 = vmatpush1.bf16.msra.mxu1 %v682_v56  ;;  %v256_v56 = vld [vmem:[%s821_s19 + $0x1e8] sm:$0xff]  ;;  %v714_v58 = vpack.c.bf16 %v253_v55, %v251_v54  ;;  %v255_v61 = vld [vmem:[%s821_s19 + $0x1e0] sm:$0xff]  ;;  %v174_v2 = vld [vmem:[%s1041_s1 + $0x18] sm:$0xff] }
  0x2e   : > { %685 = vmatprep.subr.bf16.mxu1 %v684_v60  ;;  %647 = vmatmul.mubr.msk.f32.gmra.mrb[4].mxu0 %vm315_vm0, %v179_v23  ;;  %v716_v60 = vpack.c.bf16 %v258_v57, %v256_v56  ;;  %v718_v63 = vpack.c.bf16 %v257_v62, %v255_v61  ;;  %v171_v0 = vld [vmem:[%s1041_s1] sm:$0xff]  ;;  %v178_v3 = vld [vmem:[%s1041_s1 + $0x38] sm:$0xff]  ;;  %v181_v5 = vld [vmem:[%s1041_s1 + $0x50] sm:$0xff] }
  0x2f   : > { %535 = vmatprep.mubr.f32.mxu0 %v781_v1  ;;  %v180_v6 = vld [vmem:[%s1041_s1 + $0x48] sm:$0xff]  ;;  %v183_v8 = vld [vmem:[%s1041_s1 + $0x60] sm:$0xff]  ;;  %v186_v10 = vld [vmem:[%s1041_s1 + $0x78] sm:$0xff] }
  0x30   : > { %v187_v9 = vld [vmem:[%s1041_s1 + $0x80] sm:$0xff]  ;;  %v190_v11 = vld [vmem:[%s1041_s1 + $0x98] sm:$0xff]  ;;  %v189_v12 = vld [vmem:[%s1041_s1 + $0x90] sm:$0xff] }
  0x31   : > { %687 = vmatpush1.bf16.msra.mxu1 %v686_v4  ;;  %v177_v4 = vld [vmem:[%s1041_s1 + $0x30] sm:$0xff]  ;;  %v192_v14 = vld [vmem:[%s1041_s1 + $0xa8] sm:$0xff] }
  0x32   : > { %689 = vmatprep.subr.bf16.mxu1 %v688_v7  ;;  %648 = vmatmul.mubr.msk.f32.gmra.mrb[6].mxu0 %vm315_vm0, %v182_v31  ;;  %v184_v7 = vld [vmem:[%s1041_s1 + $0x68] sm:$0xff] }
  0x33   : > { %541 = vmatprep.mubr.f32.mxu0 %v781_v1 }
  0x35   : > { %691 = vmatpush1.bf16.msra.mxu1 %v690_v13  ;;  %v193_v13 = vld [vmem:[%s1041_s1 + $0xb0] sm:$0xff] }
  0x36   : > { %693 = vmatprep.subr.bf16.mxu1 %v692_v16  ;;  %649 = vmatmul.mubr.msk.f32.gmra.mrb[8].mxu0 %vm315_vm0, %v185_v38 }
  0x37   : > { %547 = vmatprep.mubr.f32.mxu0 %v781_v1 }
  0x39   : > { %695 = vmatpush1.bf16.msra.mxu1 %v694_v22 }
  0x3a   : > { %697 = vmatprep.subr.bf16.mxu1 %v696_v25  ;;  %650 = vmatmul.mubr.msk.f32.gmra.mrb[10].mxu0 %vm315_vm0, %v188_v45 }
  0x3b   : > { %553 = vmatprep.mubr.f32.mxu0 %v781_v1 }
  0x3d   : > { %699 = vmatpush1.bf16.msra.mxu1 %v698_v30 }
  0x3e   : > { %701 = vmatprep.subr.bf16.mxu1 %v700_v32  ;;  %651 = vmatmul.mubr.msk.f32.gmra.mrb[12].mxu0 %vm315_vm0, %v191_v52 }
  0x3f   : > { %559 = vmatprep.mubr.f32.mxu0 %v781_v1  ;;  %v175_v1 = vld [vmem:[%s1041_s1 + $0x20] sm:$0xff] }
  0x41   : > { %703 = vmatpush1.bf16.msra.mxu1 %v702_v37 }
  0x42   : > { %705 = vmatprep.subr.bf16.mxu1 %v704_v39  ;;  %652 = vmatmul.mubr.msk.f32.gmra.mrb[14].mxu0 %vm315_vm0, %v194_v59 }
  0x45   : > { %707 = vmatpush1.bf16.msra.mxu1 %v706_v44 }
  0x46   : > { %709 = vmatprep.subr.bf16.mxu1 %v708_v46 }
  0x49   : > { %711 = vmatpush1.bf16.msra.mxu1 %v710_v51 }
  0x4a   : > { %713 = vmatprep.subr.bf16.mxu1 %v712_v53 }
  0x4d   : > { %715 = vmatpush1.bf16.msra.mxu1 %v714_v58 }
  0x4e   : > { %717 = vmatprep.subr.bf16.mxu1 %v716_v60 }
  0x51   : > { %719 = vmatpush1.bf16.msra.mxu1 %v718_v63 }
  0x54   : > { %405 = vmatmul.mubr.f32.vlgmr.msra.gmra.mrb[0].mxu1 %v171_v0 }
  0x55   : > { %410 = vmatprep.mubr.f32.mxu1 %v175_v1 }
  0x58   : > { %411 = vmatmul.mubr.f32.gmra.mrb[2].mxu1 %v174_v2 }
  0x59   : > { %416 = vmatprep.mubr.f32.mxu1 %v178_v3 }
  0x5c   : > { %417 = vmatmul.mubr.f32.gmra.mrb[4].mxu1 %v177_v4 }
  0x5d   : > { %422 = vmatprep.mubr.f32.mxu1 %v181_v5 }
  0x60   : > { %423 = vmatmul.mubr.f32.gmra.mrb[6].mxu1 %v180_v6 }
  0x61   : > { %428 = vmatprep.mubr.f32.mxu1 %v184_v7 }
  0x64   : > { %429 = vmatmul.mubr.f32.gmra.mrb[8].mxu1 %v183_v8 }
  0x65   : > { %434 = vmatprep.mubr.f32.mxu1 %v187_v9 }
  0x68   : > { %435 = vmatmul.mubr.f32.gmra.mrb[10].mxu1 %v186_v10 }
  0x69   : > { %440 = vmatprep.mubr.f32.mxu1 %v190_v11 }
  0x6c   : > { %441 = vmatmul.mubr.f32.gmra.mrb[12].mxu1 %v189_v12 }
  0x6d   : > { %446 = vmatprep.mubr.f32.mxu1 %v193_v13 }
  0x70   : > { %447 = vmatmul.mubr.f32.gmra.mrb[14].mxu1 %v192_v14 }
  0x87   : > { %v278_v31 = vpop.permute.xlu0 %277  ;;  %v288_v42 = vpop.permute.xlu1 %287 }
  0x9f   : > { %v283_v36 = vpop.permute.xlu0 %282 }
  0xa0   : > { %v293_v51 = vpop.permute.xlu1 %292 }
  0xa3   : > { %v298_v58 = vpop.permute.xlu0 %297 }
  0xa4   : > { %v303_v1 = vpop.permute.xlu1 %302 }
  0xa7   : > { %v308_v8 = vpop.permute.xlu0 %307 }
  0xf9   : > { %v519_v15 = vpop.f32.mrb[0].mxu0 }
  0xfa   : > { %v521_v16 = vpop.f32.mrb[1].mxu0 }
  0xfd   : > { %v525_v17 = vpop.f32.mrb[2].mxu0 }
  0xfe   : > { %v527_v18 = vpop.f32.mrb[3].mxu0 }
 0x101   : > { %v531_v19 = vpop.f32.mrb[4].mxu0 }
 0x102   : > { %v533_v20 = vpop.f32.mrb[5].mxu0 }
 0x105   : > { %v537_v21 = vpop.f32.mrb[6].mxu0 }
 0x106   : > { %v539_v22 = vpop.f32.mrb[7].mxu0 }
 0x109   : > { %v543_v23 = vpop.f32.mrb[8].mxu0 }
 0x10a   : > { %v545_v24 = vpop.f32.mrb[9].mxu0 }
 0x10d   : > { %v549_v25 = vpop.f32.mrb[10].mxu0 }
 0x10e   : > { %v551_v26 = vpop.f32.mrb[11].mxu0 }
 0x111   : > { %v1003_v27 = vpop.f32.mrb[12].mxu0 }
 0x112   : > { %v1005_v28 = vpop.f32.mrb[13].mxu0 }
 0x115   : > { %v1007_v29 = vpop.f32.mrb[14].mxu0 }
 0x116   : > { %v1009_v30 = vpop.f32.mrb[15].mxu0 }
 0x127   : > { %v406_v32 = vpop.f32.mrb[0].mxu1 }
 0x128   : > { %v407_v33 = vadd.f32 %v406_v32, %v278_v31  ;;  %v408_v34 = vpop.f32.mrb[1].mxu1 }
 0x129   : > { %v409_v35 = vadd.f32 %v408_v34, %v278_v31 }
 0x12a   : > { %v520_v37 = vadd.f32 %v519_v15, %v407_v33  ;;  %v313_v15 = vpop.permute.xlu1 %312 }
 0x12b   : > { %v522_v38 = vadd.f32 %v521_v16, %v409_v35  ;;  %v412_v39 = vpop.f32.mrb[2].mxu1 }
 0x12c   : > { %566 = vst [vmem:[%s1015_s8] sm:$0xff] %v520_v37  ;;  %v413_v40 = vadd.f32 %v412_v39, %v283_v36  ;;  %v414_v41 = vpop.f32.mrb[3].mxu1 }
 0x12d   : > { %567 = vst [vmem:[%s1015_s8 + $0x8] sm:$0xff] %v522_v38  ;;  %v415_v43 = vadd.f32 %v414_v41, %v283_v36 }
 0x12e   : > { %v526_v44 = vadd.f32 %v525_v17, %v413_v40 }
 0x12f   : > { %v528_v45 = vadd.f32 %v527_v18, %v415_v43  ;;  %v418_v46 = vpop.f32.mrb[4].mxu1 }
 0x130   : > { %568 = vst [vmem:[%s1015_s8 + $0x10] sm:$0xff] %v526_v44  ;;  %v419_v47 = vadd.f32 %v418_v46, %v288_v42  ;;  %v420_v48 = vpop.f32.mrb[5].mxu1 }
 0x131   : > { %569 = vst [vmem:[%s1015_s8 + $0x18] sm:$0xff] %v528_v45  ;;  %v421_v49 = vadd.f32 %v420_v48, %v288_v42 }
 0x132   : > { %v532_v50 = vadd.f32 %v531_v19, %v419_v47 }
 0x133   : > { %v534_v52 = vadd.f32 %v533_v20, %v421_v49  ;;  %v424_v53 = vpop.f32.mrb[6].mxu1 }
 0x134   : > { %570 = vst [vmem:[%s1015_s8 + $0x20] sm:$0xff] %v532_v50  ;;  %v425_v54 = vadd.f32 %v424_v53, %v293_v51  ;;  %v426_v55 = vpop.f32.mrb[7].mxu1 }
 0x135   : > { %571 = vst [vmem:[%s1015_s8 + $0x28] sm:$0xff] %v534_v52  ;;  %v427_v56 = vadd.f32 %v426_v55, %v293_v51 }
 0x136   : > { %v538_v57 = vadd.f32 %v537_v21, %v425_v54 }
 0x137   : > { %v540_v59 = vadd.f32 %v539_v22, %v427_v56  ;;  %v430_v60 = vpop.f32.mrb[8].mxu1 }
 0x138   : > { %572 = vst [vmem:[%s1015_s8 + $0x30] sm:$0xff] %v538_v57  ;;  %v431_v61 = vadd.f32 %v430_v60, %v298_v58  ;;  %v432_v62 = vpop.f32.mrb[9].mxu1 }
 0x139   : > { %573 = vst [vmem:[%s1015_s8 + $0x38] sm:$0xff] %v540_v59  ;;  %v433_v63 = vadd.f32 %v432_v62, %v298_v58 }
 0x13a   : > { %v544_v0 = vadd.f32 %v543_v23, %v431_v61 }
 0x13b   : > { %v546_v2 = vadd.f32 %v545_v24, %v433_v63  ;;  %v436_v3 = vpop.f32.mrb[10].mxu1 }
 0x13c   : > { %574 = vst [vmem:[%s1015_s8 + $0x40] sm:$0xff] %v544_v0  ;;  %v437_v4 = vadd.f32 %v436_v3, %v303_v1  ;;  %v438_v5 = vpop.f32.mrb[11].mxu1 }
 0x13d   : > { %575 = vst [vmem:[%s1015_s8 + $0x48] sm:$0xff] %v546_v2  ;;  %v439_v6 = vadd.f32 %v438_v5, %v303_v1 }
 0x13e   : > { %v550_v7 = vadd.f32 %v549_v25, %v437_v4 }
 0x13f   : > { %v552_v9 = vadd.f32 %v551_v26, %v439_v6  ;;  %v442_v10 = vpop.f32.mrb[12].mxu1 }
 0x140   : > { %576 = vst [vmem:[%s1015_s8 + $0x50] sm:$0xff] %v550_v7  ;;  %v443_v11 = vadd.f32 %v442_v10, %v308_v8  ;;  %v444_v12 = vpop.f32.mrb[13].mxu1 }
 0x141   : > { %577 = vst [vmem:[%s1015_s8 + $0x58] sm:$0xff] %v552_v9  ;;  %v445_v13 = vadd.f32 %v444_v12, %v308_v8 }
 0x142   : > { %v556_v14 = vadd.f32 %v1003_v27, %v443_v11 }
 0x143   : > { %v558_v16 = vadd.f32 %v1005_v28, %v445_v13  ;;  %v448_v17 = vpop.f32.mrb[14].mxu1 }
 0x144   : > { %578 = vst [vmem:[%s1015_s8 + $0x60] sm:$0xff] %v556_v14  ;;  %v449_v18 = vadd.f32 %v448_v17, %v313_v15  ;;  %v450_v19 = vpop.f32.mrb[15].mxu1 }
 0x145   : > { %579 = vst [vmem:[%s1015_s8 + $0x68] sm:$0xff] %v558_v16  ;;  %v451_v20 = vadd.f32 %v450_v19, %v313_v15 }
 0x146   : > { %v562_v21 = vadd.f32 %v1007_v29, %v449_v18 }
 0x147   : > { %v564_v22 = vadd.f32 %v1009_v30, %v451_v20 }
 0x148   : > { %580 = vst [vmem:[%s1015_s8 + $0x70] sm:$0xff] %v562_v21 }
 0x149   : > { %581 = vst [vmem:[%s1015_s8 + $0x78] sm:$0xff] %v564_v22 }
 0x14a PF: > { %s13_s12 = sadd.s32 1, %s779_s12  }
 0x14b   : > { %p10_p4 = scmp.ge.s32.totalorder %s13_s12, 4  }
 0x14d   :  { %12 = sbr.rel (!%p10_p4) target bundleno = 1 (0x1), region = 62 }

// kernel: eog_branch_forward.5
= control target key start
LH: loop header
LB: loop body
LE: loop exit
PB: predicated region body
PF: predicated region fallthrough
CT: control target
= control target key end

     0   :  { %s5167_s0 = inlined_call_operand.vmem [shape: f32[8,16384], index: 0, kind: input, shape index: {}]   ;;  %s5168_s1 = inlined_call_operand.vmem [shape: f32[128,16400], index: 1, kind: input, shape index: {}]   ;;  %s5169_s2 = inlined_call_operand.vmem [shape: f32[8,6], index: 2, kind: input, shape index: {}]   ;;  %s5170_s3 = inlined_call_operand.vmem [shape: f32[6,16], index: 3, kind: input, shape index: {}]   ;;  %s5171_s4 = inlined_call_operand.vmem [shape: f32[1,16], index: 4, kind: input, shape index: {}]   ;;  %s5172_s5 = inlined_call_operand.vmem [shape: f32[16,128], index: 5, kind: input, shape index: {}]   ;;  %s5173_s6 = inlined_call_operand.vmem [shape: f32[1,128], index: 6, kind: input, shape index: {}]   ;;  %s5174_s7 = inlined_call_operand.vmem [shape: f32[8,128], index: 7, kind: output, shape index: {}]  }
   0x1   :  { %5175 = sst [smem:[#allocation3_spill]] %s5168_s1 }
   0x2   :  { %s3820_s24 = smov 0   ;;  %s3822_s25 = smov 0  }
   0x3   :  { %s3824_s26 = smov 0  }
   0x4 LB: > { %s3837_s28 = sadd.s32 1, %s3696_s26   ;;  %s50_s30 = sadd.s32 1, %s3692_s25  ;;  %s3696_s26 = sphi %s3824_s26, %s5197_s26   ;;  %s3692_s25 = sphi %s3822_s25, %s5196_s25   ;;  %s3688_s24 = sphi %s3820_s24, %s5195_s24  }
   0x5   : > { %s47_s29 = ssub.s32 %s3696_s26, %s3837_s28  ;;  %p57_p1 = scmp.ne.s32.totalorder %s3692_s25, %s3688_s24 }
   0x6   : > { %p48_p0 = scmp.eq.s32.totalorder %s47_s29, 0  ;;  %p58_p2 = scmp.eq.s32.totalorder %s3696_s26, 0 }
   0x7   : > { %p2863_p4 = scmp.ge.s32.totalorder %s3696_s26, 4 }
   0x8   : > { %s3846_s8 = scalar_select %p48_p0, %s3692_s25, %s50_s30  }
   0x9   : > { %p59_p3 = por %p58_p2, %p57_p1  ;;  %224 = sbr.rel (%p2863_p4) target bundleno = 212 (0xd4), region = 36 }
  0x10   : > { %236 = sbr.rel (!%p59_p3) target bundleno = 212 (0xd4), region = 44  ;;  %s238_s9 = sand.u32 (%p59_p3), 1, %s3692_s25  }
  0x11   : > { %s2865_s10 = sshll.u32 (%p59_p3), %s3696_s26, 5  ;;  %s2864_s11 = sshll.u32 (%p59_p3), %s238_s9, 12 }
  0x12   : > { %s242_s12 = ssub.s32 (%p59_p3), 129, %s2865_s10  ;;  %s2900_s13 = sshll.u32 (%p59_p3), %s3696_s26, 8 }
  0x13   : > { %p243_p5 = scmp.lt.s32.totalorder (%p59_p3), %s242_s12, 32  ;;  %s5176_s1 = sld [smem:[#allocation3_spill]] (%p59_p3) }
  0x14   : > { %s3859_s19 = scalar_lea.vmem (%p59_p3), [#allocation2], %s2864_s11  }
  0x17   : > { %s5199_s12 = smov (!%p243_p5, %s242_s12), 32 }
  0x18   : > { %s2866_s17 = sshll.u32 %s5199_s12, 11  ;;  %s3857_s18 = sshll.u32 %s5199_s12, 3 }
  0x19   : > { %s3855_s16 = scalar_lea.vmem %s5176_s1, %s2900_s13   ;;  %p2870_p6 = scmp.eq.s32.totalorder %s2866_s17, 0 }
  0x1a   : > { %p253_p7 = scmp.lt.u32.totalorder (!%p2870_p6), %s3857_s18, 8 }
  0x1b   : > { %252 = sbr.rel (%p2870_p6) target bundleno = 212 (0xd4), region = 48 }
  0x22   : > { %256 = sbr.rel (%p253_p7) target bundleno = 193 (0xc1), region = 52  ;;  %s3863_s20 = sand.u32 (!%p253_p7), 7, %s3857_s18  }
  0x23   : > { %p302_p8 = scmp.eq.s32.totalorder (!%p253_p7), %s3863_s20, 0  ;;  %p2871_p9 = scmp.ne.s32.totalorder (!%p253_p7), %s3863_s20, 0 }
  0x29   : > { %305 = sbr.rel (%p2871_p9) target bundleno = 108 (0x6c), region = 67  ;;  %s306_s21 = sshrl.u32 (!%p2871_p9), %s3857_s18, 3 }
  0x2a   : > { %s3870_s22 = sshrl.u32 (!%p2871_p9), %s306_s21, 2 }
  0x2b   : > { %p2872_p10 = scmp.le.s32.totalorder (!%p2871_p9), %s3870_s22, 0 }
  0x30   : > { %2793 = sbr.rel (%p2872_p10) target bundleno = 88 (0x58), region = 164  ;;  %s5177_s23 = smov (!%p2872_p10), %s3859_s19 }
  0x31   : > { %s5178_s29 = smov (!%p2872_p10), %s3855_s16  ;;  %s3879_s30 = smov (!%p2872_p10), 0  }
  0x32   : > { %s3881_s9 = smov (!%p2872_p10), 0  }
  0x37 LB: >> { %v319_v0 = vld [vmem:[%s3704_s29] sm:$0xff]  ;;  %v321_v1 = vld [vmem:[%s3704_s29 + $0x8] sm:$0xff]  ;;  %v323_v2 = vld [vmem:[%s3704_s29 + $0x10] sm:$0xff]  ;;  %s447_s10 = sadd.s32 1, %s3708_s30  ;;  %s313_s9 = sadd.s32 1, %s3712_s9   ;;  %s3712_s9 = sphi %s3881_s9, %s313_s9   ;;  %s3708_s30 = sphi %s3879_s30, %s5181_s30   ;;  %s3704_s29 = sphi %s5178_s29, %s5180_s29   ;;  %s3700_s23 = sphi %s5177_s23, %s5179_s23  }
  0x38   : >> { %320 = vst [vmem:[%s3700_s23] sm:$0xff] %v319_v0  ;;  %322 = vst [vmem:[%s3700_s23 + $0x8] sm:$0xff] %v321_v1  ;;  %v325_v3 = vld [vmem:[%s3704_s29 + $0x18] sm:$0xff]  ;;  %v327_v4 = vld [vmem:[%s3704_s29 + $0x408] sm:$0xff]  ;;  %p448_p11 = scmp.ge.s32.totalorder %s447_s10, %s3870_s22  ;;  %p312_p12 = scmp.ge.s32.totalorder %s313_s9, %s3870_s22 }
  0x39   : >> { %324 = vst [vmem:[%s3700_s23 + $0x10] sm:$0xff] %v323_v2  ;;  %v329_v5 = vld [vmem:[%s3704_s29 + $0x410] sm:$0xff]  ;;  %326 = vst [vmem:[%s3700_s23 + $0x18] sm:$0xff] %v325_v3  ;;  %v331_v6 = vld [vmem:[%s3704_s29 + $0x418] sm:$0xff] }
  0x3a   : >> { %328 = vst [vmem:[%s3700_s23 + $0x100] sm:$0xff] %v327_v4  ;;  %330 = vst [vmem:[%s3700_s23 + $0x108] sm:$0xff] %v329_v5  ;;  %v333_v7 = vld [vmem:[%s3704_s29 + $0x420] sm:$0xff]  ;;  %v335_v8 = vld [vmem:[%s3704_s29 + $0x810] sm:$0xff]  ;;  %s5201_s10 = smov (%p448_p11, %s447_s10), 0 }
  0x3b   : >> { %332 = vst [vmem:[%s3700_s23 + $0x110] sm:$0xff] %v331_v6  ;;  %334 = vst [vmem:[%s3700_s23 + $0x118] sm:$0xff] %v333_v7  ;;  %v337_v9 = vld [vmem:[%s3704_s29 + $0x818] sm:$0xff]  ;;  %v339_v10 = vld [vmem:[%s3704_s29 + $0x820] sm:$0xff]  ;;  %s2873_s11 = sshll.u32 %s5201_s10, 5  ;;  %s5181_s30 = smov %s5201_s10 }
  0x3c   : >> { %336 = vst [vmem:[%s3700_s23 + $0x200] sm:$0xff] %v335_v8  ;;  %v341_v11 = vld [vmem:[%s3704_s29 + $0x828] sm:$0xff]  ;;  %338 = vst [vmem:[%s3700_s23 + $0x208] sm:$0xff] %v337_v9  ;;  %v343_v12 = vld [vmem:[%s3704_s29 + $0xc18] sm:$0xff]  ;;  %s3937_s12 = scalar_lea.vmem %s3855_s16, %s2873_s11   ;;  %s3940_s13 = scalar_lea.vmem %s3859_s19, %s2873_s11 [#allocation2]  }
  0x3d   : >> { %340 = vst [vmem:[%s3700_s23 + $0x210] sm:$0xff] %v339_v10  ;;  %342 = vst [vmem:[%s3700_s23 + $0x218] sm:$0xff] %v341_v11  ;;  %v345_v13 = vld [vmem:[%s3704_s29 + $0xc20] sm:$0xff]  ;;  %v347_v14 = vld [vmem:[%s3704_s29 + $0xc28] sm:$0xff] }
  0x3e   : >> { %344 = vst [vmem:[%s3700_s23 + $0x300] sm:$0xff] %v343_v12  ;;  %346 = vst [vmem:[%s3700_s23 + $0x308] sm:$0xff] %v345_v13  ;;  %v349_v15 = vld [vmem:[%s3704_s29 + $0xc30] sm:$0xff]  ;;  %v351_v16 = vld [vmem:[%s3704_s29 + $0x1020] sm:$0xff] }
  0x3f   : >> { %348 = vst [vmem:[%s3700_s23 + $0x310] sm:$0xff] %v347_v14  ;;  %v353_v17 = vld [vmem:[%s3704_s29 + $0x1028] sm:$0xff]  ;;  %350 = vst [vmem:[%s3700_s23 + $0x318] sm:$0xff] %v349_v15  ;;  %v355_v18 = vld [vmem:[%s3704_s29 + $0x1030] sm:$0xff] }
  0x40   : >> { %352 = vst [vmem:[%s3700_s23 + $0x400] sm:$0xff] %v351_v16  ;;  %354 = vst [vmem:[%s3700_s23 + $0x408] sm:$0xff] %v353_v17  ;;  %v357_v19 = vld [vmem:[%s3704_s29 + $0x1038] sm:$0xff]  ;;  %v359_v20 = vld [vmem:[%s3704_s29 + $0x1428] sm:$0xff] }
  0x41   : >> { %356 = vst [vmem:[%s3700_s23 + $0x410] sm:$0xff] %v355_v18  ;;  %358 = vst [vmem:[%s3700_s23 + $0x418] sm:$0xff] %v357_v19  ;;  %v361_v21 = vld [vmem:[%s3704_s29 + $0x1430] sm:$0xff]  ;;  %v363_v22 = vld [vmem:[%s3704_s29 + $0x1438] sm:$0xff] }
  0x42   : >> { %360 = vst [vmem:[%s3700_s23 + $0x500] sm:$0xff] %v359_v20  ;;  %v365_v23 = vld [vmem:[%s3704_s29 + $0x1440] sm:$0xff]  ;;  %362 = vst [vmem:[%s3700_s23 + $0x508] sm:$0xff] %v361_v21  ;;  %v367_v24 = vld [vmem:[%s3704_s29 + $0x1830] sm:$0xff] }
  0x43   : >> { %364 = vst [vmem:[%s3700_s23 + $0x510] sm:$0xff] %v363_v22  ;;  %366 = vst [vmem:[%s3700_s23 + $0x518] sm:$0xff] %v365_v23  ;;  %v369_v25 = vld [vmem:[%s3704_s29 + $0x1838] sm:$0xff]  ;;  %v371_v26 = vld [vmem:[%s3704_s29 + $0x1840] sm:$0xff] }
  0x44   : >> { %368 = vst [vmem:[%s3700_s23 + $0x600] sm:$0xff] %v367_v24  ;;  %370 = vst [vmem:[%s3700_s23 + $0x608] sm:$0xff] %v369_v25  ;;  %v373_v27 = vld [vmem:[%s3704_s29 + $0x1848] sm:$0xff]  ;;  %v375_v28 = vld [vmem:[%s3704_s29 + $0x1c38] sm:$0xff] }
  0x45   : >> { %372 = vst [vmem:[%s3700_s23 + $0x610] sm:$0xff] %v371_v26  ;;  %v377_v29 = vld [vmem:[%s3704_s29 + $0x1c40] sm:$0xff]  ;;  %374 = vst [vmem:[%s3700_s23 + $0x618] sm:$0xff] %v373_v27  ;;  %v379_v30 = vld [vmem:[%s3704_s29 + $0x1c48] sm:$0xff] }
  0x46   : >> { %376 = vst [vmem:[%s3700_s23 + $0x700] sm:$0xff] %v375_v28  ;;  %378 = vst [vmem:[%s3700_s23 + $0x708] sm:$0xff] %v377_v29  ;;  %v381_v31 = vld [vmem:[%s3704_s29 + $0x1c50] sm:$0xff]  ;;  %v383_v32 = vld [vmem:[%s3704_s29 + $0x2040] sm:$0xff] }
  0x47   : >> { %380 = vst [vmem:[%s3700_s23 + $0x710] sm:$0xff] %v379_v30  ;;  %382 = vst [vmem:[%s3700_s23 + $0x718] sm:$0xff] %v381_v31  ;;  %v385_v33 = vld [vmem:[%s3704_s29 + $0x2048] sm:$0xff]  ;;  %v387_v34 = vld [vmem:[%s3704_s29 + $0x2050] sm:$0xff] }
  0x48   : >> { %384 = vst [vmem:[%s3700_s23 + $0x800] sm:$0xff] %v383_v32  ;;  %v389_v35 = vld [vmem:[%s3704_s29 + $0x2058] sm:$0xff]  ;;  %386 = vst [vmem:[%s3700_s23 + $0x808] sm:$0xff] %v385_v33  ;;  %v391_v36 = vld [vmem:[%s3704_s29 + $0x2448] sm:$0xff] }
  0x49   : >> { %388 = vst [vmem:[%s3700_s23 + $0x810] sm:$0xff] %v387_v34  ;;  %390 = vst [vmem:[%s3700_s23 + $0x818] sm:$0xff] %v389_v35  ;;  %v393_v37 = vld [vmem:[%s3704_s29 + $0x2450] sm:$0xff]  ;;  %v395_v38 = vld [vmem:[%s3704_s29 + $0x2458] sm:$0xff] }
  0x4a   : >> { %392 = vst [vmem:[%s3700_s23 + $0x900] sm:$0xff] %v391_v36  ;;  %394 = vst [vmem:[%s3700_s23 + $0x908] sm:$0xff] %v393_v37  ;;  %v397_v39 = vld [vmem:[%s3704_s29 + $0x2460] sm:$0xff]  ;;  %v399_v40 = vld [vmem:[%s3704_s29 + $0x2850] sm:$0xff] }
  0x4b   : >> { %396 = vst [vmem:[%s3700_s23 + $0x910] sm:$0xff] %v395_v38  ;;  %v401_v41 = vld [vmem:[%s3704_s29 + $0x2858] sm:$0xff]  ;;  %398 = vst [vmem:[%s3700_s23 + $0x918] sm:$0xff] %v397_v39  ;;  %v403_v42 = vld [vmem:[%s3704_s29 + $0x2860] sm:$0xff] }
  0x4c   : >> { %400 = vst [vmem:[%s3700_s23 + $0xa00] sm:$0xff] %v399_v40  ;;  %402 = vst [vmem:[%s3700_s23 + $0xa08] sm:$0xff] %v401_v41  ;;  %v405_v43 = vld [vmem:[%s3704_s29 + $0x2868] sm:$0xff]  ;;  %v407_v44 = vld [vmem:[%s3704_s29 + $0x2c58] sm:$0xff] }
  0x4d   : >> { %404 = vst [vmem:[%s3700_s23 + $0xa10] sm:$0xff] %v403_v42  ;;  %406 = vst [vmem:[%s3700_s23 + $0xa18] sm:$0xff] %v405_v43  ;;  %v409_v45 = vld [vmem:[%s3704_s29 + $0x2c60] sm:$0xff]  ;;  %v411_v46 = vld [vmem:[%s3704_s29 + $0x2c68] sm:$0xff] }
  0x4e   : >> { %408 = vst [vmem:[%s3700_s23 + $0xb00] sm:$0xff] %v407_v44  ;;  %v413_v47 = vld [vmem:[%s3704_s29 + $0x2c70] sm:$0xff]  ;;  %410 = vst [vmem:[%s3700_s23 + $0xb08] sm:$0xff] %v409_v45  ;;  %v415_v48 = vld [vmem:[%s3704_s29 + $0x3060] sm:$0xff] }
  0x4f   : >> { %412 = vst [vmem:[%s3700_s23 + $0xb10] sm:$0xff] %v411_v46  ;;  %414 = vst [vmem:[%s3700_s23 + $0xb18] sm:$0xff] %v413_v47  ;;  %v417_v49 = vld [vmem:[%s3704_s29 + $0x3068] sm:$0xff]  ;;  %v419_v50 = vld [vmem:[%s3704_s29 + $0x3070] sm:$0xff] }
  0x50   : >> { %416 = vst [vmem:[%s3700_s23 + $0xc00] sm:$0xff] %v415_v48  ;;  %418 = vst [vmem:[%s3700_s23 + $0xc08] sm:$0xff] %v417_v49  ;;  %v421_v51 = vld [vmem:[%s3704_s29 + $0x3078] sm:$0xff]  ;;  %v423_v52 = vld [vmem:[%s3704_s29 + $0x3468] sm:$0xff] }
  0x51   : >> { %420 = vst [vmem:[%s3700_s23 + $0xc10] sm:$0xff] %v419_v50  ;;  %v425_v53 = vld [vmem:[%s3704_s29 + $0x3470] sm:$0xff]  ;;  %422 = vst [vmem:[%s3700_s23 + $0xc18] sm:$0xff] %v421_v51  ;;  %v427_v54 = vld [vmem:[%s3704_s29 + $0x3478] sm:$0xff]  ;;  %315 = sbr.rel (!%p312_p12) target bundleno = 55 (0x37), region = 170 }
  0x52   : >> { %424 = vst [vmem:[%s3700_s23 + $0xd00] sm:$0xff] %v423_v52  ;;  %426 = vst [vmem:[%s3700_s23 + $0xd08] sm:$0xff] %v425_v53  ;;  %v429_v55 = vld [vmem:[%s3704_s29 + $0x3480] sm:$0xff]  ;;  %v431_v56 = vld [vmem:[%s3704_s29 + $0x3870] sm:$0xff] }
  0x53   : >> { %428 = vst [vmem:[%s3700_s23 + $0xd10] sm:$0xff] %v427_v54  ;;  %430 = vst [vmem:[%s3700_s23 + $0xd18] sm:$0xff] %v429_v55  ;;  %v433_v57 = vld [vmem:[%s3704_s29 + $0x3878] sm:$0xff]  ;;  %v435_v58 = vld [vmem:[%s3704_s29 + $0x3880] sm:$0xff] }
  0x54   : >> { %432 = vst [vmem:[%s3700_s23 + $0xe00] sm:$0xff] %v431_v56  ;;  %v437_v59 = vld [vmem:[%s3704_s29 + $0x3888] sm:$0xff]  ;;  %434 = vst [vmem:[%s3700_s23 + $0xe08] sm:$0xff] %v433_v57  ;;  %v439_v60 = vld [vmem:[%s3704_s29 + $0x3c78] sm:$0xff] }
  0x55   : >> { %436 = vst [vmem:[%s3700_s23 + $0xe10] sm:$0xff] %v435_v58  ;;  %438 = vst [vmem:[%s3700_s23 + $0xe18] sm:$0xff] %v437_v59  ;;  %v441_v61 = vld [vmem:[%s3704_s29 + $0x3c80] sm:$0xff]  ;;  %v443_v62 = vld [vmem:[%s3704_s29 + $0x3c88] sm:$0xff] }
  0x56   : >> { %440 = vst [vmem:[%s3700_s23 + $0xf00] sm:$0xff] %v439_v60  ;;  %442 = vst [vmem:[%s3700_s23 + $0xf08] sm:$0xff] %v441_v61  ;;  %v445_v63 = vld [vmem:[%s3704_s29 + $0x3c90] sm:$0xff]  ;;  %s5180_s29 = smov %s3937_s12 }
  0x57   : >> { %444 = vst [vmem:[%s3700_s23 + $0xf10] sm:$0xff] %v443_v62  ;;  %446 = vst [vmem:[%s3700_s23 + $0xf18] sm:$0xff] %v445_v63  ;;  %s5179_s23 = smov %s3940_s13 }
  0x58 PF: > { %s4046_s14 = sand.u32 3, %s306_s21   ;;  %s2901_s15 = sshll.u32 %s3870_s22, 9 }
  0x59   : > { %s458_s17 = sshra.s32 %s2901_s15, 4  ;;  %p2878_p13 = scmp.le.s32.totalorder %s4046_s14, 0 }
  0x5a   : > { %s4050_s11 = scalar_lea.vmem %s3855_s16, %s458_s17   ;;  %s4053_s13 = scalar_lea.vmem %s3859_s19, %s458_s17 [#allocation2]  }
  0x5b   : > { %2807 = sbr.rel (%p2878_p13) target bundleno = 108 (0x6c), region = 175  ;;  %s5182_s23 = smov (!%p2878_p13), %s4053_s13 }
  0x5c   : > { %s5183_s29 = smov (!%p2878_p13), %s4050_s11  ;;  %s4062_s30 = smov (!%p2878_p13), 0  }
  0x5d   : > { %s4064_s9 = smov (!%p2878_p13), 0  }
  0x62 LB: >> { %v474_v0 = vld [vmem:[%s3720_s29] sm:$0xff]  ;;  %v476_v1 = vld [vmem:[%s3720_s29 + $0x408] sm:$0xff]  ;;  %v478_v2 = vld [vmem:[%s3720_s29 + $0x810] sm:$0xff]  ;;  %s506_s21 = sadd.s32 1, %s3724_s30  ;;  %s468_s9 = sadd.s32 1, %s3728_s9   ;;  %s3728_s9 = sphi %s4064_s9, %s468_s9   ;;  %s3724_s30 = sphi %s4062_s30, %s5184_s30   ;;  %s3720_s29 = sphi %s5183_s29, %s511_s29   ;;  %s3716_s23 = sphi %s5182_s23, %s512_s23  }
  0x63   : >> { %475 = vst [vmem:[%s3716_s23] sm:$0xff] %v474_v0  ;;  %477 = vst [vmem:[%s3716_s23 + $0x100] sm:$0xff] %v476_v1  ;;  %v480_v3 = vld [vmem:[%s3720_s29 + $0xc18] sm:$0xff]  ;;  %v482_v4 = vld [vmem:[%s3720_s29 + $0x1020] sm:$0xff]  ;;  %p507_p0 = scmp.ge.s32.totalorder %s506_s21, %s4046_s14  ;;  %p467_p1 = scmp.ge.s32.totalorder %s468_s9, %s4046_s14 }
  0x64   : >> { %479 = vst [vmem:[%s3716_s23 + $0x200] sm:$0xff] %v478_v2  ;;  %v484_v5 = vld [vmem:[%s3720_s29 + $0x1428] sm:$0xff]  ;;  %481 = vst [vmem:[%s3716_s23 + $0x300] sm:$0xff] %v480_v3  ;;  %v486_v6 = vld [vmem:[%s3720_s29 + $0x1830] sm:$0xff] }
  0x65   : >> { %483 = vst [vmem:[%s3716_s23 + $0x400] sm:$0xff] %v482_v4  ;;  %485 = vst [vmem:[%s3716_s23 + $0x500] sm:$0xff] %v484_v5  ;;  %v488_v7 = vld [vmem:[%s3720_s29 + $0x1c38] sm:$0xff]  ;;  %v490_v8 = vld [vmem:[%s3720_s29 + $0x2040] sm:$0xff]  ;;  %s5203_s21 = smov (%p507_p0, %s506_s21), 0  ;;  %470 = sbr.rel (!%p467_p1) target bundleno = 98 (0x62), region = 181 }
  0x66   : >> { %487 = vst [vmem:[%s3716_s23 + $0x600] sm:$0xff] %v486_v6  ;;  %489 = vst [vmem:[%s3716_s23 + $0x700] sm:$0xff] %v488_v7  ;;  %v492_v9 = vld [vmem:[%s3720_s29 + $0x2448] sm:$0xff]  ;;  %v494_v10 = vld [vmem:[%s3720_s29 + $0x2850] sm:$0xff]  ;;  %s2879_s22 = sshll.u32 %s5203_s21, 3  ;;  %s5184_s30 = smov %s5203_s21 }
  0x67   : >> { %491 = vst [vmem:[%s3716_s23 + $0x800] sm:$0xff] %v490_v8  ;;  %v496_v11 = vld [vmem:[%s3720_s29 + $0x2c58] sm:$0xff]  ;;  %493 = vst [vmem:[%s3716_s23 + $0x900] sm:$0xff] %v492_v9  ;;  %v498_v12 = vld [vmem:[%s3720_s29 + $0x3060] sm:$0xff] }
  0x68   : >> { %495 = vst [vmem:[%s3716_s23 + $0xa00] sm:$0xff] %v494_v10  ;;  %497 = vst [vmem:[%s3716_s23 + $0xb00] sm:$0xff] %v496_v11  ;;  %v500_v13 = vld [vmem:[%s3720_s29 + $0x3468] sm:$0xff]  ;;  %v502_v14 = vld [vmem:[%s3720_s29 + $0x3870] sm:$0xff] }
  0x69   : >> { %499 = vst [vmem:[%s3716_s23 + $0xc00] sm:$0xff] %v498_v12  ;;  %501 = vst [vmem:[%s3716_s23 + $0xd00] sm:$0xff] %v500_v13  ;;  %v504_v15 = vld [vmem:[%s3720_s29 + $0x3c78] sm:$0xff]  ;;  %s511_s29 = scalar_lea.vmem %s4050_s11, %s2879_s22  }
  0x6a   : >> { %503 = vst [vmem:[%s3716_s23 + $0xe00] sm:$0xff] %v502_v14  ;;  %505 = vst [vmem:[%s3716_s23 + $0xf00] sm:$0xff] %v504_v15  ;;  %s512_s23 = scalar_lea.vmem %s4053_s13, %s2879_s22 [#allocation2]  }
  0x6c PF: > { %515 = sbr.rel (%p302_p8) target bundleno = 193 (0xc1), region = 85  ;;  %s517_s10 = ssub.s32 (!%p302_p8), %s3857_s18, %s3863_s20 }
  0x6d   : > { %s521_s12 = sshrl.u32 (!%p302_p8), %s3857_s18, 3  ;;  %s4127_s15 = scalar_lea.vmem (!%p302_p8), %s3855_s16, %s517_s10 }
  0x6e   : > { %s4130_s17 = scalar_lea.vmem (!%p302_p8), %s3859_s19, %s517_s10 [#allocation2]  ;;  %s4134_s9 = sshrl.u32 (!%p302_p8), %s521_s12, 2 }
  0x6f   : > { %p2881_p2 = scmp.le.s32.totalorder (!%p302_p8), %s4134_s9, 0 }
  0x73   : > { %2821 = sbr.rel (%p2881_p2) target bundleno = 155 (0x9b), region = 186  ;;  %s5185_s14 = smov (!%p2881_p2), %s3859_s19 }
  0x74   : > { %s5186_s11 = smov (!%p2881_p2), %s3855_s16  ;;  %s4143_s13 = smov (!%p2881_p2), 0  }
  0x75   : > { %s4145_s23 = smov (!%p2881_p2), 0  }
  0x7a LB: >> { %v534_v16 = vld [vmem:[%s3736_s11] sm:$0xff]  ;;  %v536_v17 = vld [vmem:[%s3736_s11 + $0x8] sm:$0xff]  ;;  %v538_v18 = vld [vmem:[%s3736_s11 + $0x10] sm:$0xff]  ;;  %s662_s29 = sadd.s32 1, %s3740_s13  ;;  %s528_s23 = sadd.s32 1, %s3744_s23   ;;  %s3744_s23 = sphi %s4145_s23, %s528_s23   ;;  %s3740_s13 = sphi %s4143_s13, %s5189_s13   ;;  %s3736_s11 = sphi %s5186_s11, %s5188_s11   ;;  %s3732_s14 = sphi %s5185_s14, %s5187_s14  }
  0x7b   : >> { %535 = vst [vmem:[%s3732_s14] sm:$0xff] %v534_v16  ;;  %537 = vst [vmem:[%s3732_s14 + $0x8] sm:$0xff] %v536_v17  ;;  %v540_v19 = vld [vmem:[%s3736_s11 + $0x18] sm:$0xff]  ;;  %v542_v20 = vld [vmem:[%s3736_s11 + $0x408] sm:$0xff]  ;;  %p663_p3 = scmp.ge.s32.totalorder %s662_s29, %s4134_s9  ;;  %p527_p4 = scmp.ge.s32.totalorder %s528_s23, %s4134_s9 }
  0x7c   : >> { %539 = vst [vmem:[%s3732_s14 + $0x10] sm:$0xff] %v538_v18  ;;  %v544_v21 = vld [vmem:[%s3736_s11 + $0x410] sm:$0xff]  ;;  %541 = vst [vmem:[%s3732_s14 + $0x18] sm:$0xff] %v540_v19  ;;  %v546_v22 = vld [vmem:[%s3736_s11 + $0x418] sm:$0xff] }
  0x7d   : >> { %543 = vst [vmem:[%s3732_s14 + $0x100] sm:$0xff] %v542_v20  ;;  %545 = vst [vmem:[%s3732_s14 + $0x108] sm:$0xff] %v544_v21  ;;  %v548_v23 = vld [vmem:[%s3736_s11 + $0x420] sm:$0xff]  ;;  %v550_v24 = vld [vmem:[%s3736_s11 + $0x810] sm:$0xff]  ;;  %s5205_s29 = smov (%p663_p3, %s662_s29), 0 }
  0x7e   : >> { %547 = vst [vmem:[%s3732_s14 + $0x110] sm:$0xff] %v546_v22  ;;  %549 = vst [vmem:[%s3732_s14 + $0x118] sm:$0xff] %v548_v23  ;;  %v552_v25 = vld [vmem:[%s3736_s11 + $0x818] sm:$0xff]  ;;  %v554_v26 = vld [vmem:[%s3736_s11 + $0x820] sm:$0xff]  ;;  %s2882_s30 = sshll.u32 %s5205_s29, 5  ;;  %s5189_s13 = smov %s5205_s29 }
  0x7f   : >> { %551 = vst [vmem:[%s3732_s14 + $0x200] sm:$0xff] %v550_v24  ;;  %v556_v27 = vld [vmem:[%s3736_s11 + $0x828] sm:$0xff]  ;;  %553 = vst [vmem:[%s3732_s14 + $0x208] sm:$0xff] %v552_v25  ;;  %v558_v28 = vld [vmem:[%s3736_s11 + $0xc18] sm:$0xff]  ;;  %s4201_s21 = scalar_lea.vmem %s3855_s16, %s2882_s30   ;;  %s4204_s22 = scalar_lea.vmem %s3859_s19, %s2882_s30 [#allocation2]  }
  0x80   : >> { %555 = vst [vmem:[%s3732_s14 + $0x210] sm:$0xff] %v554_v26  ;;  %557 = vst [vmem:[%s3732_s14 + $0x218] sm:$0xff] %v556_v27  ;;  %v560_v29 = vld [vmem:[%s3736_s11 + $0xc20] sm:$0xff]  ;;  %v562_v30 = vld [vmem:[%s3736_s11 + $0xc28] sm:$0xff] }
  0x81   : >> { %559 = vst [vmem:[%s3732_s14 + $0x300] sm:$0xff] %v558_v28  ;;  %561 = vst [vmem:[%s3732_s14 + $0x308] sm:$0xff] %v560_v29  ;;  %v564_v31 = vld [vmem:[%s3736_s11 + $0xc30] sm:$0xff]  ;;  %v566_v32 = vld [vmem:[%s3736_s11 + $0x1020] sm:$0xff] }
  0x82   : >> { %563 = vst [vmem:[%s3732_s14 + $0x310] sm:$0xff] %v562_v30  ;;  %v568_v33 = vld [vmem:[%s3736_s11 + $0x1028] sm:$0xff]  ;;  %565 = vst [vmem:[%s3732_s14 + $0x318] sm:$0xff] %v564_v31  ;;  %v570_v34 = vld [vmem:[%s3736_s11 + $0x1030] sm:$0xff] }
  0x83   : >> { %567 = vst [vmem:[%s3732_s14 + $0x400] sm:$0xff] %v566_v32  ;;  %569 = vst [vmem:[%s3732_s14 + $0x408] sm:$0xff] %v568_v33  ;;  %v572_v35 = vld [vmem:[%s3736_s11 + $0x1038] sm:$0xff]  ;;  %v574_v36 = vld [vmem:[%s3736_s11 + $0x1428] sm:$0xff] }
  0x84   : >> { %571 = vst [vmem:[%s3732_s14 + $0x410] sm:$0xff] %v570_v34  ;;  %573 = vst [vmem:[%s3732_s14 + $0x418] sm:$0xff] %v572_v35  ;;  %v576_v37 = vld [vmem:[%s3736_s11 + $0x1430] sm:$0xff]  ;;  %v578_v38 = vld [vmem:[%s3736_s11 + $0x1438] sm:$0xff] }
  0x85   : >> { %575 = vst [vmem:[%s3732_s14 + $0x500] sm:$0xff] %v574_v36  ;;  %v580_v39 = vld [vmem:[%s3736_s11 + $0x1440] sm:$0xff]  ;;  %577 = vst [vmem:[%s3732_s14 + $0x508] sm:$0xff] %v576_v37  ;;  %v582_v40 = vld [vmem:[%s3736_s11 + $0x1830] sm:$0xff] }
  0x86   : >> { %579 = vst [vmem:[%s3732_s14 + $0x510] sm:$0xff] %v578_v38  ;;  %581 = vst [vmem:[%s3732_s14 + $0x518] sm:$0xff] %v580_v39  ;;  %v584_v41 = vld [vmem:[%s3736_s11 + $0x1838] sm:$0xff]  ;;  %v586_v42 = vld [vmem:[%s3736_s11 + $0x1840] sm:$0xff] }
  0x87   : >> { %583 = vst [vmem:[%s3732_s14 + $0x600] sm:$0xff] %v582_v40  ;;  %585 = vst [vmem:[%s3732_s14 + $0x608] sm:$0xff] %v584_v41  ;;  %v588_v43 = vld [vmem:[%s3736_s11 + $0x1848] sm:$0xff]  ;;  %v590_v44 = vld [vmem:[%s3736_s11 + $0x1c38] sm:$0xff] }
  0x88   : >> { %587 = vst [vmem:[%s3732_s14 + $0x610] sm:$0xff] %v586_v42  ;;  %v592_v45 = vld [vmem:[%s3736_s11 + $0x1c40] sm:$0xff]  ;;  %589 = vst [vmem:[%s3732_s14 + $0x618] sm:$0xff] %v588_v43  ;;  %v594_v46 = vld [vmem:[%s3736_s11 + $0x1c48] sm:$0xff] }
  0x89   : >> { %591 = vst [vmem:[%s3732_s14 + $0x700] sm:$0xff] %v590_v44  ;;  %593 = vst [vmem:[%s3732_s14 + $0x708] sm:$0xff] %v592_v45  ;;  %v596_v47 = vld [vmem:[%s3736_s11 + $0x1c50] sm:$0xff]  ;;  %v598_v48 = vld [vmem:[%s3736_s11 + $0x2040] sm:$0xff] }
  0x8a   : >> { %595 = vst [vmem:[%s3732_s14 + $0x710] sm:$0xff] %v594_v46  ;;  %597 = vst [vmem:[%s3732_s14 + $0x718] sm:$0xff] %v596_v47  ;;  %v600_v49 = vld [vmem:[%s3736_s11 + $0x2048] sm:$0xff]  ;;  %v602_v50 = vld [vmem:[%s3736_s11 + $0x2050] sm:$0xff] }
  0x8b   : >> { %599 = vst [vmem:[%s3732_s14 + $0x800] sm:$0xff] %v598_v48  ;;  %v604_v51 = vld [vmem:[%s3736_s11 + $0x2058] sm:$0xff]  ;;  %601 = vst [vmem:[%s3732_s14 + $0x808] sm:$0xff] %v600_v49  ;;  %v606_v52 = vld [vmem:[%s3736_s11 + $0x2448] sm:$0xff] }
  0x8c   : >> { %603 = vst [vmem:[%s3732_s14 + $0x810] sm:$0xff] %v602_v50  ;;  %605 = vst [vmem:[%s3732_s14 + $0x818] sm:$0xff] %v604_v51  ;;  %v608_v53 = vld [vmem:[%s3736_s11 + $0x2450] sm:$0xff]  ;;  %v610_v54 = vld [vmem:[%s3736_s11 + $0x2458] sm:$0xff] }
  0x8d   : >> { %607 = vst [vmem:[%s3732_s14 + $0x900] sm:$0xff] %v606_v52  ;;  %609 = vst [vmem:[%s3732_s14 + $0x908] sm:$0xff] %v608_v53  ;;  %v612_v55 = vld [vmem:[%s3736_s11 + $0x2460] sm:$0xff]  ;;  %v614_v56 = vld [vmem:[%s3736_s11 + $0x2850] sm:$0xff] }
  0x8e   : >> { %611 = vst [vmem:[%s3732_s14 + $0x910] sm:$0xff] %v610_v54  ;;  %v616_v57 = vld [vmem:[%s3736_s11 + $0x2858] sm:$0xff]  ;;  %613 = vst [vmem:[%s3732_s14 + $0x918] sm:$0xff] %v612_v55  ;;  %v618_v58 = vld [vmem:[%s3736_s11 + $0x2860] sm:$0xff] }
  0x8f   : >> { %615 = vst [vmem:[%s3732_s14 + $0xa00] sm:$0xff] %v614_v56  ;;  %617 = vst [vmem:[%s3732_s14 + $0xa08] sm:$0xff] %v616_v57  ;;  %v620_v59 = vld [vmem:[%s3736_s11 + $0x2868] sm:$0xff]  ;;  %v622_v60 = vld [vmem:[%s3736_s11 + $0x2c58] sm:$0xff] }
  0x90   : >> { %619 = vst [vmem:[%s3732_s14 + $0xa10] sm:$0xff] %v618_v58  ;;  %621 = vst [vmem:[%s3732_s14 + $0xa18] sm:$0xff] %v620_v59  ;;  %v624_v61 = vld [vmem:[%s3736_s11 + $0x2c60] sm:$0xff]  ;;  %v626_v62 = vld [vmem:[%s3736_s11 + $0x2c68] sm:$0xff] }
  0x91   : >> { %623 = vst [vmem:[%s3732_s14 + $0xb00] sm:$0xff] %v622_v60  ;;  %v628_v63 = vld [vmem:[%s3736_s11 + $0x2c70] sm:$0xff]  ;;  %625 = vst [vmem:[%s3732_s14 + $0xb08] sm:$0xff] %v624_v61  ;;  %v630_v0 = vld [vmem:[%s3736_s11 + $0x3060] sm:$0xff] }
  0x92   : >> { %627 = vst [vmem:[%s3732_s14 + $0xb10] sm:$0xff] %v626_v62  ;;  %629 = vst [vmem:[%s3732_s14 + $0xb18] sm:$0xff] %v628_v63  ;;  %v632_v1 = vld [vmem:[%s3736_s11 + $0x3068] sm:$0xff]  ;;  %v634_v2 = vld [vmem:[%s3736_s11 + $0x3070] sm:$0xff] }
  0x93   : >> { %631 = vst [vmem:[%s3732_s14 + $0xc00] sm:$0xff] %v630_v0  ;;  %633 = vst [vmem:[%s3732_s14 + $0xc08] sm:$0xff] %v632_v1  ;;  %v636_v3 = vld [vmem:[%s3736_s11 + $0x3078] sm:$0xff]  ;;  %v638_v4 = vld [vmem:[%s3736_s11 + $0x3468] sm:$0xff] }
  0x94   : >> { %635 = vst [vmem:[%s3732_s14 + $0xc10] sm:$0xff] %v634_v2  ;;  %v640_v5 = vld [vmem:[%s3736_s11 + $0x3470] sm:$0xff]  ;;  %637 = vst [vmem:[%s3732_s14 + $0xc18] sm:$0xff] %v636_v3  ;;  %v642_v6 = vld [vmem:[%s3736_s11 + $0x3478] sm:$0xff]  ;;  %530 = sbr.rel (!%p527_p4) target bundleno = 122 (0x7a), region = 192 }
  0x95   : >> { %639 = vst [vmem:[%s3732_s14 + $0xd00] sm:$0xff] %v638_v4  ;;  %641 = vst [vmem:[%s3732_s14 + $0xd08] sm:$0xff] %v640_v5  ;;  %v644_v7 = vld [vmem:[%s3736_s11 + $0x3480] sm:$0xff]  ;;  %v646_v8 = vld [vmem:[%s3736_s11 + $0x3870] sm:$0xff] }
  0x96   : >> { %643 = vst [vmem:[%s3732_s14 + $0xd10] sm:$0xff] %v642_v6  ;;  %645 = vst [vmem:[%s3732_s14 + $0xd18] sm:$0xff] %v644_v7  ;;  %v648_v9 = vld [vmem:[%s3736_s11 + $0x3878] sm:$0xff]  ;;  %v650_v10 = vld [vmem:[%s3736_s11 + $0x3880] sm:$0xff] }
  0x97   : >> { %647 = vst [vmem:[%s3732_s14 + $0xe00] sm:$0xff] %v646_v8  ;;  %v652_v11 = vld [vmem:[%s3736_s11 + $0x3888] sm:$0xff]  ;;  %649 = vst [vmem:[%s3732_s14 + $0xe08] sm:$0xff] %v648_v9  ;;  %v654_v12 = vld [vmem:[%s3736_s11 + $0x3c78] sm:$0xff] }
  0x98   : >> { %651 = vst [vmem:[%s3732_s14 + $0xe10] sm:$0xff] %v650_v10  ;;  %653 = vst [vmem:[%s3732_s14 + $0xe18] sm:$0xff] %v652_v11  ;;  %v656_v13 = vld [vmem:[%s3736_s11 + $0x3c80] sm:$0xff]  ;;  %v658_v14 = vld [vmem:[%s3736_s11 + $0x3c88] sm:$0xff] }
  0x99   : >> { %655 = vst [vmem:[%s3732_s14 + $0xf00] sm:$0xff] %v654_v12  ;;  %657 = vst [vmem:[%s3732_s14 + $0xf08] sm:$0xff] %v656_v13  ;;  %v660_v15 = vld [vmem:[%s3736_s11 + $0x3c90] sm:$0xff]  ;;  %s5188_s11 = smov %s4201_s21 }
  0x9a   : >> { %659 = vst [vmem:[%s3732_s14 + $0xf10] sm:$0xff] %v658_v14  ;;  %661 = vst [vmem:[%s3732_s14 + $0xf18] sm:$0xff] %v660_v15  ;;  %s5187_s14 = smov %s4204_s22 }
  0x9b PF: > { %s4310_s10 = sand.u32 3, %s521_s12   ;;  %s2903_s30 = sshll.u32 %s4134_s9, 9 }
  0x9c   : > { %s673_s27 = sshra.s32 %s2903_s30, 4  ;;  %p2887_p5 = scmp.le.s32.totalorder %s4310_s10, 0 }
  0x9d   : > { %s4314_s1 = scalar_lea.vmem %s3855_s16, %s673_s27   ;;  %s4317_s22 = scalar_lea.vmem %s3859_s19, %s673_s27 [#allocation2]  }
  0x9e   : > { %2835 = sbr.rel (%p2887_p5) target bundleno = 175 (0xaf), region = 197  ;;  %s5190_s14 = smov (!%p2887_p5), %s4317_s22 }
  0x9f   : > { %s5191_s11 = smov (!%p2887_p5), %s4314_s1  ;;  %s4326_s13 = smov (!%p2887_p5), 0  }
  0xa0   : > { %s4328_s23 = smov (!%p2887_p5), 0  }
  0xa5 LB: >> { %v689_v16 = vld [vmem:[%s3752_s11] sm:$0xff]  ;;  %v691_v17 = vld [vmem:[%s3752_s11 + $0x408] sm:$0xff]  ;;  %v693_v18 = vld [vmem:[%s3752_s11 + $0x810] sm:$0xff]  ;;  %s721_s27 = sadd.s32 1, %s3756_s13  ;;  %s683_s23 = sadd.s32 1, %s3760_s23   ;;  %s3760_s23 = sphi %s4328_s23, %s683_s23   ;;  %s3756_s13 = sphi %s4326_s13, %s5192_s13   ;;  %s3752_s11 = sphi %s5191_s11, %s726_s11   ;;  %s3748_s14 = sphi %s5190_s14, %s727_s14  }
  0xa6   : >> { %690 = vst [vmem:[%s3748_s14] sm:$0xff] %v689_v16  ;;  %692 = vst [vmem:[%s3748_s14 + $0x100] sm:$0xff] %v691_v17  ;;  %v695_v19 = vld [vmem:[%s3752_s11 + $0xc18] sm:$0xff]  ;;  %v697_v20 = vld [vmem:[%s3752_s11 + $0x1020] sm:$0xff]  ;;  %p722_p6 = scmp.ge.s32.totalorder %s721_s27, %s4310_s10  ;;  %p682_p7 = scmp.ge.s32.totalorder %s683_s23, %s4310_s10 }
  0xa7   : >> { %694 = vst [vmem:[%s3748_s14 + $0x200] sm:$0xff] %v693_v18  ;;  %v699_v21 = vld [vmem:[%s3752_s11 + $0x1428] sm:$0xff]  ;;  %696 = vst [vmem:[%s3748_s14 + $0x300] sm:$0xff] %v695_v19  ;;  %v701_v22 = vld [vmem:[%s3752_s11 + $0x1830] sm:$0xff] }
  0xa8   : >> { %698 = vst [vmem:[%s3748_s14 + $0x400] sm:$0xff] %v697_v20  ;;  %700 = vst [vmem:[%s3748_s14 + $0x500] sm:$0xff] %v699_v21  ;;  %v703_v23 = vld [vmem:[%s3752_s11 + $0x1c38] sm:$0xff]  ;;  %v705_v24 = vld [vmem:[%s3752_s11 + $0x2040] sm:$0xff]  ;;  %s5207_s27 = smov (%p722_p6, %s721_s27), 0  ;;  %685 = sbr.rel (!%p682_p7) target bundleno = 165 (0xa5), region = 203 }
  0xa9   : >> { %702 = vst [vmem:[%s3748_s14 + $0x600] sm:$0xff] %v701_v22  ;;  %704 = vst [vmem:[%s3748_s14 + $0x700] sm:$0xff] %v703_v23  ;;  %v707_v25 = vld [vmem:[%s3752_s11 + $0x2448] sm:$0xff]  ;;  %v709_v26 = vld [vmem:[%s3752_s11 + $0x2850] sm:$0xff]  ;;  %s2888_s12 = sshll.u32 %s5207_s27, 3  ;;  %s5192_s13 = smov %s5207_s27 }
  0xaa   : >> { %706 = vst [vmem:[%s3748_s14 + $0x800] sm:$0xff] %v705_v24  ;;  %v711_v27 = vld [vmem:[%s3752_s11 + $0x2c58] sm:$0xff]  ;;  %708 = vst [vmem:[%s3748_s14 + $0x900] sm:$0xff] %v707_v25  ;;  %v713_v28 = vld [vmem:[%s3752_s11 + $0x3060] sm:$0xff] }
  0xab   : >> { %710 = vst [vmem:[%s3748_s14 + $0xa00] sm:$0xff] %v709_v26  ;;  %712 = vst [vmem:[%s3748_s14 + $0xb00] sm:$0xff] %v711_v27  ;;  %v715_v29 = vld [vmem:[%s3752_s11 + $0x3468] sm:$0xff]  ;;  %v717_v30 = vld [vmem:[%s3752_s11 + $0x3870] sm:$0xff] }
  0xac   : >> { %714 = vst [vmem:[%s3748_s14 + $0xc00] sm:$0xff] %v713_v28  ;;  %716 = vst [vmem:[%s3748_s14 + $0xd00] sm:$0xff] %v715_v29  ;;  %v719_v31 = vld [vmem:[%s3752_s11 + $0x3c78] sm:$0xff]  ;;  %s726_s11 = scalar_lea.vmem %s4314_s1, %s2888_s12  }
  0xad   : >> { %718 = vst [vmem:[%s3748_s14 + $0xe00] sm:$0xff] %v717_v30  ;;  %720 = vst [vmem:[%s3748_s14 + $0xf00] sm:$0xff] %v719_v31  ;;  %s727_s14 = scalar_lea.vmem %s4317_s22, %s2888_s12 [#allocation2]  }
  0xaf PF: > { %s3762_s9 = smov 0  }
  0xb0   : > { %s4386_s29 = sshllo.u32 %s3762_s9, %s3863_s20 }
  0xb1   : > { %v737_v32 = vld [vmem:[%s4127_s15] sm:%s4386_s29]  ;;  %v739_v33 = vld [vmem:[%s4127_s15 + $0x408] sm:%s4386_s29] }
  0xb2   : > { %738 = vst [vmem:[%s4130_s17] sm:%s4386_s29] %v737_v32  ;;  %740 = vst [vmem:[%s4130_s17 + $0x100] sm:%s4386_s29] %v739_v33 }
  0xb3   : > { %v741_v34 = vld [vmem:[%s4127_s15 + $0x810] sm:%s4386_s29]  ;;  %v743_v35 = vld [vmem:[%s4127_s15 + $0xc18] sm:%s4386_s29] }
  0xb4   : > { %742 = vst [vmem:[%s4130_s17 + $0x200] sm:%s4386_s29] %v741_v34  ;;  %744 = vst [vmem:[%s4130_s17 + $0x300] sm:%s4386_s29] %v743_v35 }
  0xb5   : > { %v745_v36 = vld [vmem:[%s4127_s15 + $0x1020] sm:%s4386_s29]  ;;  %v747_v37 = vld [vmem:[%s4127_s15 + $0x1428] sm:%s4386_s29] }
  0xb6   : > { %746 = vst [vmem:[%s4130_s17 + $0x400] sm:%s4386_s29] %v745_v36  ;;  %748 = vst [vmem:[%s4130_s17 + $0x500] sm:%s4386_s29] %v747_v37 }
  0xb7   : > { %v749_v38 = vld [vmem:[%s4127_s15 + $0x1830] sm:%s4386_s29]  ;;  %v751_v39 = vld [vmem:[%s4127_s15 + $0x1c38] sm:%s4386_s29] }
  0xb8   : > { %750 = vst [vmem:[%s4130_s17 + $0x600] sm:%s4386_s29] %v749_v38  ;;  %752 = vst [vmem:[%s4130_s17 + $0x700] sm:%s4386_s29] %v751_v39 }
  0xb9   : > { %v753_v40 = vld [vmem:[%s4127_s15 + $0x2040] sm:%s4386_s29]  ;;  %v755_v41 = vld [vmem:[%s4127_s15 + $0x2448] sm:%s4386_s29] }
  0xba   : > { %754 = vst [vmem:[%s4130_s17 + $0x800] sm:%s4386_s29] %v753_v40  ;;  %756 = vst [vmem:[%s4130_s17 + $0x900] sm:%s4386_s29] %v755_v41 }
  0xbb   : > { %v757_v42 = vld [vmem:[%s4127_s15 + $0x2850] sm:%s4386_s29]  ;;  %v759_v43 = vld [vmem:[%s4127_s15 + $0x2c58] sm:%s4386_s29] }
  0xbc   : > { %758 = vst [vmem:[%s4130_s17 + $0xa00] sm:%s4386_s29] %v757_v42  ;;  %760 = vst [vmem:[%s4130_s17 + $0xb00] sm:%s4386_s29] %v759_v43 }
  0xbd   : > { %v761_v44 = vld [vmem:[%s4127_s15 + $0x3060] sm:%s4386_s29]  ;;  %v763_v45 = vld [vmem:[%s4127_s15 + $0x3468] sm:%s4386_s29] }
  0xbe   : > { %762 = vst [vmem:[%s4130_s17 + $0xc00] sm:%s4386_s29] %v761_v44  ;;  %764 = vst [vmem:[%s4130_s17 + $0xd00] sm:%s4386_s29] %v763_v45 }
  0xbf   : > { %v765_v46 = vld [vmem:[%s4127_s15 + $0x3870] sm:%s4386_s29]  ;;  %v767_v47 = vld [vmem:[%s4127_s15 + $0x3c78] sm:%s4386_s29] }
  0xc0   : > { %766 = vst [vmem:[%s4130_s17 + $0xe00] sm:%s4386_s29] %v765_v46  ;;  %768 = vst [vmem:[%s4130_s17 + $0xf00] sm:%s4386_s29] %v767_v47 }
  0xc1 PF: > { %p2890_p8 = scmp.ge.u32.totalorder %s3857_s18, 8 }
  0xc2   : > { %s3763_s1 = smov (!%p2890_p8), 0  }
  0xc3   : > { %259 = sbr.rel (%p2890_p8) target bundleno = 212 (0xd4), region = 56  ;;  %s4454_s20 = sshllo.u32 (!%p2890_p8), %s3763_s1, %s3857_s18 }
  0xc4   : > { %v269_v48 = vld [vmem:[%s3855_s16] sm:%s4454_s20] (!%p2890_p8)  ;;  %v271_v49 = vld [vmem:[%s3855_s16 + $0x408] sm:%s4454_s20] (!%p2890_p8) }
  0xc5   : > { %270 = vst [vmem:[%s3859_s19] sm:%s4454_s20] (!%p2890_p8), %v269_v48  ;;  %272 = vst [vmem:[%s3859_s19 + $0x100] sm:%s4454_s20] (!%p2890_p8), %v271_v49 }
  0xc6   : > { %v273_v50 = vld [vmem:[%s3855_s16 + $0x810] sm:%s4454_s20] (!%p2890_p8)  ;;  %v275_v51 = vld [vmem:[%s3855_s16 + $0xc18] sm:%s4454_s20] (!%p2890_p8) }
  0xc7   : > { %274 = vst [vmem:[%s3859_s19 + $0x200] sm:%s4454_s20] (!%p2890_p8), %v273_v50  ;;  %276 = vst [vmem:[%s3859_s19 + $0x300] sm:%s4454_s20] (!%p2890_p8), %v275_v51 }
  0xc8   : > { %v277_v52 = vld [vmem:[%s3855_s16 + $0x1020] sm:%s4454_s20] (!%p2890_p8)  ;;  %v279_v53 = vld [vmem:[%s3855_s16 + $0x1428] sm:%s4454_s20] (!%p2890_p8) }
  0xc9   : > { %278 = vst [vmem:[%s3859_s19 + $0x400] sm:%s4454_s20] (!%p2890_p8), %v277_v52  ;;  %280 = vst [vmem:[%s3859_s19 + $0x500] sm:%s4454_s20] (!%p2890_p8), %v279_v53 }
  0xca   : > { %v281_v54 = vld [vmem:[%s3855_s16 + $0x1830] sm:%s4454_s20]  ;;  %v283_v55 = vld [vmem:[%s3855_s16 + $0x1c38] sm:%s4454_s20] }
  0xcb   : > { %282 = vst [vmem:[%s3859_s19 + $0x600] sm:%s4454_s20] %v281_v54  ;;  %284 = vst [vmem:[%s3859_s19 + $0x700] sm:%s4454_s20] %v283_v55 }
  0xcc   : > { %v285_v56 = vld [vmem:[%s3855_s16 + $0x2040] sm:%s4454_s20]  ;;  %v287_v57 = vld [vmem:[%s3855_s16 + $0x2448] sm:%s4454_s20] }
  0xcd   : > { %286 = vst [vmem:[%s3859_s19 + $0x800] sm:%s4454_s20] %v285_v56  ;;  %288 = vst [vmem:[%s3859_s19 + $0x900] sm:%s4454_s20] %v287_v57 }
  0xce   : > { %v289_v58 = vld [vmem:[%s3855_s16 + $0x2850] sm:%s4454_s20]  ;;  %v291_v59 = vld [vmem:[%s3855_s16 + $0x2c58] sm:%s4454_s20] }
  0xcf   : > { %290 = vst [vmem:[%s3859_s19 + $0xa00] sm:%s4454_s20] %v289_v58  ;;  %292 = vst [vmem:[%s3859_s19 + $0xb00] sm:%s4454_s20] %v291_v59 }
  0xd0   : > { %v293_v60 = vld [vmem:[%s3855_s16 + $0x3060] sm:%s4454_s20]  ;;  %v295_v61 = vld [vmem:[%s3855_s16 + $0x3468] sm:%s4454_s20] }
  0xd1   : > { %294 = vst [vmem:[%s3859_s19 + $0xc00] sm:%s4454_s20] %v293_v60  ;;  %296 = vst [vmem:[%s3859_s19 + $0xd00] sm:%s4454_s20] %v295_v61 }
  0xd2   : > { %v297_v62 = vld [vmem:[%s3855_s16 + $0x3870] sm:%s4454_s20]  ;;  %v299_v63 = vld [vmem:[%s3855_s16 + $0x3c78] sm:%s4454_s20] }
  0xd3   : > { %298 = vst [vmem:[%s3859_s19 + $0xe00] sm:%s4454_s20] %v297_v62  ;;  %300 = vst [vmem:[%s3859_s19 + $0xf00] sm:%s4454_s20] %v299_v63 }
  0xd4 PF: > { %p2891_p9 = scmp.ge.s32.totalorder %s3696_s26, 1  ;;  %p771_p10 = scmp.lt.s32.totalorder %s3696_s26, 5 }
  0xd6   : > { %p772_p11 = pnand %p2891_p9, %p771_p10 }
  0xd7   : > { %s778_s18 = sand.u32 (!%p772_p11), 1, %s3688_s24   ;;  %s5193_s15 = sadd.s32 (!%p772_p11), 4294967295, %s3696_s26  }
  0xd8   : > { %775 = sbr.rel (%p772_p11) target bundleno = 1295 (0x50f), region = 110  ;;  %s2893_s17 = sshll.u32 (!%p772_p11), %s5193_s15, 5 }
  0xd9   : > { %s2892_s21 = sshll.u32 (!%p772_p11), %s778_s18, 12  ;;  %p810_p12 = scmp.lt.s32.totalorder (!%p772_p11), %s2893_s17, 127 }
  0xda   : > { %s4530_s22 = scalar_lea.vmem (!%p772_p11), [#allocation2], %s2892_s21  ;;  %s5194_s14 = smov (!%p772_p11), %s5193_s15 }
  0xdb   : > { %p2895_p13 = scmp.ne.s32.totalorder (!%p772_p11), %s5194_s14, 0 }
  0xdf   : > { %s5209_s17 = smov (!%p810_p12, %s2893_s17), 127  ;;  %823 = sbr.rel (%p2895_p13) target bundleno = 560 (0x230), region = 118 }
  0xe0   : > { %s2894_s16 = sshll.u32 %s5209_s17, 3  ;;  %v824_v0 = vld [vmem:[%s5169_s2] sm:$0xff] (!%p2895_p13)  ;;  %v3764_v1 = vmov (!%p2895_p13), 0   ;;  %v3765_v2 = vmov (!%p2895_p13), 2   ;;  %v3766_v3 = vmov (!%p2895_p13), 1   ;;  %v3767_v4 = vmov (!%p2895_p13), 3  }
  0xe1   : > { %s4528_s30 = scalar_lea.vmem %s5167_s0, %s2894_s16  ;;  %3587 = vset.pattern.permute.xlu0 (!%p2895_p13), %v3764_v1  ;;  %3589 = vset.pattern.permute.xlu1 (!%p2895_p13), %v3765_v2  ;;  %v3768_v5 = vmov (!%p2895_p13), 4   ;;  %v3769_v6 = vmov (!%p2895_p13), 5   ;;  %v831_v7 = vlaneseq (!%p2895_p13)  ;;  %v825_v11 = vld [vmem:[%s5170_s3] sm:$0x3f] (!%p2895_p13)  ;;  %v3770_v42 = vmov (!%p2895_p13), 8  }
  0xe2   : > { %828 = vperm.xlu0 (!%p2895_p13), %3587, %v824_v0   ;;  %847 = vperm.xlu1 (!%p2895_p13), %3589, %v824_v0   ;;  %v2896_v38 = vld [vmem:[%s5171_s4] ss:$0 sm:$0xff] (!%p2895_p13)  ;;  %v3771_v43 = vmov (!%p2895_p13), 11   ;;  %v3772_v44 = vmov (!%p2895_p13), 14   ;;  %v3773_v45 = vmov (!%p2895_p13), 6   ;;  %v3774_v46 = vmov (!%p2895_p13), 7  }
  0xe3   : > { %v4537_v8 = vshrl.u32 (!%p2895_p13), %v831_v7, 7  ;;  %v3775_v47 = vmov (!%p2895_p13), 15   ;;  %v3776_v48 = vmov (!%p2895_p13), 9   ;;  %v3777_v49 = vmov (!%p2895_p13), 10   ;;  %v895_v52 = vld [vmem:[%s5172_s5] sm:$0xff] (!%p2895_p13) }
  0xe4   : > { %v3778_v50 = vmov (!%p2895_p13), 12   ;;  %v3779_v51 = vmov (!%p2895_p13), 13  }
  0xe5   : > { %v4540_v9 = vsub.s32 (!%p2895_p13), 0, %v4537_v8  ;;  %v4543_v10 = vsub.s32 (!%p2895_p13), 1, %v4537_v8  ;;  %v4549_v13 = vsub.s32 (!%p2895_p13), 2, %v4537_v8  ;;  %v4554_v17 = vsub.s32 (!%p2895_p13), 3, %v4537_v8 }
  0xe6   : > { %3588 = vset.pattern.permute.xlu0 %v3766_v3  ;;  %3590 = vset.pattern.permute.xlu1 %v3767_v4  ;;  %v4557_v18 = vsub.s32 4, %v4537_v8  ;;  %v4561_v20 = vsub.s32 5, %v4537_v8 }
  0xe7   : > { %837 = vperm.xlu0 %3588, %v824_v0   ;;  %857 = vperm.xlu1 %3590, %v824_v0   ;;  %v834_v15 = vrot.slane %v825_v11, %v4540_v9  ;;  %v843_v16 = vrot.slane %v825_v11, %v4543_v10  ;;  %v853_v19 = vrot.slane %v825_v11, %v4549_v13 }
  0xe8   : > { %v863_v25 = vrot.slane %v825_v11, %v4554_v17  ;;  %v873_v26 = vrot.slane %v825_v11, %v4557_v18  ;;  %v883_v29 = vrot.slane %v825_v11, %v4561_v20  ;;  %v905_v54 = vrot.slane %v895_v52, %v4540_v9 }
  0xe9   : > { %v914_v55 = vrot.slane %v895_v52, %v4543_v10  ;;  %v924_v57 = vrot.slane %v895_v52, %v4549_v13  ;;  %v934_v62 = vrot.slane %v895_v52, %v4554_v17 }
  0xeb   : > { %3591 = vset.pattern.permute.xlu1 %v3768_v5  ;;  %3592 = vset.pattern.permute.xlu0 %v3769_v6 }
  0xec   : > { %867 = vperm.xlu1 %3591, %v824_v0   ;;  %877 = vperm.xlu0 %3592, %v824_v0  }
  0xf0   : > { %3593 = vset.pattern.permute.xlu1 %v3764_v1  ;;  %3595 = vset.pattern.permute.xlu0 %v3765_v2 }
 0x161   : > { %v829_v12 = vpop.permute.xlu0 %828  ;;  %v848_v14 = vpop.permute.xlu1 %847 }
 0x162   : > { %v835_v23 = vmul.f32 %v834_v15, %v829_v12  ;;  %v854_v27 = vmul.f32 %v853_v19, %v848_v14 }
 0x166   : > { %v838_v21 = vpop.permute.xlu0 %837  ;;  %v858_v22 = vpop.permute.xlu1 %857 }
 0x167   : > { %v844_v24 = vmul.f32 %v843_v16, %v838_v21  ;;  %v864_v31 = vmul.f32 %v863_v25, %v858_v22  ;;  %v973_v16 = vsub.s32 7, %v4537_v8  ;;  %v896_v25 = vld [vmem:[%s5172_s5 + $0x8] sm:$0xff] }
 0x169   : > { %v845_v28 = vadd.f32 %v844_v24, %v835_v23  ;;  %v974_v24 = vrot.slane %v895_v52, %v973_v16 }
 0x16b   : > { %v855_v30 = vadd.f32 %v854_v27, %v845_v28  ;;  %v868_v32 = vpop.permute.xlu1 %867  ;;  %v878_v33 = vpop.permute.xlu0 %877  ;;  %v984_v27 = vrot.slane %v896_v25, %v4540_v9  ;;  %v1024_v9 = vrot.slane %v896_v25, %v4557_v18 }
 0x16c   : > { %v874_v34 = vmul.f32 %v873_v26, %v868_v32  ;;  %v884_v36 = vmul.f32 %v883_v29, %v878_v33  ;;  %v994_v32 = vrot.slane %v896_v25, %v4543_v10  ;;  %v1034_v10 = vrot.slane %v896_v25, %v4561_v20 }
 0x16d   : > { %v865_v35 = vadd.f32 %v864_v31, %v855_v30 }
 0x16f   : > { %v875_v37 = vadd.f32 %v874_v34, %v865_v35 }
 0x171   : > { %v885_v39 = vadd.f32 %v884_v36, %v875_v37  ;;  %v1004_v36 = vrot.slane %v896_v25, %v4549_v13 }
 0x173   : > { %v893_v40 = vadd.f32 %v2896_v38, %v885_v39  ;;  %v1014_v38 = vrot.slane %v896_v25, %v4554_v17 }
 0x175   : > { %v894_v41 = vmax.f32 %v893_v40, 0.0 }
 0x177   : > { %918 = vperm.xlu0 %3595, %v894_v41   ;;  %899 = vperm.xlu1 %3593, %v894_v41  }
 0x17b   : > { %3598 = vset.pattern.permute.xlu0 %v3769_v6  ;;  %3594 = vset.pattern.permute.xlu1 %v3766_v3  ;;  %v944_v3 = vrot.slane %v895_v52, %v4557_v18  ;;  %v954_v6 = vrot.slane %v895_v52, %v4561_v20  ;;  %v2897_v18 = vld [vmem:[%s5173_s6] ss:$0 sm:$0xff] }
 0x17c   : > { %948 = vperm.xlu0 %3598, %v894_v41   ;;  %908 = vperm.xlu1 %3594, %v894_v41  }
 0x180   : > { %3601 = vset.pattern.permute.xlu0 %v3770_v42  ;;  %3596 = vset.pattern.permute.xlu1 %v3767_v4  ;;  %v963_v4 = vsub.s32 6, %v4537_v8 }
 0x181   : > { %978 = vperm.xlu0 %3601, %v894_v41   ;;  %928 = vperm.xlu1 %3596, %v894_v41  }
 0x182   : > { %v964_v15 = vrot.slane %v895_v52, %v963_v4 }
 0x185   : > { %3604 = vset.pattern.permute.xlu0 %v3771_v43  ;;  %3597 = vset.pattern.permute.xlu1 %v3768_v5 }
 0x186   : > { %1008 = vperm.xlu0 %3604, %v894_v41   ;;  %938 = vperm.xlu1 %3597, %v894_v41  }
 0x18a   : > { %3607 = vset.pattern.permute.xlu0 %v3772_v44  ;;  %3599 = vset.pattern.permute.xlu1 %v3773_v45 }
 0x18b   : > { %1038 = vperm.xlu0 %3607, %v894_v41   ;;  %958 = vperm.xlu1 %3599, %v894_v41  }
 0x18f   : > { %3600 = vset.pattern.permute.xlu1 %v3774_v46  ;;  %3609 = vset.pattern.permute.xlu0 %v3775_v47 }
 0x190   : > { %968 = vperm.xlu1 %3600, %v894_v41  }
 0x194   : > { %3602 = vset.pattern.permute.xlu1 %v3776_v48 }
 0x195   : > { %988 = vperm.xlu1 %3602, %v894_v41  }
 0x199   : > { %3603 = vset.pattern.permute.xlu1 %v3777_v49 }
 0x19a   : > { %998 = vperm.xlu1 %3603, %v894_v41  }
 0x19e   : > { %3605 = vset.pattern.permute.xlu1 %v3778_v50 }
 0x19f   : > { %1018 = vperm.xlu1 %3605, %v894_v41  }
 0x1a3   : > { %3606 = vset.pattern.permute.xlu1 %v3779_v51  ;;  %v1054_v51 = vrot.slane %v896_v25, %v973_v16 }
 0x1a4   : > { %1028 = vperm.xlu1 %3606, %v894_v41  }
 0x1a8   : > { %3608 = vset.pattern.permute.xlu1 %v3775_v47  ;;  %v1044_v47 = vrot.slane %v896_v25, %v963_v4 }
 0x1a9   : > { %1048 = vperm.xlu1 %3608, %v894_v41  }
 0x1f6   : > { %v900_v53 = vpop.permute.xlu1 %899  ;;  %v919_v60 = vpop.permute.xlu0 %918 }
 0x1f7   : > { %v906_v58 = vmul.f32 %v905_v54, %v900_v53  ;;  %v925_v63 = vmul.f32 %v924_v57, %v919_v60 }
 0x1fb   : > { %v909_v56 = vpop.permute.xlu1 %908  ;;  %v949_v12 = vpop.permute.xlu0 %948 }
 0x1fc   : > { %v915_v59 = vmul.f32 %v914_v55, %v909_v56  ;;  %v955_v19 = vmul.f32 %v954_v6, %v949_v12 }
 0x1fe   : > { %v916_v61 = vadd.f32 %v915_v59, %v906_v58 }
 0x200   : > { %v929_v0 = vpop.permute.xlu1 %928  ;;  %v926_v1 = vadd.f32 %v925_v63, %v916_v61  ;;  %v979_v30 = vpop.permute.xlu0 %978 }
 0x201   : > { %v935_v2 = vmul.f32 %v934_v62, %v929_v0  ;;  %v985_v33 = vmul.f32 %v984_v27, %v979_v30 }
 0x203   : > { %v936_v7 = vadd.f32 %v935_v2, %v926_v1 }
 0x205   : > { %v939_v5 = vpop.permute.xlu1 %938  ;;  %v1009_v41 = vpop.permute.xlu0 %1008 }
 0x206   : > { %v945_v11 = vmul.f32 %v944_v3, %v939_v5  ;;  %v1015_v43 = vmul.f32 %v1014_v38, %v1009_v41 }
 0x208   : > { %v946_v14 = vadd.f32 %v945_v11, %v936_v7 }
 0x20a   : > { %v959_v21 = vpop.permute.xlu1 %958  ;;  %v956_v22 = vadd.f32 %v955_v19, %v946_v14  ;;  %v1039_v48 = vpop.permute.xlu0 %1038 }
 0x20b   : > { %v965_v23 = vmul.f32 %v964_v15, %v959_v21  ;;  %v1045_v52 = vmul.f32 %v1044_v47, %v1039_v48 }
 0x20d   : > { %v966_v28 = vadd.f32 %v965_v23, %v956_v22 }
 0x20f   : > { %v969_v26 = vpop.permute.xlu1 %968 }
 0x210   : > { %v975_v29 = vmul.f32 %v974_v24, %v969_v26 }
 0x212   : > { %v976_v31 = vadd.f32 %v975_v29, %v966_v28 }
 0x214   : > { %v989_v8 = vpop.permute.xlu1 %988  ;;  %v986_v34 = vadd.f32 %v985_v33, %v976_v31 }
 0x215   : > { %v995_v35 = vmul.f32 %v994_v32, %v989_v8 }
 0x217   : > { %v996_v39 = vadd.f32 %v995_v35, %v986_v34 }
 0x219   : > { %v999_v37 = vpop.permute.xlu1 %998 }
 0x21a   : > { %v1005_v40 = vmul.f32 %v1004_v36, %v999_v37 }
 0x21c   : > { %v1006_v42 = vadd.f32 %v1005_v40, %v996_v39 }
 0x21e   : > { %v1019_v44 = vpop.permute.xlu1 %1018  ;;  %v1016_v45 = vadd.f32 %v1015_v43, %v1006_v42 }
 0x21f   : > { %v1025_v46 = vmul.f32 %v1024_v9, %v1019_v44 }
 0x221   : > { %v1026_v50 = vadd.f32 %v1025_v46, %v1016_v45 }
 0x223   : > { %v1029_v49 = vpop.permute.xlu1 %1028 }
 0x224   : > { %v1035_v13 = vmul.f32 %v1034_v10, %v1029_v49 }
 0x226   : > { %v1036_v17 = vadd.f32 %v1035_v13, %v1026_v50 }
 0x228   : > { %v1046_v53 = vadd.f32 %v1045_v52, %v1036_v17  ;;  %v1049_v54 = vpop.permute.xlu1 %1048 }
 0x229   : > { %v1055_v55 = vmul.f32 %v1054_v51, %v1049_v54 }
 0x22b   : > { %v1056_v56 = vadd.f32 %v1055_v55, %v1046_v53 }
 0x22d   : > { %v1064_v57 = vadd.f32 %v2897_v18, %v1056_v56 }
 0x22f   : > { %1065 = vst [vmem:[%s5174_s7] sm:$0xff] %v1064_v57 }
 0x230 PF: > { %v1100_v20 = vld [vmem:[%s4530_s22 + $0x8] sm:$0xff]  ;;  %v1099_v59 = vld [vmem:[%s4530_s22] sm:$0xff]  ;;  %v1102_v62 = vld [vmem:[%s4530_s22 + $0x18] sm:$0xff] }
 0x231   : > { %v1132_v58 = vld [vmem:[%s4530_s22 + $0x108] sm:$0xff]  ;;  %v1131_v61 = vld [vmem:[%s4530_s22 + $0x100] sm:$0xff]  ;;  %v1134_v63 = vld [vmem:[%s4530_s22 + $0x118] sm:$0xff] }
 0x232   : > { %v2905_v60 = vpack.c.bf16 %v1132_v58, %v1100_v20  ;;  %v2907_v0 = vpack.c.bf16 %v1131_v61, %v1099_v59  ;;  %v2937_v1 = vpack.c.bf16 %v1134_v63, %v1102_v62  ;;  %v1101_v2 = vld [vmem:[%s4530_s22 + $0x10] sm:$0xff]  ;;  %v1164_v4 = vld [vmem:[%s4530_s22 + $0x208] sm:$0xff]  ;;  %v1166_v11 = vld [vmem:[%s4530_s22 + $0x218] sm:$0xff] }
 0x233   : > { %v1133_v3 = vld [vmem:[%s4530_s22 + $0x110] sm:$0xff]  ;;  %v1196_v6 = vld [vmem:[%s4530_s22 + $0x308] sm:$0xff]  ;;  %v1198_v12 = vld [vmem:[%s4530_s22 + $0x318] sm:$0xff] }
 0x234   : > { %2906 = vmatprep.subr.bf16.mxu0 %v2905_v60  ;;  %v2939_v5 = vpack.c.bf16 %v1133_v3, %v1101_v2  ;;  %2938 = vmatprep.subr.bf16.mxu1 %v2937_v1  ;;  %v2909_v7 = vpack.c.bf16 %v1196_v6, %v1164_v4  ;;  %v1163_v14 = vld [vmem:[%s4530_s22 + $0x200] sm:$0xff]  ;;  %v2941_v16 = vpack.c.bf16 %v1198_v12, %v1166_v11  ;;  %v1165_v19 = vld [vmem:[%s4530_s22 + $0x210] sm:$0xff]  ;;  %v1228_v22 = vld [vmem:[%s4530_s22 + $0x408] sm:$0xff] }
 0x235   : > { %2908 = vmatpush1.bf16.xpose.msra.mxu0 %v2907_v0  ;;  %v1195_v15 = vld [vmem:[%s4530_s22 + $0x300] sm:$0xff]  ;;  %v1197_v21 = vld [vmem:[%s4530_s22 + $0x310] sm:$0xff]  ;;  %v1260_v23 = vld [vmem:[%s4530_s22 + $0x508] sm:$0xff] }
 0x236   : > { %2940 = vmatpush1.bf16.xpose.msra.mxu1 %v2939_v5  ;;  %2910 = vmatprep.subr.bf16.mxu0 %v2909_v7  ;;  %v1230_v24 = vld [vmem:[%s4530_s22 + $0x418] sm:$0xff]  ;;  %v2911_v26 = vpack.c.bf16 %v1195_v15, %v1163_v14  ;;  %v2943_v27 = vpack.c.bf16 %v1197_v21, %v1165_v19  ;;  %v2913_v28 = vpack.c.bf16 %v1260_v23, %v1228_v22  ;;  %v1227_v30 = vld [vmem:[%s4530_s22 + $0x400] sm:$0xff]  ;;  %v1229_v32 = vld [vmem:[%s4530_s22 + $0x410] sm:$0xff] }
 0x237   : > { %2942 = vmatprep.subr.bf16.mxu1 %v2941_v16  ;;  %v1262_v25 = vld [vmem:[%s4530_s22 + $0x518] sm:$0xff]  ;;  %v1259_v31 = vld [vmem:[%s4530_s22 + $0x500] sm:$0xff]  ;;  %v1261_v33 = vld [vmem:[%s4530_s22 + $0x510] sm:$0xff] }
 0x238   : > { %v2945_v29 = vpack.c.bf16 %v1262_v25, %v1230_v24  ;;  %v1292_v8 = vld [vmem:[%s4530_s22 + $0x608] sm:$0xff]  ;;  %v1294_v35 = vld [vmem:[%s4530_s22 + $0x618] sm:$0xff]  ;;  %v2915_v37 = vpack.c.bf16 %v1259_v31, %v1227_v30  ;;  %v2947_v38 = vpack.c.bf16 %v1261_v33, %v1229_v32  ;;  %v1291_v41 = vld [vmem:[%s4530_s22 + $0x600] sm:$0xff] }
 0x239   : > { %v1324_v34 = vld [vmem:[%s4530_s22 + $0x708] sm:$0xff]  ;;  %v1326_v36 = vld [vmem:[%s4530_s22 + $0x718] sm:$0xff]  ;;  %v1323_v42 = vld [vmem:[%s4530_s22 + $0x700] sm:$0xff] }
 0x23a   : > { %v2917_v39 = vpack.c.bf16 %v1324_v34, %v1292_v8  ;;  %v2949_v40 = vpack.c.bf16 %v1326_v36, %v1294_v35  ;;  %v1293_v9 = vld [vmem:[%s4530_s22 + $0x610] sm:$0xff]  ;;  %v1068_v44 = vld [vmem:[%s4528_s30 + $0x8] sm:$0xff]  ;;  %v1070_v10 = vld [vmem:[%s4528_s30 + $0x18] sm:$0xff]  ;;  %v2919_v49 = vpack.c.bf16 %v1323_v42, %v1291_v41 }
 0x23b   : > { %v1325_v43 = vld [vmem:[%s4530_s22 + $0x710] sm:$0xff]  ;;  %v1356_v45 = vld [vmem:[%s4530_s22 + $0x808] sm:$0xff]  ;;  %1675 = vmatprep.mubr.f32.mxu0 %v1068_v44  ;;  %v1358_v47 = vld [vmem:[%s4530_s22 + $0x818] sm:$0xff]  ;;  %1745 = vmatprep.mubr.f32.mxu1 %v1070_v10 }
 0x23c   : > { %v1388_v46 = vld [vmem:[%s4530_s22 + $0x908] sm:$0xff]  ;;  %v1390_v48 = vld [vmem:[%s4530_s22 + $0x918] sm:$0xff]  ;;  %v2951_v50 = vpack.c.bf16 %v1325_v43, %v1293_v9  ;;  %v1355_v52 = vld [vmem:[%s4530_s22 + $0x800] sm:$0xff] }
 0x23d   : > { %2912 = vmatpush1.bf16.xpose.msra.mxu0 %v2911_v26  ;;  %v2921_v13 = vpack.c.bf16 %v1388_v46, %v1356_v45  ;;  %v2953_v51 = vpack.c.bf16 %v1390_v48, %v1358_v47  ;;  %v1387_v17 = vld [vmem:[%s4530_s22 + $0x900] sm:$0xff]  ;;  %v1357_v53 = vld [vmem:[%s4530_s22 + $0x810] sm:$0xff]  ;;  %v1420_v55 = vld [vmem:[%s4530_s22 + $0xa08] sm:$0xff] }
 0x23e   : > { %2944 = vmatpush1.bf16.xpose.msra.mxu1 %v2943_v27  ;;  %2914 = vmatprep.subr.bf16.mxu0 %v2913_v28  ;;  %v1389_v54 = vld [vmem:[%s4530_s22 + $0x910] sm:$0xff]  ;;  %v1452_v18 = vld [vmem:[%s4530_s22 + $0xb08] sm:$0xff]  ;;  %v1422_v56 = vld [vmem:[%s4530_s22 + $0xa18] sm:$0xff]  ;;  %v2923_v20 = vpack.c.bf16 %v1387_v17, %v1355_v52 }
 0x23f   : > { %2946 = vmatprep.subr.bf16.mxu1 %v2945_v29  ;;  %v1454_v57 = vld [vmem:[%s4530_s22 + $0xb18] sm:$0xff]  ;;  %v2955_v58 = vpack.c.bf16 %v1389_v54, %v1357_v53  ;;  %v2925_v59 = vpack.c.bf16 %v1452_v18, %v1420_v55  ;;  %v1419_v61 = vld [vmem:[%s4530_s22 + $0xa00] sm:$0xff]  ;;  %v1421_v63 = vld [vmem:[%s4530_s22 + $0xa10] sm:$0xff] }
 0x240   : > { %v2957_v60 = vpack.c.bf16 %v1454_v57, %v1422_v56  ;;  %v1451_v62 = vld [vmem:[%s4530_s22 + $0xb00] sm:$0xff]  ;;  %v1453_v0 = vld [vmem:[%s4530_s22 + $0xb10] sm:$0xff]  ;;  %v1484_v1 = vld [vmem:[%s4530_s22 + $0xc08] sm:$0xff] }
 0x241   : > { %v1516_v2 = vld [vmem:[%s4530_s22 + $0xd08] sm:$0xff]  ;;  %v1486_v3 = vld [vmem:[%s4530_s22 + $0xc18] sm:$0xff]  ;;  %v2927_v5 = vpack.c.bf16 %v1451_v62, %v1419_v61  ;;  %v2959_v6 = vpack.c.bf16 %v1453_v0, %v1421_v63  ;;  %v1483_v12 = vld [vmem:[%s4530_s22 + $0xc00] sm:$0xff] }
 0x242   : > { %v1518_v4 = vld [vmem:[%s4530_s22 + $0xd18] sm:$0xff]  ;;  %v2929_v7 = vpack.c.bf16 %v1516_v2, %v1484_v1  ;;  %v1515_v14 = vld [vmem:[%s4530_s22 + $0xd00] sm:$0xff]  ;;  %v1485_v15 = vld [vmem:[%s4530_s22 + $0xc10] sm:$0xff] }
 0x243   : > { %v2961_v11 = vpack.c.bf16 %v1518_v4, %v1486_v3  ;;  %v1517_v16 = vld [vmem:[%s4530_s22 + $0xd10] sm:$0xff]  ;;  %v1548_v19 = vld [vmem:[%s4530_s22 + $0xe08] sm:$0xff]  ;;  %v1550_v22 = vld [vmem:[%s4530_s22 + $0xe18] sm:$0xff]  ;;  %v2931_v24 = vpack.c.bf16 %v1515_v14, %v1483_v12 }
 0x244   : > { %v1580_v21 = vld [vmem:[%s4530_s22 + $0xf08] sm:$0xff]  ;;  %v1582_v23 = vld [vmem:[%s4530_s22 + $0xf18] sm:$0xff]  ;;  %v2963_v25 = vpack.c.bf16 %v1517_v16, %v1485_v15  ;;  %v1547_v28 = vld [vmem:[%s4530_s22 + $0xe00] sm:$0xff] }
 0x245   : > { %2916 = vmatpush1.bf16.xpose.msra.mxu0 %v2915_v37  ;;  %v2933_v26 = vpack.c.bf16 %v1580_v21, %v1548_v19  ;;  %v2965_v27 = vpack.c.bf16 %v1582_v23, %v1550_v22  ;;  %v1579_v29 = vld [vmem:[%s4530_s22 + $0xf00] sm:$0xff]  ;;  %v1549_v30 = vld [vmem:[%s4530_s22 + $0xe10] sm:$0xff]  ;;  %v1104_v32 = vld [vmem:[%s4530_s22 + $0x28] sm:$0xff] }
 0x246   : > { %2948 = vmatpush1.bf16.xpose.msra.mxu1 %v2947_v38  ;;  %2918 = vmatprep.subr.bf16.mxu0 %v2917_v39  ;;  %v1581_v31 = vld [vmem:[%s4530_s22 + $0xf10] sm:$0xff]  ;;  %v1136_v33 = vld [vmem:[%s4530_s22 + $0x128] sm:$0xff]  ;;  %v1106_v8 = vld [vmem:[%s4530_s22 + $0x38] sm:$0xff]  ;;  %v2935_v35 = vpack.c.bf16 %v1579_v29, %v1547_v28 }
 0x247   : > { %2950 = vmatprep.subr.bf16.mxu1 %v2949_v40  ;;  %v1138_v34 = vld [vmem:[%s4530_s22 + $0x138] sm:$0xff]  ;;  %v2967_v36 = vpack.c.bf16 %v1581_v31, %v1549_v30  ;;  %v2969_v37 = vpack.c.bf16 %v1136_v33, %v1104_v32  ;;  %v1103_v39 = vld [vmem:[%s4530_s22 + $0x20] sm:$0xff]  ;;  %v1105_v41 = vld [vmem:[%s4530_s22 + $0x30] sm:$0xff] }
 0x248   : > { %v3001_v38 = vpack.c.bf16 %v1138_v34, %v1106_v8  ;;  %v1135_v40 = vld [vmem:[%s4530_s22 + $0x120] sm:$0xff]  ;;  %v1137_v42 = vld [vmem:[%s4530_s22 + $0x130] sm:$0xff]  ;;  %v1168_v9 = vld [vmem:[%s4530_s22 + $0x228] sm:$0xff] }
 0x249   : > { %v1200_v43 = vld [vmem:[%s4530_s22 + $0x328] sm:$0xff]  ;;  %v1170_v44 = vld [vmem:[%s4530_s22 + $0x238] sm:$0xff]  ;;  %v1067_v46 = vld [vmem:[%s4528_s30] sm:$0xff]  ;;  %v2971_v10 = vpack.c.bf16 %v1135_v40, %v1103_v39  ;;  %v3003_v48 = vpack.c.bf16 %v1137_v42, %v1105_v41 }
 0x24a   : > { %v1202_v45 = vld [vmem:[%s4530_s22 + $0x338] sm:$0xff]  ;;  %v1069_v47 = vld [vmem:[%s4528_s30 + $0x10] sm:$0xff]  ;;  %v1167_v52 = vld [vmem:[%s4530_s22 + $0x220] sm:$0xff] }
 0x24b   : > { %v1199_v17 = vld [vmem:[%s4530_s22 + $0x320] sm:$0xff]  ;;  %v1169_v53 = vld [vmem:[%s4530_s22 + $0x230] sm:$0xff]  ;;  %v1232_v55 = vld [vmem:[%s4530_s22 + $0x428] sm:$0xff] }
 0x24c   : > { %v1201_v54 = vld [vmem:[%s4530_s22 + $0x330] sm:$0xff]  ;;  %v1264_v18 = vld [vmem:[%s4530_s22 + $0x528] sm:$0xff]  ;;  %v1234_v56 = vld [vmem:[%s4530_s22 + $0x438] sm:$0xff] }
 0x24d   : > { %2920 = vmatpush1.bf16.xpose.msra.mxu0 %v2919_v49  ;;  %v2973_v49 = vpack.c.bf16 %v1200_v43, %v1168_v9  ;;  %v1266_v57 = vld [vmem:[%s4530_s22 + $0x538] sm:$0xff]  ;;  %v1231_v61 = vld [vmem:[%s4530_s22 + $0x420] sm:$0xff]  ;;  %v1233_v63 = vld [vmem:[%s4530_s22 + $0x430] sm:$0xff] }
 0x24e   : > { %2952 = vmatpush1.bf16.xpose.msra.mxu1 %v2951_v50  ;;  %2922 = vmatprep.subr.bf16.mxu0 %v2921_v13  ;;  %v3005_v50 = vpack.c.bf16 %v1202_v45, %v1170_v44  ;;  %v1072_v13 = vld [vmem:[%s4528_s30 + $0x28] sm:$0xff]  ;;  %v1263_v62 = vld [vmem:[%s4530_s22 + $0x520] sm:$0xff]  ;;  %v1265_v0 = vld [vmem:[%s4530_s22 + $0x530] sm:$0xff] }
 0x24f   : > { %2954 = vmatprep.subr.bf16.mxu1 %v2953_v51  ;;  %v1074_v51 = vld [vmem:[%s4528_s30 + $0x38] sm:$0xff]  ;;  %v1296_v1 = vld [vmem:[%s4530_s22 + $0x628] sm:$0xff]  ;;  %v1295_v12 = vld [vmem:[%s4530_s22 + $0x620] sm:$0xff] }
 0x250   : > { %v1328_v2 = vld [vmem:[%s4530_s22 + $0x728] sm:$0xff]  ;;  %v1298_v3 = vld [vmem:[%s4530_s22 + $0x638] sm:$0xff]  ;;  %v1327_v14 = vld [vmem:[%s4530_s22 + $0x720] sm:$0xff] }
 0x251   : > { %v1330_v4 = vld [vmem:[%s4530_s22 + $0x738] sm:$0xff]  ;;  %v1297_v15 = vld [vmem:[%s4530_s22 + $0x630] sm:$0xff]  ;;  %v1360_v19 = vld [vmem:[%s4530_s22 + $0x828] sm:$0xff] }
 0x252   : > { %v1329_v16 = vld [vmem:[%s4530_s22 + $0x730] sm:$0xff]  ;;  %v1392_v21 = vld [vmem:[%s4530_s22 + $0x928] sm:$0xff]  ;;  %v1362_v22 = vld [vmem:[%s4530_s22 + $0x838] sm:$0xff] }
 0x253   : > { %v1394_v23 = vld [vmem:[%s4530_s22 + $0x938] sm:$0xff]  ;;  %v1359_v28 = vld [vmem:[%s4530_s22 + $0x820] sm:$0xff]  ;;  %v1361_v30 = vld [vmem:[%s4530_s22 + $0x830] sm:$0xff] }
 0x254   : > { %v1391_v29 = vld [vmem:[%s4530_s22 + $0x920] sm:$0xff]  ;;  %v1393_v31 = vld [vmem:[%s4530_s22 + $0x930] sm:$0xff]  ;;  %v1424_v32 = vld [vmem:[%s4530_s22 + $0xa28] sm:$0xff] }
 0x255   : > { %2924 = vmatpush1.bf16.xpose.msra.mxu0 %v2923_v20  ;;  %v2975_v20 = vpack.c.bf16 %v1199_v17, %v1167_v52  ;;  %v1456_v33 = vld [vmem:[%s4530_s22 + $0xb28] sm:$0xff]  ;;  %v1426_v8 = vld [vmem:[%s4530_s22 + $0xa38] sm:$0xff]  ;;  %v1423_v39 = vld [vmem:[%s4530_s22 + $0xa20] sm:$0xff] }
 0x256   : > { %2956 = vmatpush1.bf16.xpose.msra.mxu1 %v2955_v58  ;;  %2926 = vmatprep.subr.bf16.mxu0 %v2925_v59  ;;  %v3007_v58 = vpack.c.bf16 %v1201_v54, %v1169_v53  ;;  %v2977_v59 = vpack.c.bf16 %v1264_v18, %v1232_v55  ;;  %v1458_v34 = vld [vmem:[%s4530_s22 + $0xb38] sm:$0xff]  ;;  %v1455_v40 = vld [vmem:[%s4530_s22 + $0xb20] sm:$0xff]  ;;  %v1425_v41 = vld [vmem:[%s4530_s22 + $0xa30] sm:$0xff] }
 0x257   : > { %2958 = vmatprep.subr.bf16.mxu1 %v2957_v60  ;;  %v3009_v60 = vpack.c.bf16 %v1266_v57, %v1234_v56  ;;  %v1457_v42 = vld [vmem:[%s4530_s22 + $0xb30] sm:$0xff]  ;;  %v1488_v9 = vld [vmem:[%s4530_s22 + $0xc28] sm:$0xff]  ;;  %v1490_v44 = vld [vmem:[%s4530_s22 + $0xc38] sm:$0xff] }
 0x258   : > { %v1520_v43 = vld [vmem:[%s4530_s22 + $0xd28] sm:$0xff]  ;;  %v1522_v45 = vld [vmem:[%s4530_s22 + $0xd38] sm:$0xff] }
 0x259   : > { %v1552_v52 = vld [vmem:[%s4530_s22 + $0xe28] sm:$0xff]  ;;  %v1554_v53 = vld [vmem:[%s4530_s22 + $0xe38] sm:$0xff] }
 0x25a   : > { %v1584_v17 = vld [vmem:[%s4530_s22 + $0xf28] sm:$0xff]  ;;  %v1586_v54 = vld [vmem:[%s4530_s22 + $0xf38] sm:$0xff] }
 0x25b   : > { %v2997_v56 = vpack.c.bf16 %v1584_v17, %v1552_v52  ;;  %v3029_v57 = vpack.c.bf16 %v1586_v54, %v1554_v53  ;;  %v1364_v52 = vld [vmem:[%s4530_s22 + $0x848] sm:$0xff]  ;;  %v1366_v53 = vld [vmem:[%s4530_s22 + $0x858] sm:$0xff] }
 0x25c   : > { %v1396_v17 = vld [vmem:[%s4530_s22 + $0x948] sm:$0xff]  ;;  %v1398_v54 = vld [vmem:[%s4530_s22 + $0x958] sm:$0xff] }
 0x25d   : > { %2928 = vmatpush1.bf16.xpose.msra.mxu0 %v2927_v5  ;;  %v2979_v5 = vpack.c.bf16 %v1263_v62, %v1231_v61  ;;  %v1108_v61 = vld [vmem:[%s4530_s22 + $0x48] sm:$0xff] }
 0x25e   : > { %2960 = vmatpush1.bf16.xpose.msra.mxu1 %v2959_v6  ;;  %2930 = vmatprep.subr.bf16.mxu0 %v2929_v7  ;;  %v3011_v6 = vpack.c.bf16 %v1265_v0, %v1233_v63  ;;  %v2981_v7 = vpack.c.bf16 %v1328_v2, %v1296_v1  ;;  %v1140_v62 = vld [vmem:[%s4530_s22 + $0x148] sm:$0xff]  ;;  %v1110_v63 = vld [vmem:[%s4530_s22 + $0x58] sm:$0xff] }
 0x25f   : > { %2962 = vmatprep.subr.bf16.mxu1 %v2961_v11  ;;  %v3013_v11 = vpack.c.bf16 %v1330_v4, %v1298_v3  ;;  %v1142_v0 = vld [vmem:[%s4530_s22 + $0x158] sm:$0xff]  ;;  %v3033_v3 = vpack.c.bf16 %v1140_v62, %v1108_v61  ;;  %v1428_v61 = vld [vmem:[%s4530_s22 + $0xa48] sm:$0xff] }
 0x260   : > { %v3065_v4 = vpack.c.bf16 %v1142_v0, %v1110_v63  ;;  %v1460_v62 = vld [vmem:[%s4530_s22 + $0xb48] sm:$0xff]  ;;  %v1430_v63 = vld [vmem:[%s4530_s22 + $0xa58] sm:$0xff] }
 0x261   : > { %v1462_v0 = vld [vmem:[%s4530_s22 + $0xb58] sm:$0xff] }
 0x265   : > { %2932 = vmatpush1.bf16.xpose.msra.mxu0 %v2931_v24  ;;  %v2983_v24 = vpack.c.bf16 %v1327_v14, %v1295_v12  ;;  %v1172_v12 = vld [vmem:[%s4530_s22 + $0x248] sm:$0xff] }
 0x266   : > { %2964 = vmatpush1.bf16.xpose.msra.mxu1 %v2963_v25  ;;  %2934 = vmatprep.subr.bf16.mxu0 %v2933_v26  ;;  %v3015_v25 = vpack.c.bf16 %v1329_v16, %v1297_v15  ;;  %v2985_v26 = vpack.c.bf16 %v1392_v21, %v1360_v19  ;;  %v1204_v14 = vld [vmem:[%s4530_s22 + $0x348] sm:$0xff]  ;;  %v1174_v15 = vld [vmem:[%s4530_s22 + $0x258] sm:$0xff]  ;;  %v1071_v19 = vld [vmem:[%s4528_s30 + $0x20] sm:$0xff] }
 0x267   : > { %2966 = vmatprep.subr.bf16.mxu1 %v2965_v27  ;;  %v3017_v27 = vpack.c.bf16 %v1394_v23, %v1362_v22  ;;  %v1206_v16 = vld [vmem:[%s4530_s22 + $0x358] sm:$0xff]  ;;  %v1073_v22 = vld [vmem:[%s4528_s30 + $0x30] sm:$0xff] }
 0x26d   : > { %2936 = vmatpush1.bf16.xpose.msra.mxu0 %v2935_v35  ;;  %v2987_v35 = vpack.c.bf16 %v1391_v29, %v1359_v28  ;;  %v1171_v28 = vld [vmem:[%s4530_s22 + $0x240] sm:$0xff] }
 0x26e   : > { %2968 = vmatpush1.bf16.xpose.msra.mxu1 %v2967_v36  ;;  %2970 = vmatprep.subr.bf16.mxu0 %v2969_v37  ;;  %v3019_v36 = vpack.c.bf16 %v1393_v31, %v1361_v30  ;;  %v2989_v37 = vpack.c.bf16 %v1456_v33, %v1424_v32  ;;  %v1203_v29 = vld [vmem:[%s4530_s22 + $0x340] sm:$0xff]  ;;  %v1173_v30 = vld [vmem:[%s4530_s22 + $0x250] sm:$0xff]  ;;  %v1236_v32 = vld [vmem:[%s4530_s22 + $0x448] sm:$0xff] }
 0x26f   : > { %3002 = vmatprep.subr.bf16.mxu1 %v3001_v38  ;;  %v3021_v38 = vpack.c.bf16 %v1458_v34, %v1426_v8  ;;  %v1205_v31 = vld [vmem:[%s4530_s22 + $0x350] sm:$0xff]  ;;  %v1268_v33 = vld [vmem:[%s4530_s22 + $0x548] sm:$0xff]  ;;  %v1238_v8 = vld [vmem:[%s4530_s22 + $0x458] sm:$0xff] }
 0x270   : > { %v1270_v34 = vld [vmem:[%s4530_s22 + $0x558] sm:$0xff] }
 0x274   : > { %1676 = vmatmul.mubr.f32.vlgmr.msra.gmra.mrb[0].mxu0 %v1067_v46  ;;  %v2991_v46 = vpack.c.bf16 %v1455_v40, %v1423_v39  ;;  %v1235_v39 = vld [vmem:[%s4530_s22 + $0x440] sm:$0xff] }
 0x275   : > { %1746 = vmatmul.mubr.f32.vlgmr.msra.gmra.mrb[0].mxu1 %v1069_v47  ;;  %2972 = vmatpush1.bf16.xpose.msra.mxu0 %v2971_v10  ;;  %v3023_v10 = vpack.c.bf16 %v1457_v42, %v1425_v41  ;;  %v2993_v47 = vpack.c.bf16 %v1520_v43, %v1488_v9  ;;  %v1267_v40 = vld [vmem:[%s4530_s22 + $0x540] sm:$0xff]  ;;  %v1237_v41 = vld [vmem:[%s4530_s22 + $0x450] sm:$0xff]  ;;  %v1300_v9 = vld [vmem:[%s4530_s22 + $0x648] sm:$0xff] }
 0x276   : > { %3004 = vmatpush1.bf16.xpose.msra.mxu1 %v3003_v48  ;;  %2974 = vmatprep.subr.bf16.mxu0 %v2973_v49  ;;  %v3025_v48 = vpack.c.bf16 %v1522_v45, %v1490_v44  ;;  %v1487_v49 = vld [vmem:[%s4530_s22 + $0xc20] sm:$0xff]  ;;  %v1269_v42 = vld [vmem:[%s4530_s22 + $0x550] sm:$0xff]  ;;  %v1332_v43 = vld [vmem:[%s4530_s22 + $0x748] sm:$0xff] }
 0x277   : > { %3006 = vmatprep.subr.bf16.mxu1 %v3005_v50  ;;  %1815 = vmatprep.mubr.f32.mxu0 %v1072_v13  ;;  %v1519_v50 = vld [vmem:[%s4530_s22 + $0xd20] sm:$0xff]  ;;  %v1489_v13 = vld [vmem:[%s4530_s22 + $0xc30] sm:$0xff]  ;;  %v1302_v44 = vld [vmem:[%s4530_s22 + $0x658] sm:$0xff] }
 0x278   : > { %1885 = vmatprep.mubr.f32.mxu1 %v1074_v51  ;;  %v1521_v51 = vld [vmem:[%s4530_s22 + $0xd30] sm:$0xff]  ;;  %v2995_v55 = vpack.c.bf16 %v1519_v50, %v1487_v49  ;;  %v1334_v45 = vld [vmem:[%s4530_s22 + $0x758] sm:$0xff]  ;;  %v1299_v49 = vld [vmem:[%s4530_s22 + $0x640] sm:$0xff] }
 0x279   : > { %v3027_v18 = vpack.c.bf16 %v1521_v51, %v1489_v13  ;;  %v1331_v50 = vld [vmem:[%s4530_s22 + $0x740] sm:$0xff]  ;;  %v1301_v13 = vld [vmem:[%s4530_s22 + $0x650] sm:$0xff] }
 0x27a   : > { %v1333_v51 = vld [vmem:[%s4530_s22 + $0x750] sm:$0xff] }
 0x27d   : > { %2976 = vmatpush1.bf16.xpose.msra.mxu0 %v2975_v20  ;;  %v1551_v20 = vld [vmem:[%s4530_s22 + $0xe20] sm:$0xff] }
 0x27e   : > { %3008 = vmatpush1.bf16.xpose.msra.mxu1 %v3007_v58  ;;  %2978 = vmatprep.subr.bf16.mxu0 %v2977_v59  ;;  %v1583_v58 = vld [vmem:[%s4530_s22 + $0xf20] sm:$0xff]  ;;  %v1553_v59 = vld [vmem:[%s4530_s22 + $0xe30] sm:$0xff] }
 0x27f   : > { %3010 = vmatprep.subr.bf16.mxu1 %v3009_v60  ;;  %v1585_v60 = vld [vmem:[%s4530_s22 + $0xf30] sm:$0xff]  ;;  %v2999_v1 = vpack.c.bf16 %v1583_v58, %v1551_v20  ;;  %v1363_v20 = vld [vmem:[%s4530_s22 + $0x840] sm:$0xff] }
 0x280   : > { %v3031_v2 = vpack.c.bf16 %v1585_v60, %v1553_v59  ;;  %v1395_v58 = vld [vmem:[%s4530_s22 + $0x940] sm:$0xff]  ;;  %v1365_v59 = vld [vmem:[%s4530_s22 + $0x850] sm:$0xff] }
 0x281   : > { %v1397_v60 = vld [vmem:[%s4530_s22 + $0x950] sm:$0xff] }
 0x285   : > { %2980 = vmatpush1.bf16.xpose.msra.mxu0 %v2979_v5  ;;  %v1107_v5 = vld [vmem:[%s4530_s22 + $0x40] sm:$0xff] }
 0x286   : > { %3012 = vmatpush1.bf16.xpose.msra.mxu1 %v3011_v6  ;;  %2982 = vmatprep.subr.bf16.mxu0 %v2981_v7  ;;  %v1139_v6 = vld [vmem:[%s4530_s22 + $0x140] sm:$0xff]  ;;  %v1109_v7 = vld [vmem:[%s4530_s22 + $0x50] sm:$0xff] }
 0x287   : > { %3014 = vmatprep.subr.bf16.mxu1 %v3013_v11  ;;  %v1141_v11 = vld [vmem:[%s4530_s22 + $0x150] sm:$0xff]  ;;  %v3035_v21 = vpack.c.bf16 %v1139_v6, %v1107_v5  ;;  %v1427_v5 = vld [vmem:[%s4530_s22 + $0xa40] sm:$0xff] }
 0x288   : > { %v3067_v23 = vpack.c.bf16 %v1141_v11, %v1109_v7  ;;  %v1459_v6 = vld [vmem:[%s4530_s22 + $0xb40] sm:$0xff]  ;;  %v1429_v7 = vld [vmem:[%s4530_s22 + $0xa50] sm:$0xff] }
 0x289   : > { %v1461_v11 = vld [vmem:[%s4530_s22 + $0xb50] sm:$0xff] }
 0x28d   : > { %2984 = vmatpush1.bf16.xpose.msra.mxu0 %v2983_v24  ;;  %v3037_v24 = vpack.c.bf16 %v1204_v14, %v1172_v12  ;;  %v1492_v12 = vld [vmem:[%s4530_s22 + $0xc48] sm:$0xff] }
 0x28e   : > { %3016 = vmatpush1.bf16.xpose.msra.mxu1 %v3015_v25  ;;  %2986 = vmatprep.subr.bf16.mxu0 %v2985_v26  ;;  %v3069_v25 = vpack.c.bf16 %v1206_v16, %v1174_v15  ;;  %v1076_v26 = vld [vmem:[%s4528_s30 + $0x48] sm:$0xff]  ;;  %v1494_v15 = vld [vmem:[%s4530_s22 + $0xc58] sm:$0xff] }
 0x28f   : > { %3018 = vmatprep.subr.bf16.mxu1 %v3017_v27  ;;  %v1078_v27 = vld [vmem:[%s4528_s30 + $0x58] sm:$0xff]  ;;  %v1524_v14 = vld [vmem:[%s4530_s22 + $0xd48] sm:$0xff] }
 0x290   : > { %v1526_v16 = vld [vmem:[%s4530_s22 + $0xd58] sm:$0xff] }
 0x295   : > { %2988 = vmatpush1.bf16.xpose.msra.mxu0 %v2987_v35  ;;  %v3039_v35 = vpack.c.bf16 %v1203_v29, %v1171_v28  ;;  %v1556_v28 = vld [vmem:[%s4530_s22 + $0xe48] sm:$0xff] }
 0x296   : > { %3020 = vmatpush1.bf16.xpose.msra.mxu1 %v3019_v36  ;;  %2990 = vmatprep.subr.bf16.mxu0 %v2989_v37  ;;  %v3071_v36 = vpack.c.bf16 %v1205_v31, %v1173_v30  ;;  %v3041_v37 = vpack.c.bf16 %v1268_v33, %v1236_v32  ;;  %v1588_v29 = vld [vmem:[%s4530_s22 + $0xf48] sm:$0xff]  ;;  %v1558_v30 = vld [vmem:[%s4530_s22 + $0xe58] sm:$0xff] }
 0x297   : > { %3022 = vmatprep.subr.bf16.mxu1 %v3021_v38  ;;  %v3073_v38 = vpack.c.bf16 %v1270_v34, %v1238_v8  ;;  %v1590_v31 = vld [vmem:[%s4530_s22 + $0xf58] sm:$0xff]  ;;  %v3061_v8 = vpack.c.bf16 %v1588_v29, %v1556_v28  ;;  %v1368_v28 = vld [vmem:[%s4530_s22 + $0x868] sm:$0xff] }
 0x298   : > { %v3093_v34 = vpack.c.bf16 %v1590_v31, %v1558_v30  ;;  %v1400_v29 = vld [vmem:[%s4530_s22 + $0x968] sm:$0xff]  ;;  %v1370_v30 = vld [vmem:[%s4530_s22 + $0x878] sm:$0xff] }
 0x299   : > { %v1402_v31 = vld [vmem:[%s4530_s22 + $0x978] sm:$0xff] }
 0x29d   : > { %2992 = vmatpush1.bf16.xpose.msra.mxu0 %v2991_v46  ;;  %v3043_v46 = vpack.c.bf16 %v1267_v40, %v1235_v39  ;;  %v1112_v39 = vld [vmem:[%s4530_s22 + $0x68] sm:$0xff] }
 0x29e   : > { %3024 = vmatpush1.bf16.xpose.msra.mxu1 %v3023_v10  ;;  %2994 = vmatprep.subr.bf16.mxu0 %v2993_v47  ;;  %v3075_v10 = vpack.c.bf16 %v1269_v42, %v1237_v41  ;;  %v3045_v47 = vpack.c.bf16 %v1332_v43, %v1300_v9  ;;  %v1144_v40 = vld [vmem:[%s4530_s22 + $0x168] sm:$0xff]  ;;  %v1114_v41 = vld [vmem:[%s4530_s22 + $0x78] sm:$0xff] }
 0x29f   : > { %3026 = vmatprep.subr.bf16.mxu1 %v3025_v48  ;;  %v3077_v48 = vpack.c.bf16 %v1334_v45, %v1302_v44  ;;  %v1146_v42 = vld [vmem:[%s4530_s22 + $0x178] sm:$0xff]  ;;  %v3097_v44 = vpack.c.bf16 %v1144_v40, %v1112_v39  ;;  %v1432_v39 = vld [vmem:[%s4530_s22 + $0xa68] sm:$0xff] }
 0x2a0   : > { %v3129_v45 = vpack.c.bf16 %v1146_v42, %v1114_v41  ;;  %v1464_v40 = vld [vmem:[%s4530_s22 + $0xb68] sm:$0xff]  ;;  %v1434_v41 = vld [vmem:[%s4530_s22 + $0xa78] sm:$0xff] }
 0x2a1   : > { %v1466_v42 = vld [vmem:[%s4530_s22 + $0xb78] sm:$0xff] }
 0x2a5   : > { %2996 = vmatpush1.bf16.xpose.msra.mxu0 %v2995_v55  ;;  %v3047_v55 = vpack.c.bf16 %v1331_v50, %v1299_v49  ;;  %v1176_v49 = vld [vmem:[%s4530_s22 + $0x268] sm:$0xff] }
 0x2a6   : > { %3028 = vmatpush1.bf16.xpose.msra.mxu1 %v3027_v18  ;;  %2998 = vmatprep.subr.bf16.mxu0 %v2997_v56  ;;  %v3079_v18 = vpack.c.bf16 %v1333_v51, %v1301_v13  ;;  %v3049_v56 = vpack.c.bf16 %v1396_v17, %v1364_v52  ;;  %v1208_v50 = vld [vmem:[%s4530_s22 + $0x368] sm:$0xff]  ;;  %v1178_v13 = vld [vmem:[%s4530_s22 + $0x278] sm:$0xff]  ;;  %v1075_v52 = vld [vmem:[%s4528_s30 + $0x40] sm:$0xff] }
 0x2a7   : > { %3030 = vmatprep.subr.bf16.mxu1 %v3029_v57  ;;  %v3081_v57 = vpack.c.bf16 %v1398_v54, %v1366_v53  ;;  %v1210_v51 = vld [vmem:[%s4530_s22 + $0x378] sm:$0xff]  ;;  %v1077_v53 = vld [vmem:[%s4528_s30 + $0x50] sm:$0xff] }
 0x2ad   : > { %3000 = vmatpush1.bf16.xpose.msra.mxu0 %v2999_v1  ;;  %v3051_v1 = vpack.c.bf16 %v1395_v58, %v1363_v20  ;;  %v1175_v20 = vld [vmem:[%s4530_s22 + $0x260] sm:$0xff] }
 0x2ae   : > { %3032 = vmatpush1.bf16.xpose.msra.mxu1 %v3031_v2  ;;  %3034 = vmatprep.subr.bf16.mxu0 %v3033_v3  ;;  %v3083_v2 = vpack.c.bf16 %v1397_v60, %v1365_v59  ;;  %v3053_v3 = vpack.c.bf16 %v1460_v62, %v1428_v61  ;;  %v1207_v58 = vld [vmem:[%s4530_s22 + $0x360] sm:$0xff]  ;;  %v1177_v59 = vld [vmem:[%s4530_s22 + $0x270] sm:$0xff]  ;;  %v1240_v61 = vld [vmem:[%s4530_s22 + $0x468] sm:$0xff] }
 0x2af   : > { %3066 = vmatprep.subr.bf16.mxu1 %v3065_v4  ;;  %v3085_v4 = vpack.c.bf16 %v1462_v0, %v1430_v63  ;;  %v1209_v60 = vld [vmem:[%s4530_s22 + $0x370] sm:$0xff]  ;;  %v1272_v62 = vld [vmem:[%s4530_s22 + $0x568] sm:$0xff]  ;;  %v1242_v63 = vld [vmem:[%s4530_s22 + $0x478] sm:$0xff] }
 0x2b0   : > { %v1274_v0 = vld [vmem:[%s4530_s22 + $0x578] sm:$0xff] }
 0x2b4   : > { %1816 = vmatmul.mubr.f32.vlgmr.msra.gmra.mrb[2].mxu0 %v1071_v19  ;;  %v3055_v19 = vpack.c.bf16 %v1459_v6, %v1427_v5  ;;  %v1239_v5 = vld [vmem:[%s4530_s22 + $0x460] sm:$0xff] }
 0x2b5   : > { %3036 = vmatpush1.bf16.xpose.msra.mxu0 %v3035_v21  ;;  %1886 = vmatmul.mubr.f32.vlgmr.msra.gmra.mrb[2].mxu1 %v1073_v22  ;;  %v3087_v21 = vpack.c.bf16 %v1461_v11, %v1429_v7  ;;  %v3057_v22 = vpack.c.bf16 %v1524_v14, %v1492_v12  ;;  %v1271_v6 = vld [vmem:[%s4530_s22 + $0x560] sm:$0xff]  ;;  %v1241_v7 = vld [vmem:[%s4530_s22 + $0x470] sm:$0xff]  ;;  %v1304_v12 = vld [vmem:[%s4530_s22 + $0x668] sm:$0xff] }
 0x2b6   : > { %3068 = vmatpush1.bf16.xpose.msra.mxu1 %v3067_v23  ;;  %3038 = vmatprep.subr.bf16.mxu0 %v3037_v24  ;;  %v3089_v23 = vpack.c.bf16 %v1526_v16, %v1494_v15  ;;  %v1491_v24 = vld [vmem:[%s4530_s22 + $0xc40] sm:$0xff]  ;;  %v1273_v11 = vld [vmem:[%s4530_s22 + $0x570] sm:$0xff]  ;;  %v1336_v14 = vld [vmem:[%s4530_s22 + $0x768] sm:$0xff] }
 0x2b7   : > { %3070 = vmatprep.subr.bf16.mxu1 %v3069_v25  ;;  %1955 = vmatprep.mubr.f32.mxu0 %v1076_v26  ;;  %v1523_v25 = vld [vmem:[%s4530_s22 + $0xd40] sm:$0xff]  ;;  %v1493_v26 = vld [vmem:[%s4530_s22 + $0xc50] sm:$0xff]  ;;  %v1306_v15 = vld [vmem:[%s4530_s22 + $0x678] sm:$0xff] }
 0x2b8   : > { %2025 = vmatprep.mubr.f32.mxu1 %v1078_v27  ;;  %v1525_v27 = vld [vmem:[%s4530_s22 + $0xd50] sm:$0xff]  ;;  %v3059_v32 = vpack.c.bf16 %v1523_v25, %v1491_v24  ;;  %v1338_v16 = vld [vmem:[%s4530_s22 + $0x778] sm:$0xff]  ;;  %v1303_v24 = vld [vmem:[%s4530_s22 + $0x660] sm:$0xff] }
 0x2b9   : > { %v3091_v33 = vpack.c.bf16 %v1525_v27, %v1493_v26  ;;  %v1335_v25 = vld [vmem:[%s4530_s22 + $0x760] sm:$0xff]  ;;  %v1305_v26 = vld [vmem:[%s4530_s22 + $0x670] sm:$0xff] }
 0x2ba   : > { %v1337_v27 = vld [vmem:[%s4530_s22 + $0x770] sm:$0xff] }
 0x2bd   : > { %3040 = vmatpush1.bf16.xpose.msra.mxu0 %v3039_v35  ;;  %v1555_v35 = vld [vmem:[%s4530_s22 + $0xe40] sm:$0xff] }
 0x2be   : > { %3072 = vmatpush1.bf16.xpose.msra.mxu1 %v3071_v36  ;;  %3042 = vmatprep.subr.bf16.mxu0 %v3041_v37  ;;  %v1587_v36 = vld [vmem:[%s4530_s22 + $0xf40] sm:$0xff]  ;;  %v1557_v37 = vld [vmem:[%s4530_s22 + $0xe50] sm:$0xff] }
 0x2bf   : > { %3074 = vmatprep.subr.bf16.mxu1 %v3073_v38  ;;  %v1589_v38 = vld [vmem:[%s4530_s22 + $0xf50] sm:$0xff]  ;;  %v3063_v9 = vpack.c.bf16 %v1587_v36, %v1555_v35  ;;  %v1367_v35 = vld [vmem:[%s4530_s22 + $0x860] sm:$0xff] }
 0x2c0   : > { %v3095_v43 = vpack.c.bf16 %v1589_v38, %v1557_v37  ;;  %v1399_v36 = vld [vmem:[%s4530_s22 + $0x960] sm:$0xff]  ;;  %v1369_v37 = vld [vmem:[%s4530_s22 + $0x870] sm:$0xff] }
 0x2c1   : > { %v1401_v38 = vld [vmem:[%s4530_s22 + $0x970] sm:$0xff] }
 0x2c5   : > { %3044 = vmatpush1.bf16.xpose.msra.mxu0 %v3043_v46  ;;  %v1111_v46 = vld [vmem:[%s4530_s22 + $0x60] sm:$0xff] }
 0x2c6   : > { %3076 = vmatpush1.bf16.xpose.msra.mxu1 %v3075_v10  ;;  %3046 = vmatprep.subr.bf16.mxu0 %v3045_v47  ;;  %v1143_v10 = vld [vmem:[%s4530_s22 + $0x160] sm:$0xff]  ;;  %v1113_v47 = vld [vmem:[%s4530_s22 + $0x70] sm:$0xff] }
 0x2c7   : > { %3078 = vmatprep.subr.bf16.mxu1 %v3077_v48  ;;  %v1145_v48 = vld [vmem:[%s4530_s22 + $0x170] sm:$0xff]  ;;  %v3099_v17 = vpack.c.bf16 %v1143_v10, %v1111_v46  ;;  %v1431_v46 = vld [vmem:[%s4530_s22 + $0xa60] sm:$0xff] }
 0x2c8   : > { %v3131_v54 = vpack.c.bf16 %v1145_v48, %v1113_v47  ;;  %v1463_v10 = vld [vmem:[%s4530_s22 + $0xb60] sm:$0xff]  ;;  %v1433_v47 = vld [vmem:[%s4530_s22 + $0xa70] sm:$0xff] }
 0x2c9   : > { %v1465_v48 = vld [vmem:[%s4530_s22 + $0xb70] sm:$0xff] }
 0x2cd   : > { %3048 = vmatpush1.bf16.xpose.msra.mxu0 %v3047_v55  ;;  %v3101_v55 = vpack.c.bf16 %v1208_v50, %v1176_v49  ;;  %v1496_v49 = vld [vmem:[%s4530_s22 + $0xc68] sm:$0xff] }
 0x2ce   : > { %3080 = vmatpush1.bf16.xpose.msra.mxu1 %v3079_v18  ;;  %3050 = vmatprep.subr.bf16.mxu0 %v3049_v56  ;;  %v3133_v18 = vpack.c.bf16 %v1210_v51, %v1178_v13  ;;  %v1080_v56 = vld [vmem:[%s4528_s30 + $0x68] sm:$0xff]  ;;  %v1498_v13 = vld [vmem:[%s4530_s22 + $0xc78] sm:$0xff] }
 0x2cf   : > { %3082 = vmatprep.subr.bf16.mxu1 %v3081_v57  ;;  %v1082_v57 = vld [vmem:[%s4528_s30 + $0x78] sm:$0xff]  ;;  %v1528_v50 = vld [vmem:[%s4530_s22 + $0xd68] sm:$0xff] }
 0x2d0   : > { %v1530_v51 = vld [vmem:[%s4530_s22 + $0xd78] sm:$0xff] }
 0x2d5   : > { %3052 = vmatpush1.bf16.xpose.msra.mxu0 %v3051_v1  ;;  %v3103_v1 = vpack.c.bf16 %v1207_v58, %v1175_v20  ;;  %v1560_v20 = vld [vmem:[%s4530_s22 + $0xe68] sm:$0xff] }
 0x2d6   : > { %3084 = vmatpush1.bf16.xpose.msra.mxu1 %v3083_v2  ;;  %3054 = vmatprep.subr.bf16.mxu0 %v3053_v3  ;;  %v3135_v2 = vpack.c.bf16 %v1209_v60, %v1177_v59  ;;  %v3105_v3 = vpack.c.bf16 %v1272_v62, %v1240_v61  ;;  %v1592_v58 = vld [vmem:[%s4530_s22 + $0xf68] sm:$0xff]  ;;  %v1562_v59 = vld [vmem:[%s4530_s22 + $0xe78] sm:$0xff] }
 0x2d7   : > { %3086 = vmatprep.subr.bf16.mxu1 %v3085_v4  ;;  %v3137_v4 = vpack.c.bf16 %v1274_v0, %v1242_v63  ;;  %v1594_v60 = vld [vmem:[%s4530_s22 + $0xf78] sm:$0xff]  ;;  %v3125_v63 = vpack.c.bf16 %v1592_v58, %v1560_v20  ;;  %v1341_v20 = vld [vmem:[%s4530_s22 + $0x790] sm:$0xff]  ;;  %v1372_v58 = vld [vmem:[%s4530_s22 + $0x888] sm:$0xff] }
 0x2d8   : > { %v3157_v0 = vpack.c.bf16 %v1594_v60, %v1562_v59  ;;  %v1404_v59 = vld [vmem:[%s4530_s22 + $0x988] sm:$0xff] }
 0x2dd   : > { %3056 = vmatpush1.bf16.xpose.msra.mxu0 %v3055_v19  ;;  %v3107_v19 = vpack.c.bf16 %v1271_v6, %v1239_v5  ;;  %v1116_v5 = vld [vmem:[%s4530_s22 + $0x88] sm:$0xff] }
 0x2de   : > { %3088 = vmatpush1.bf16.xpose.msra.mxu1 %v3087_v21  ;;  %3058 = vmatprep.subr.bf16.mxu0 %v3057_v22  ;;  %v3139_v21 = vpack.c.bf16 %v1273_v11, %v1241_v7  ;;  %v3109_v22 = vpack.c.bf16 %v1336_v14, %v1304_v12  ;;  %v1148_v6 = vld [vmem:[%s4530_s22 + $0x188] sm:$0xff]  ;;  %v1118_v7 = vld [vmem:[%s4530_s22 + $0x98] sm:$0xff] }
 0x2df   : > { %3090 = vmatprep.subr.bf16.mxu1 %v3089_v23  ;;  %v3141_v23 = vpack.c.bf16 %v1338_v16, %v1306_v15  ;;  %v1150_v11 = vld [vmem:[%s4530_s22 + $0x198] sm:$0xff]  ;;  %v3161_v15 = vpack.c.bf16 %v1148_v6, %v1116_v5  ;;  %v1371_v6 = vld [vmem:[%s4530_s22 + $0x880] sm:$0xff] }
 0x2e0   : > { %v3193_v16 = vpack.c.bf16 %v1150_v11, %v1118_v7  ;;  %v1403_v7 = vld [vmem:[%s4530_s22 + $0x980] sm:$0xff]  ;;  %v1373_v11 = vld [vmem:[%s4530_s22 + $0x890] sm:$0xff] }
 0x2e5   : > { %3060 = vmatpush1.bf16.xpose.msra.mxu0 %v3059_v32  ;;  %v3111_v32 = vpack.c.bf16 %v1335_v25, %v1303_v24  ;;  %v1180_v24 = vld [vmem:[%s4530_s22 + $0x288] sm:$0xff] }
 0x2e6   : > { %3092 = vmatpush1.bf16.xpose.msra.mxu1 %v3091_v33  ;;  %3062 = vmatprep.subr.bf16.mxu0 %v3061_v8  ;;  %v3143_v33 = vpack.c.bf16 %v1337_v27, %v1305_v26  ;;  %v3113_v8 = vpack.c.bf16 %v1400_v29, %v1368_v28  ;;  %v1212_v25 = vld [vmem:[%s4530_s22 + $0x388] sm:$0xff]  ;;  %v1182_v26 = vld [vmem:[%s4530_s22 + $0x298] sm:$0xff]  ;;  %v1079_v28 = vld [vmem:[%s4528_s30 + $0x60] sm:$0xff] }
 0x2e7   : > { %3094 = vmatprep.subr.bf16.mxu1 %v3093_v34  ;;  %v3145_v34 = vpack.c.bf16 %v1402_v31, %v1370_v30  ;;  %v1214_v27 = vld [vmem:[%s4530_s22 + $0x398] sm:$0xff]  ;;  %v1081_v30 = vld [vmem:[%s4528_s30 + $0x70] sm:$0xff] }
 0x2ed   : > { %3064 = vmatpush1.bf16.xpose.msra.mxu0 %v3063_v9  ;;  %v3115_v9 = vpack.c.bf16 %v1399_v36, %v1367_v35  ;;  %v1179_v35 = vld [vmem:[%s4530_s22 + $0x280] sm:$0xff] }
 0x2ee   : > { %3096 = vmatpush1.bf16.xpose.msra.mxu1 %v3095_v43  ;;  %3098 = vmatprep.subr.bf16.mxu0 %v3097_v44  ;;  %v3147_v43 = vpack.c.bf16 %v1401_v38, %v1369_v37  ;;  %v3117_v44 = vpack.c.bf16 %v1464_v40, %v1432_v39  ;;  %v1211_v36 = vld [vmem:[%s4530_s22 + $0x380] sm:$0xff]  ;;  %v1181_v37 = vld [vmem:[%s4530_s22 + $0x290] sm:$0xff]  ;;  %v1244_v39 = vld [vmem:[%s4530_s22 + $0x488] sm:$0xff] }
 0x2ef   : > { %3130 = vmatprep.subr.bf16.mxu1 %v3129_v45  ;;  %v3149_v45 = vpack.c.bf16 %v1466_v42, %v1434_v41  ;;  %v1213_v38 = vld [vmem:[%s4530_s22 + $0x390] sm:$0xff]  ;;  %v1276_v40 = vld [vmem:[%s4530_s22 + $0x588] sm:$0xff]  ;;  %v1246_v41 = vld [vmem:[%s4530_s22 + $0x498] sm:$0xff] }
 0x2f0   : > { %v1278_v42 = vld [vmem:[%s4530_s22 + $0x598] sm:$0xff] }
 0x2f4   : > { %1956 = vmatmul.mubr.f32.vlgmr.msra.gmra.mrb[4].mxu0 %v1075_v52  ;;  %v3119_v52 = vpack.c.bf16 %v1463_v10, %v1431_v46  ;;  %v1243_v46 = vld [vmem:[%s4530_s22 + $0x480] sm:$0xff] }
 0x2f5   : > { %3100 = vmatpush1.bf16.xpose.msra.mxu0 %v3099_v17  ;;  %2026 = vmatmul.mubr.f32.vlgmr.msra.gmra.mrb[4].mxu1 %v1077_v53  ;;  %v3151_v17 = vpack.c.bf16 %v1465_v48, %v1433_v47  ;;  %v3121_v53 = vpack.c.bf16 %v1528_v50, %v1496_v49  ;;  %v1275_v10 = vld [vmem:[%s4530_s22 + $0x580] sm:$0xff]  ;;  %v1245_v47 = vld [vmem:[%s4530_s22 + $0x490] sm:$0xff]  ;;  %v1308_v49 = vld [vmem:[%s4530_s22 + $0x688] sm:$0xff] }
 0x2f6   : > { %3132 = vmatpush1.bf16.xpose.msra.mxu1 %v3131_v54  ;;  %3102 = vmatprep.subr.bf16.mxu0 %v3101_v55  ;;  %v3153_v54 = vpack.c.bf16 %v1530_v51, %v1498_v13  ;;  %v1495_v55 = vld [vmem:[%s4530_s22 + $0xc60] sm:$0xff]  ;;  %v1277_v48 = vld [vmem:[%s4530_s22 + $0x590] sm:$0xff]  ;;  %v1340_v50 = vld [vmem:[%s4530_s22 + $0x788] sm:$0xff] }
 0x2f7   : > { %3134 = vmatprep.subr.bf16.mxu1 %v3133_v18  ;;  %2095 = vmatprep.mubr.f32.mxu0 %v1080_v56  ;;  %v1527_v18 = vld [vmem:[%s4530_s22 + $0xd60] sm:$0xff]  ;;  %v1497_v56 = vld [vmem:[%s4530_s22 + $0xc70] sm:$0xff]  ;;  %v1310_v13 = vld [vmem:[%s4530_s22 + $0x698] sm:$0xff] }
 0x2f8   : > { %2165 = vmatprep.mubr.f32.mxu1 %v1082_v57  ;;  %v1529_v57 = vld [vmem:[%s4530_s22 + $0xd70] sm:$0xff]  ;;  %v3123_v61 = vpack.c.bf16 %v1527_v18, %v1495_v55  ;;  %v1342_v51 = vld [vmem:[%s4530_s22 + $0x798] sm:$0xff]  ;;  %v1307_v55 = vld [vmem:[%s4530_s22 + $0x680] sm:$0xff] }
 0x2f9   : > { %v3155_v62 = vpack.c.bf16 %v1529_v57, %v1497_v56  ;;  %v1339_v18 = vld [vmem:[%s4530_s22 + $0x780] sm:$0xff]  ;;  %v1309_v56 = vld [vmem:[%s4530_s22 + $0x690] sm:$0xff] }
 0x2fd   : > { %3104 = vmatpush1.bf16.xpose.msra.mxu0 %v3103_v1  ;;  %v1559_v1 = vld [vmem:[%s4530_s22 + $0xe60] sm:$0xff] }
 0x2fe   : > { %3136 = vmatpush1.bf16.xpose.msra.mxu1 %v3135_v2  ;;  %3106 = vmatprep.subr.bf16.mxu0 %v3105_v3  ;;  %v1591_v2 = vld [vmem:[%s4530_s22 + $0xf60] sm:$0xff]  ;;  %v1561_v3 = vld [vmem:[%s4530_s22 + $0xe70] sm:$0xff] }
 0x2ff   : > { %3138 = vmatprep.subr.bf16.mxu1 %v3137_v4  ;;  %v1593_v4 = vld [vmem:[%s4530_s22 + $0xf70] sm:$0xff]  ;;  %v3127_v12 = vpack.c.bf16 %v1591_v2, %v1559_v1  ;;  %v3175_v2 = vpack.c.bf16 %v1339_v18, %v1307_v55  ;;  %v1119_v18 = vld [vmem:[%s4530_s22 + $0xa0] sm:$0xff] }
 0x300   : > { %v3159_v14 = vpack.c.bf16 %v1593_v4, %v1561_v3  ;;  %v3207_v3 = vpack.c.bf16 %v1341_v20, %v1309_v56  ;;  %v3177_v4 = vpack.c.bf16 %v1404_v59, %v1372_v58  ;;  %v1151_v56 = vld [vmem:[%s4530_s22 + $0x1a0] sm:$0xff]  ;;  %v1153_v20 = vld [vmem:[%s4530_s22 + $0x1b0] sm:$0xff]  ;;  %v1184_v58 = vld [vmem:[%s4530_s22 + $0x2a8] sm:$0xff] }
 0x301   : > { %v1216_v59 = vld [vmem:[%s4530_s22 + $0x3a8] sm:$0xff] }
 0x305   : > { %3108 = vmatpush1.bf16.xpose.msra.mxu0 %v3107_v19  ;;  %v1115_v19 = vld [vmem:[%s4530_s22 + $0x80] sm:$0xff] }
 0x306   : > { %3140 = vmatpush1.bf16.xpose.msra.mxu1 %v3139_v21  ;;  %3110 = vmatprep.subr.bf16.mxu0 %v3109_v22  ;;  %v1147_v21 = vld [vmem:[%s4530_s22 + $0x180] sm:$0xff]  ;;  %v1117_v22 = vld [vmem:[%s4530_s22 + $0x90] sm:$0xff] }
 0x307   : > { %3142 = vmatprep.subr.bf16.mxu1 %v3141_v23  ;;  %v1149_v23 = vld [vmem:[%s4530_s22 + $0x190] sm:$0xff]  ;;  %v3163_v29 = vpack.c.bf16 %v1147_v21, %v1115_v19  ;;  %v1470_v19 = vld [vmem:[%s4530_s22 + $0xb98] sm:$0xff]  ;;  %v3179_v21 = vpack.c.bf16 %v1403_v7, %v1371_v6  ;;  %v1183_v7 = vld [vmem:[%s4530_s22 + $0x2a0] sm:$0xff] }
 0x308   : > { %v3195_v31 = vpack.c.bf16 %v1149_v23, %v1117_v22  ;;  %v1090_v6 = vld [vmem:[%s4528_s30 + $0xb8] sm:$0xff] }
 0x30d   : > { %3112 = vmatpush1.bf16.xpose.msra.mxu0 %v3111_v32  ;;  %v3165_v32 = vpack.c.bf16 %v1212_v25, %v1180_v24  ;;  %v1435_v25 = vld [vmem:[%s4530_s22 + $0xa80] sm:$0xff] }
 0x30e   : > { %3144 = vmatpush1.bf16.xpose.msra.mxu1 %v3143_v33  ;;  %3114 = vmatprep.subr.bf16.mxu0 %v3113_v8  ;;  %v3197_v33 = vpack.c.bf16 %v1214_v27, %v1182_v26  ;;  %v1084_v8 = vld [vmem:[%s4528_s30 + $0x88] sm:$0xff]  ;;  %v1467_v26 = vld [vmem:[%s4530_s22 + $0xb80] sm:$0xff]  ;;  %v1437_v27 = vld [vmem:[%s4530_s22 + $0xa90] sm:$0xff] }
 0x30f   : > { %3146 = vmatprep.subr.bf16.mxu1 %v3145_v34  ;;  %v1086_v34 = vld [vmem:[%s4528_s30 + $0x98] sm:$0xff] }
 0x315   : > { %3116 = vmatpush1.bf16.xpose.msra.mxu0 %v3115_v9  ;;  %v3167_v9 = vpack.c.bf16 %v1211_v36, %v1179_v35  ;;  %v1499_v36 = vld [vmem:[%s4530_s22 + $0xc80] sm:$0xff] }
 0x316   : > { %3148 = vmatpush1.bf16.xpose.msra.mxu1 %v3147_v43  ;;  %3118 = vmatprep.subr.bf16.mxu0 %v3117_v44  ;;  %v3199_v43 = vpack.c.bf16 %v1213_v38, %v1181_v37  ;;  %v3169_v44 = vpack.c.bf16 %v1276_v40, %v1244_v39  ;;  %v1531_v37 = vld [vmem:[%s4530_s22 + $0xd80] sm:$0xff]  ;;  %v1501_v38 = vld [vmem:[%s4530_s22 + $0xc90] sm:$0xff]  ;;  %v1564_v40 = vld [vmem:[%s4530_s22 + $0xe88] sm:$0xff] }
 0x317   : > { %3150 = vmatprep.subr.bf16.mxu1 %v3149_v45  ;;  %v3201_v45 = vpack.c.bf16 %v1278_v42, %v1246_v41  ;;  %v1533_v39 = vld [vmem:[%s4530_s22 + $0xd90] sm:$0xff]  ;;  %v1596_v41 = vld [vmem:[%s4530_s22 + $0xf88] sm:$0xff]  ;;  %v1566_v42 = vld [vmem:[%s4530_s22 + $0xe98] sm:$0xff] }
 0x31d   : > { %3120 = vmatpush1.bf16.xpose.msra.mxu0 %v3119_v52  ;;  %v3171_v52 = vpack.c.bf16 %v1275_v10, %v1243_v46  ;;  %v1563_v10 = vld [vmem:[%s4530_s22 + $0xe80] sm:$0xff] }
 0x31e   : > { %3152 = vmatpush1.bf16.xpose.msra.mxu1 %v3151_v17  ;;  %3122 = vmatprep.subr.bf16.mxu0 %v3121_v53  ;;  %v3203_v17 = vpack.c.bf16 %v1277_v48, %v1245_v47  ;;  %v3173_v53 = vpack.c.bf16 %v1340_v50, %v1308_v49  ;;  %v1595_v47 = vld [vmem:[%s4530_s22 + $0xf80] sm:$0xff]  ;;  %v1565_v48 = vld [vmem:[%s4530_s22 + $0xe90] sm:$0xff]  ;;  %v1120_v50 = vld [vmem:[%s4530_s22 + $0xa8] sm:$0xff] }
 0x31f   : > { %3154 = vmatprep.subr.bf16.mxu1 %v3153_v54  ;;  %v3205_v54 = vpack.c.bf16 %v1342_v51, %v1310_v13  ;;  %v1597_v49 = vld [vmem:[%s4530_s22 + $0xf90] sm:$0xff]  ;;  %v1152_v13 = vld [vmem:[%s4530_s22 + $0x1a8] sm:$0xff]  ;;  %v1122_v51 = vld [vmem:[%s4530_s22 + $0xb8] sm:$0xff] }
 0x325   : > { %3124 = vmatpush1.bf16.xpose.msra.mxu0 %v3123_v61 }
 0x326   : > { %3156 = vmatpush1.bf16.xpose.msra.mxu1 %v3155_v62  ;;  %3126 = vmatprep.subr.bf16.mxu0 %v3125_v63  ;;  %v1374_v62 = vld [vmem:[%s4530_s22 + $0x898] sm:$0xff] }
 0x327   : > { %3158 = vmatprep.subr.bf16.mxu1 %v3157_v0  ;;  %v1406_v63 = vld [vmem:[%s4530_s22 + $0x998] sm:$0xff] }
 0x328   : > { %v3209_v5 = vpack.c.bf16 %v1406_v63, %v1374_v62  ;;  %v1083_v62 = vld [vmem:[%s4528_s30 + $0x80] sm:$0xff]  ;;  %v3227_v63 = vpack.c.bf16 %v1151_v56, %v1119_v18  ;;  %v1442_v18 = vld [vmem:[%s4530_s22 + $0xab8] sm:$0xff] }
 0x329   : > { %v1474_v56 = vld [vmem:[%s4530_s22 + $0xbb8] sm:$0xff] }
 0x32d   : > { %3128 = vmatpush1.bf16.xpose.msra.mxu0 %v3127_v12  ;;  %v1405_v12 = vld [vmem:[%s4530_s22 + $0x990] sm:$0xff] }
 0x32e   : > { %3160 = vmatpush1.bf16.xpose.msra.mxu1 %v3159_v14  ;;  %3162 = vmatprep.subr.bf16.mxu0 %v3161_v15  ;;  %v1436_v14 = vld [vmem:[%s4530_s22 + $0xa88] sm:$0xff]  ;;  %v3211_v22 = vpack.c.bf16 %v1405_v12, %v1373_v11  ;;  %v1215_v11 = vld [vmem:[%s4530_s22 + $0x3a0] sm:$0xff]  ;;  %v1185_v12 = vld [vmem:[%s4530_s22 + $0x2b0] sm:$0xff] }
 0x32f   : > { %3194 = vmatprep.subr.bf16.mxu1 %v3193_v16  ;;  %v1468_v15 = vld [vmem:[%s4530_s22 + $0xb88] sm:$0xff]  ;;  %v1438_v16 = vld [vmem:[%s4530_s22 + $0xa98] sm:$0xff] }
 0x330   : > { %v3181_v23 = vpack.c.bf16 %v1468_v15, %v1436_v14  ;;  %v3213_v24 = vpack.c.bf16 %v1470_v19, %v1438_v16  ;;  %v1217_v14 = vld [vmem:[%s4530_s22 + $0x3b0] sm:$0xff]  ;;  %v1248_v15 = vld [vmem:[%s4530_s22 + $0x4a8] sm:$0xff]  ;;  %v1250_v19 = vld [vmem:[%s4530_s22 + $0x4b8] sm:$0xff] }
 0x331   : > { %v1280_v16 = vld [vmem:[%s4530_s22 + $0x5a8] sm:$0xff] }
 0x334   : > { %2096 = vmatmul.mubr.f32.vlgmr.msra.gmra.mrb[6].mxu0 %v1079_v28  ;;  %v1469_v28 = vld [vmem:[%s4530_s22 + $0xb90] sm:$0xff] }
 0x335   : > { %3164 = vmatpush1.bf16.xpose.msra.mxu0 %v3163_v29  ;;  %2166 = vmatmul.mubr.f32.vlgmr.msra.gmra.mrb[6].mxu1 %v1081_v30  ;;  %v1500_v29 = vld [vmem:[%s4530_s22 + $0xc88] sm:$0xff] }
 0x336   : > { %3196 = vmatpush1.bf16.xpose.msra.mxu1 %v3195_v31  ;;  %3166 = vmatprep.subr.bf16.mxu0 %v3165_v32  ;;  %v1532_v30 = vld [vmem:[%s4530_s22 + $0xd88] sm:$0xff]  ;;  %v1502_v31 = vld [vmem:[%s4530_s22 + $0xc98] sm:$0xff] }
 0x337   : > { %3198 = vmatprep.subr.bf16.mxu1 %v3197_v33  ;;  %2235 = vmatprep.mubr.f32.mxu0 %v1084_v8  ;;  %v1534_v32 = vld [vmem:[%s4530_s22 + $0xd98] sm:$0xff]  ;;  %v3183_v33 = vpack.c.bf16 %v1467_v26, %v1435_v25  ;;  %v3215_v8 = vpack.c.bf16 %v1469_v28, %v1437_v27  ;;  %v1247_v26 = vld [vmem:[%s4530_s22 + $0x4a0] sm:$0xff]  ;;  %v1249_v28 = vld [vmem:[%s4530_s22 + $0x4b0] sm:$0xff] }
 0x338   : > { %2305 = vmatprep.mubr.f32.mxu1 %v1086_v34  ;;  %v3185_v34 = vpack.c.bf16 %v1532_v30, %v1500_v29  ;;  %v3217_v35 = vpack.c.bf16 %v1534_v32, %v1502_v31  ;;  %v1279_v27 = vld [vmem:[%s4530_s22 + $0x5a0] sm:$0xff]  ;;  %v1281_v29 = vld [vmem:[%s4530_s22 + $0x5b0] sm:$0xff]  ;;  %v1312_v30 = vld [vmem:[%s4530_s22 + $0x6a8] sm:$0xff] }
 0x339   : > { %v1344_v31 = vld [vmem:[%s4530_s22 + $0x7a8] sm:$0xff]  ;;  %v1314_v32 = vld [vmem:[%s4530_s22 + $0x6b8] sm:$0xff] }
 0x33d   : > { %3168 = vmatpush1.bf16.xpose.msra.mxu0 %v3167_v9  ;;  %v1598_v9 = vld [vmem:[%s4530_s22 + $0xf98] sm:$0xff] }
 0x33e   : > { %3200 = vmatpush1.bf16.xpose.msra.mxu1 %v3199_v43  ;;  %3170 = vmatprep.subr.bf16.mxu0 %v3169_v44  ;;  %v3187_v43 = vpack.c.bf16 %v1531_v37, %v1499_v36  ;;  %v3219_v44 = vpack.c.bf16 %v1533_v39, %v1501_v38  ;;  %v3221_v46 = vpack.c.bf16 %v1598_v9, %v1566_v42  ;;  %v1311_v37 = vld [vmem:[%s4530_s22 + $0x6a0] sm:$0xff]  ;;  %v1313_v39 = vld [vmem:[%s4530_s22 + $0x6b0] sm:$0xff]  ;;  %v1376_v42 = vld [vmem:[%s4530_s22 + $0x8a8] sm:$0xff] }
 0x33f   : > { %3202 = vmatprep.subr.bf16.mxu1 %v3201_v45  ;;  %v3189_v45 = vpack.c.bf16 %v1596_v41, %v1564_v40  ;;  %v1343_v38 = vld [vmem:[%s4530_s22 + $0x7a0] sm:$0xff]  ;;  %v1345_v41 = vld [vmem:[%s4530_s22 + $0x7b0] sm:$0xff]  ;;  %v1408_v9 = vld [vmem:[%s4530_s22 + $0x9a8] sm:$0xff] }
 0x345   : > { %3172 = vmatpush1.bf16.xpose.msra.mxu0 %v3171_v52  ;;  %v1154_v52 = vld [vmem:[%s4530_s22 + $0x1b8] sm:$0xff] }
 0x346   : > { %3204 = vmatpush1.bf16.xpose.msra.mxu1 %v3203_v17  ;;  %3174 = vmatprep.subr.bf16.mxu0 %v3173_v53  ;;  %v3191_v17 = vpack.c.bf16 %v1595_v47, %v1563_v10  ;;  %v3223_v53 = vpack.c.bf16 %v1597_v49, %v1565_v48  ;;  %v3257_v55 = vpack.c.bf16 %v1154_v52, %v1122_v51  ;;  %v1410_v10 = vld [vmem:[%s4530_s22 + $0x9b8] sm:$0xff]  ;;  %v1407_v52 = vld [vmem:[%s4530_s22 + $0x9a0] sm:$0xff] }
 0x347   : > { %v1677_v57 = vpop.f32.mrb[0].mxu0  ;;  %3206 = vmatprep.subr.bf16.mxu1 %v3205_v54  ;;  %v3225_v54 = vpack.c.bf16 %v1152_v13, %v1120_v50  ;;  %v3239_v48 = vpack.c.bf16 %v1343_v38, %v1311_v37  ;;  %v3271_v50 = vpack.c.bf16 %v1345_v41, %v1313_v39  ;;  %v3241_v13 = vpack.c.bf16 %v1408_v9, %v1376_v42  ;;  %v1123_v39 = vld [vmem:[%s4530_s22 + $0xc0] sm:$0xff]  ;;  %v1125_v41 = vld [vmem:[%s4530_s22 + $0xd0] sm:$0xff]  ;;  %v1188_v9 = vld [vmem:[%s4530_s22 + $0x2c8] sm:$0xff] }
 0x348   : > { %v1679_v60 = vpop.f32.mrb[1].mxu0  ;;  %v1747_v61 = vpop.f32.mrb[0].mxu1  ;;  %v1157_v42 = vld [vmem:[%s4530_s22 + $0x1d0] sm:$0xff] }
 0x349   : > { %v4905_v0 = vadd.f32 %v1747_v61, %v1677_v57  ;;  %v1749_v1 = vpop.f32.mrb[1].mxu1  ;;  %v1121_v57 = vld [vmem:[%s4530_s22 + $0xb0] sm:$0xff]  ;;  %v1186_v60 = vld [vmem:[%s4530_s22 + $0x2b8] sm:$0xff] }
 0x34a   : > { %v1218_v61 = vld [vmem:[%s4530_s22 + $0x3b8] sm:$0xff]  ;;  %v1085_v1 = vld [vmem:[%s4528_s30 + $0x90] sm:$0xff] }
 0x34d   : > { %3176 = vmatpush1.bf16.xpose.msra.mxu0 %v3175_v2  ;;  %v3259_v2 = vpack.c.bf16 %v1153_v20, %v1121_v57 }
 0x34e   : > { %3208 = vmatpush1.bf16.xpose.msra.mxu1 %v3207_v3  ;;  %3178 = vmatprep.subr.bf16.mxu0 %v3177_v4  ;;  %v3229_v3 = vpack.c.bf16 %v1216_v59, %v1184_v58  ;;  %v3261_v4 = vpack.c.bf16 %v1218_v61, %v1186_v60  ;;  %v3277_v59 = vpack.c.bf16 %v1474_v56, %v1442_v18  ;;  %v1439_v60 = vld [vmem:[%s4530_s22 + $0xaa0] sm:$0xff]  ;;  %v1284_v18 = vld [vmem:[%s4530_s22 + $0x5c8] sm:$0xff]  ;;  %v1254_v56 = vld [vmem:[%s4530_s22 + $0x4d8] sm:$0xff] }
 0x34f   : > { %3210 = vmatprep.subr.bf16.mxu1 %v3209_v5  ;;  %v1088_v5 = vld [vmem:[%s4528_s30 + $0xa8] sm:$0xff]  ;;  %v1471_v61 = vld [vmem:[%s4530_s22 + $0xba0] sm:$0xff] }
 0x355   : > { %3180 = vmatpush1.bf16.xpose.msra.mxu0 %v3179_v21  ;;  %v1282_v21 = vld [vmem:[%s4530_s22 + $0x5b8] sm:$0xff] }
 0x356   : > { %3212 = vmatpush1.bf16.xpose.msra.mxu1 %v3211_v22  ;;  %3182 = vmatprep.subr.bf16.mxu0 %v3181_v23  ;;  %v3231_v22 = vpack.c.bf16 %v1215_v11, %v1183_v7  ;;  %v3263_v23 = vpack.c.bf16 %v1217_v14, %v1185_v12  ;;  %v3265_v25 = vpack.c.bf16 %v1282_v21, %v1250_v19  ;;  %v1503_v12 = vld [vmem:[%s4530_s22 + $0xca0] sm:$0xff]  ;;  %v1568_v19 = vld [vmem:[%s4530_s22 + $0xea8] sm:$0xff] }
 0x357   : > { %3214 = vmatprep.subr.bf16.mxu1 %v3213_v24  ;;  %v3233_v24 = vpack.c.bf16 %v1280_v16, %v1248_v15  ;;  %v1535_v14 = vld [vmem:[%s4530_s22 + $0xda0] sm:$0xff]  ;;  %v1505_v15 = vld [vmem:[%s4530_s22 + $0xcb0] sm:$0xff]  ;;  %v1600_v21 = vld [vmem:[%s4530_s22 + $0xfa8] sm:$0xff] }
 0x358   : > { %v1537_v16 = vld [vmem:[%s4530_s22 + $0xdb0] sm:$0xff] }
 0x35d   : > { %3184 = vmatpush1.bf16.xpose.msra.mxu0 %v3183_v33  ;;  %v1346_v33 = vld [vmem:[%s4530_s22 + $0x7b8] sm:$0xff] }
 0x35e   : > { %3216 = vmatpush1.bf16.xpose.msra.mxu1 %v3215_v8  ;;  %3186 = vmatprep.subr.bf16.mxu0 %v3185_v34  ;;  %v3235_v8 = vpack.c.bf16 %v1279_v27, %v1247_v26  ;;  %v3267_v34 = vpack.c.bf16 %v1281_v29, %v1249_v28  ;;  %v3269_v36 = vpack.c.bf16 %v1346_v33, %v1314_v32  ;;  %v1567_v28 = vld [vmem:[%s4530_s22 + $0xea0] sm:$0xff]  ;;  %v1124_v32 = vld [vmem:[%s4530_s22 + $0xc8] sm:$0xff] }
 0x35f   : > { %3218 = vmatprep.subr.bf16.mxu1 %v3217_v35  ;;  %v3237_v35 = vpack.c.bf16 %v1344_v31, %v1312_v30  ;;  %v3253_v26 = vpack.c.bf16 %v1600_v21, %v1568_v19  ;;  %v1599_v29 = vld [vmem:[%s4530_s22 + $0xfa0] sm:$0xff]  ;;  %v1569_v30 = vld [vmem:[%s4530_s22 + $0xeb0] sm:$0xff]  ;;  %v1156_v33 = vld [vmem:[%s4530_s22 + $0x1c8] sm:$0xff] }
 0x360   : > { %v1601_v31 = vld [vmem:[%s4530_s22 + $0xfb0] sm:$0xff]  ;;  %v3289_v37 = vpack.c.bf16 %v1156_v33, %v1124_v32 }
 0x361   : > { %v1349_v21 = vld [vmem:[%s4530_s22 + $0x7d0] sm:$0xff] }
 0x365   : > { %3188 = vmatpush1.bf16.xpose.msra.mxu0 %v3187_v43 }
 0x366   : > { %3220 = vmatpush1.bf16.xpose.msra.mxu1 %v3219_v44  ;;  %3190 = vmatprep.subr.bf16.mxu0 %v3189_v45 }
 0x367   : > { %3222 = vmatprep.subr.bf16.mxu1 %v3221_v46  ;;  %v1378_v46 = vld [vmem:[%s4530_s22 + $0x8b8] sm:$0xff] }
 0x368   : > { %v3273_v51 = vpack.c.bf16 %v1410_v10, %v1378_v46  ;;  %v1087_v46 = vld [vmem:[%s4528_s30 + $0xa0] sm:$0xff] }
 0x36d   : > { %3192 = vmatpush1.bf16.xpose.msra.mxu0 %v3191_v17  ;;  %v1377_v17 = vld [vmem:[%s4530_s22 + $0x8b0] sm:$0xff] }
 0x36e   : > { %3224 = vmatpush1.bf16.xpose.msra.mxu1 %v3223_v53  ;;  %3226 = vmatprep.subr.bf16.mxu0 %v3225_v54  ;;  %v1409_v53 = vld [vmem:[%s4530_s22 + $0x9b0] sm:$0xff]  ;;  %v1440_v54 = vld [vmem:[%s4530_s22 + $0xaa8] sm:$0xff] }
 0x36f   : > { %3258 = vmatprep.subr.bf16.mxu1 %v3257_v55  ;;  %v1472_v55 = vld [vmem:[%s4530_s22 + $0xba8] sm:$0xff]  ;;  %v3275_v20 = vpack.c.bf16 %v1409_v53, %v1377_v17  ;;  %v1219_v17 = vld [vmem:[%s4530_s22 + $0x3c0] sm:$0xff]  ;;  %v1189_v53 = vld [vmem:[%s4530_s22 + $0x2d0] sm:$0xff] }
 0x370   : > { %v3245_v58 = vpack.c.bf16 %v1472_v55, %v1440_v54  ;;  %v1221_v54 = vld [vmem:[%s4530_s22 + $0x3d0] sm:$0xff]  ;;  %v1252_v55 = vld [vmem:[%s4530_s22 + $0x4c8] sm:$0xff] }
 0x374   : > { %2236 = vmatmul.mubr.f32.vlgmr.msra.gmra.mrb[8].mxu0 %v1083_v62  ;;  %v1441_v62 = vld [vmem:[%s4530_s22 + $0xab0] sm:$0xff] }
 0x375   : > { %3228 = vmatpush1.bf16.xpose.msra.mxu0 %v3227_v63  ;;  %2306 = vmatmul.mubr.f32.vlgmr.msra.gmra.mrb[8].mxu1 %v1085_v1  ;;  %v1473_v63 = vld [vmem:[%s4530_s22 + $0xbb0] sm:$0xff]  ;;  %v1504_v1 = vld [vmem:[%s4530_s22 + $0xca8] sm:$0xff] }
 0x376   : > { %3260 = vmatpush1.bf16.xpose.msra.mxu1 %v3259_v2  ;;  %3230 = vmatprep.subr.bf16.mxu0 %v3229_v3  ;;  %v1536_v2 = vld [vmem:[%s4530_s22 + $0xda8] sm:$0xff]  ;;  %v1506_v3 = vld [vmem:[%s4530_s22 + $0xcb8] sm:$0xff] }
 0x377   : > { %3262 = vmatprep.subr.bf16.mxu1 %v3261_v4  ;;  %2375 = vmatprep.mubr.f32.mxu0 %v1088_v5  ;;  %v1538_v4 = vld [vmem:[%s4530_s22 + $0xdb8] sm:$0xff]  ;;  %v3247_v5 = vpack.c.bf16 %v1471_v61, %v1439_v60  ;;  %v3249_v7 = vpack.c.bf16 %v1536_v2, %v1504_v1  ;;  %v1251_v61 = vld [vmem:[%s4530_s22 + $0x4c0] sm:$0xff]  ;;  %v1285_v1 = vld [vmem:[%s4530_s22 + $0x5d0] sm:$0xff] }
 0x378   : > { %2445 = vmatprep.mubr.f32.mxu1 %v1090_v6  ;;  %v3279_v6 = vpack.c.bf16 %v1473_v63, %v1441_v62  ;;  %v3281_v11 = vpack.c.bf16 %v1538_v4, %v1506_v3  ;;  %v1283_v62 = vld [vmem:[%s4530_s22 + $0x5c0] sm:$0xff]  ;;  %v1253_v63 = vld [vmem:[%s4530_s22 + $0x4d0] sm:$0xff]  ;;  %v1316_v2 = vld [vmem:[%s4530_s22 + $0x6c8] sm:$0xff] }
 0x379   : > { %v1348_v3 = vld [vmem:[%s4530_s22 + $0x7c8] sm:$0xff]  ;;  %v1318_v4 = vld [vmem:[%s4530_s22 + $0x6d8] sm:$0xff] }
 0x37d   : > { %3232 = vmatpush1.bf16.xpose.msra.mxu0 %v3231_v22  ;;  %v1570_v22 = vld [vmem:[%s4530_s22 + $0xeb8] sm:$0xff] }
 0x37e   : > { %3264 = vmatpush1.bf16.xpose.msra.mxu1 %v3263_v23  ;;  %3234 = vmatprep.subr.bf16.mxu0 %v3233_v24  ;;  %v1602_v23 = vld [vmem:[%s4530_s22 + $0xfb8] sm:$0xff]  ;;  %v3251_v24 = vpack.c.bf16 %v1535_v14, %v1503_v12  ;;  %v1315_v14 = vld [vmem:[%s4530_s22 + $0x6c0] sm:$0xff] }
 0x37f   : > { %3266 = vmatprep.subr.bf16.mxu1 %v3265_v25  ;;  %v3283_v25 = vpack.c.bf16 %v1537_v16, %v1505_v15  ;;  %v3285_v27 = vpack.c.bf16 %v1602_v23, %v1570_v22  ;;  %v1347_v15 = vld [vmem:[%s4530_s22 + $0x7c0] sm:$0xff]  ;;  %v1317_v16 = vld [vmem:[%s4530_s22 + $0x6d0] sm:$0xff]  ;;  %v1380_v22 = vld [vmem:[%s4530_s22 + $0x8c8] sm:$0xff] }
 0x380   : > { %v1412_v23 = vld [vmem:[%s4530_s22 + $0x9c8] sm:$0xff]  ;;  %v3335_v32 = vpack.c.bf16 %v1349_v21, %v1317_v16  ;;  %v1127_v16 = vld [vmem:[%s4530_s22 + $0xe0] sm:$0xff]  ;;  %v1129_v21 = vld [vmem:[%s4530_s22 + $0xf0] sm:$0xff] }
 0x381   : > { %v3305_v33 = vpack.c.bf16 %v1412_v23, %v1380_v22  ;;  %v1161_v22 = vld [vmem:[%s4530_s22 + $0x1f0] sm:$0xff]  ;;  %v1192_v23 = vld [vmem:[%s4530_s22 + $0x2e8] sm:$0xff] }
 0x385   : > { %3236 = vmatpush1.bf16.xpose.msra.mxu0 %v3235_v8  ;;  %v1126_v8 = vld [vmem:[%s4530_s22 + $0xd8] sm:$0xff] }
 0x386   : > { %3268 = vmatpush1.bf16.xpose.msra.mxu1 %v3267_v34  ;;  %3238 = vmatprep.subr.bf16.mxu0 %v3237_v35  ;;  %v1158_v34 = vld [vmem:[%s4530_s22 + $0x1d8] sm:$0xff]  ;;  %v3255_v35 = vpack.c.bf16 %v1599_v29, %v1567_v28 }
 0x387   : > { %v1817_v40 = vpop.f32.mrb[2].mxu0  ;;  %3270 = vmatprep.subr.bf16.mxu1 %v3269_v36  ;;  %v3287_v36 = vpack.c.bf16 %v1601_v31, %v1569_v30  ;;  %v3321_v38 = vpack.c.bf16 %v1158_v34, %v1126_v8  ;;  %v1414_v28 = vld [vmem:[%s4530_s22 + $0x9d8] sm:$0xff]  ;;  %v3303_v30 = vpack.c.bf16 %v1347_v15, %v1315_v14  ;;  %v1411_v34 = vld [vmem:[%s4530_s22 + $0x9c0] sm:$0xff] }
 0x388   : > { %v1818_v43 = vadd.f32 %v1817_v40, %v4905_v0  ;;  %v1819_v44 = vpop.f32.mrb[3].mxu0  ;;  %v1887_v45 = vpop.f32.mrb[2].mxu1  ;;  %v1375_v0 = vld [vmem:[%s4530_s22 + $0x8a0] sm:$0xff] }
 0x389   : > { %v1889_v47 = vpop.f32.mrb[3].mxu1  ;;  %v3243_v57 = vpack.c.bf16 %v1407_v52, %v1375_v0  ;;  %v1155_v40 = vld [vmem:[%s4530_s22 + $0x1c0] sm:$0xff]  ;;  %v1190_v44 = vld [vmem:[%s4530_s22 + $0x2d8] sm:$0xff] }
 0x38a   : > { %v4976_v49 = vadd.f32 %v1887_v45, %v1818_v43  ;;  %v1220_v43 = vld [vmem:[%s4530_s22 + $0x3c8] sm:$0xff]  ;;  %v1222_v45 = vld [vmem:[%s4530_s22 + $0x3d8] sm:$0xff]  ;;  %v3291_v10 = vpack.c.bf16 %v1155_v40, %v1123_v39  ;;  %v1089_v47 = vld [vmem:[%s4528_s30 + $0xb0] sm:$0xff] }
 0x38b   : > { %v1094_v0 = vld [vmem:[%s4528_s30 + $0xd8] sm:$0xff]  ;;  %v1187_v52 = vld [vmem:[%s4530_s22 + $0x2c0] sm:$0xff] }
 0x38c   : > { %v1446_v39 = vld [vmem:[%s4530_s22 + $0xad8] sm:$0xff] }
 0x38d   : > { %3240 = vmatpush1.bf16.xpose.msra.mxu0 %v3239_v48  ;;  %v3323_v48 = vpack.c.bf16 %v1157_v42, %v1125_v41  ;;  %v1478_v40 = vld [vmem:[%s4530_s22 + $0xbd8] sm:$0xff] }
 0x38e   : > { %3272 = vmatpush1.bf16.xpose.msra.mxu1 %v3271_v50  ;;  %3242 = vmatprep.subr.bf16.mxu0 %v3241_v13  ;;  %v3293_v50 = vpack.c.bf16 %v1220_v43, %v1188_v9  ;;  %v3325_v13 = vpack.c.bf16 %v1222_v45, %v1190_v44  ;;  %v3341_v43 = vpack.c.bf16 %v1478_v40, %v1446_v39  ;;  %v1443_v44 = vld [vmem:[%s4530_s22 + $0xac0] sm:$0xff]  ;;  %v1288_v39 = vld [vmem:[%s4530_s22 + $0x5e8] sm:$0xff]  ;;  %v1258_v40 = vld [vmem:[%s4530_s22 + $0x4f8] sm:$0xff] }
 0x38f   : > { %3274 = vmatprep.subr.bf16.mxu1 %v3273_v51  ;;  %v1092_v51 = vld [vmem:[%s4528_s30 + $0xc8] sm:$0xff]  ;;  %v1475_v45 = vld [vmem:[%s4530_s22 + $0xbc0] sm:$0xff] }
 0x395   : > { %3244 = vmatpush1.bf16.xpose.msra.mxu0 %v3243_v57  ;;  %v1286_v57 = vld [vmem:[%s4530_s22 + $0x5d8] sm:$0xff] }
 0x396   : > { %3276 = vmatpush1.bf16.xpose.msra.mxu1 %v3275_v20  ;;  %3246 = vmatprep.subr.bf16.mxu0 %v3245_v58  ;;  %v3295_v20 = vpack.c.bf16 %v1219_v17, %v1187_v52  ;;  %v3327_v58 = vpack.c.bf16 %v1221_v54, %v1189_v53  ;;  %v3329_v60 = vpack.c.bf16 %v1286_v57, %v1254_v56  ;;  %v1507_v53 = vld [vmem:[%s4530_s22 + $0xcc0] sm:$0xff]  ;;  %v1572_v56 = vld [vmem:[%s4530_s22 + $0xec8] sm:$0xff] }
 0x397   : > { %3278 = vmatprep.subr.bf16.mxu1 %v3277_v59  ;;  %v3297_v59 = vpack.c.bf16 %v1284_v18, %v1252_v55  ;;  %v1539_v54 = vld [vmem:[%s4530_s22 + $0xdc0] sm:$0xff]  ;;  %v1509_v55 = vld [vmem:[%s4530_s22 + $0xcd0] sm:$0xff]  ;;  %v1604_v57 = vld [vmem:[%s4530_s22 + $0xfc8] sm:$0xff] }
 0x398   : > { %v1541_v18 = vld [vmem:[%s4530_s22 + $0xdd0] sm:$0xff] }
 0x39d   : > { %3248 = vmatpush1.bf16.xpose.msra.mxu0 %v3247_v5  ;;  %v1350_v5 = vld [vmem:[%s4530_s22 + $0x7d8] sm:$0xff] }
 0x39e   : > { %3280 = vmatpush1.bf16.xpose.msra.mxu1 %v3279_v6  ;;  %3250 = vmatprep.subr.bf16.mxu0 %v3249_v7  ;;  %v3299_v6 = vpack.c.bf16 %v1283_v62, %v1251_v61  ;;  %v3331_v7 = vpack.c.bf16 %v1285_v1, %v1253_v63  ;;  %v3333_v12 = vpack.c.bf16 %v1350_v5, %v1318_v4  ;;  %v1571_v63 = vld [vmem:[%s4530_s22 + $0xec0] sm:$0xff]  ;;  %v1128_v4 = vld [vmem:[%s4530_s22 + $0xe8] sm:$0xff] }
 0x39f   : > { %3282 = vmatprep.subr.bf16.mxu1 %v3281_v11  ;;  %v3301_v11 = vpack.c.bf16 %v1348_v3, %v1316_v2  ;;  %v3317_v61 = vpack.c.bf16 %v1604_v57, %v1572_v56  ;;  %v1603_v1 = vld [vmem:[%s4530_s22 + $0xfc0] sm:$0xff]  ;;  %v1573_v2 = vld [vmem:[%s4530_s22 + $0xed0] sm:$0xff]  ;;  %v1160_v5 = vld [vmem:[%s4530_s22 + $0x1e8] sm:$0xff] }
 0x3a0   : > { %v1605_v3 = vld [vmem:[%s4530_s22 + $0xfd0] sm:$0xff]  ;;  %v3353_v14 = vpack.c.bf16 %v1160_v5, %v1128_v4 }
 0x3a1   : > { %v1353_v57 = vld [vmem:[%s4530_s22 + $0x7f0] sm:$0xff] }
 0x3a5   : > { %3252 = vmatpush1.bf16.xpose.msra.mxu0 %v3251_v24 }
 0x3a6   : > { %3284 = vmatpush1.bf16.xpose.msra.mxu1 %v3283_v25  ;;  %3254 = vmatprep.subr.bf16.mxu0 %v3253_v26 }
 0x3a7   : > { %3286 = vmatprep.subr.bf16.mxu1 %v3285_v27  ;;  %v1382_v27 = vld [vmem:[%s4530_s22 + $0x8d8] sm:$0xff] }
 0x3a8   : > { %v3337_v8 = vpack.c.bf16 %v1414_v28, %v1382_v27  ;;  %v1091_v27 = vld [vmem:[%s4528_s30 + $0xc0] sm:$0xff] }
 0x3ad   : > { %3256 = vmatpush1.bf16.xpose.msra.mxu0 %v3255_v35  ;;  %v1381_v35 = vld [vmem:[%s4530_s22 + $0x8d0] sm:$0xff] }
 0x3ae   : > { %3288 = vmatpush1.bf16.xpose.msra.mxu1 %v3287_v36  ;;  %3290 = vmatprep.subr.bf16.mxu0 %v3289_v37  ;;  %v1413_v36 = vld [vmem:[%s4530_s22 + $0x9d0] sm:$0xff]  ;;  %v1444_v37 = vld [vmem:[%s4530_s22 + $0xac8] sm:$0xff] }
 0x3af   : > { %3322 = vmatprep.subr.bf16.mxu1 %v3321_v38  ;;  %v1476_v38 = vld [vmem:[%s4530_s22 + $0xbc8] sm:$0xff]  ;;  %v3339_v42 = vpack.c.bf16 %v1413_v36, %v1381_v35  ;;  %v1223_v35 = vld [vmem:[%s4530_s22 + $0x3e0] sm:$0xff]  ;;  %v1193_v36 = vld [vmem:[%s4530_s22 + $0x2f0] sm:$0xff] }
 0x3b0   : > { %v3309_v9 = vpack.c.bf16 %v1476_v38, %v1444_v37  ;;  %v1225_v37 = vld [vmem:[%s4530_s22 + $0x3f0] sm:$0xff]  ;;  %v1256_v38 = vld [vmem:[%s4530_s22 + $0x4e8] sm:$0xff] }
 0x3b4   : > { %2376 = vmatmul.mubr.f32.vlgmr.msra.gmra.mrb[10].mxu0 %v1087_v46  ;;  %v1445_v46 = vld [vmem:[%s4530_s22 + $0xad0] sm:$0xff] }
 0x3b5   : > { %3292 = vmatpush1.bf16.xpose.msra.mxu0 %v3291_v10  ;;  %2446 = vmatmul.mubr.f32.vlgmr.msra.gmra.mrb[10].mxu1 %v1089_v47  ;;  %v1477_v10 = vld [vmem:[%s4530_s22 + $0xbd0] sm:$0xff]  ;;  %v1508_v47 = vld [vmem:[%s4530_s22 + $0xcc8] sm:$0xff] }
 0x3b6   : > { %3324 = vmatpush1.bf16.xpose.msra.mxu1 %v3323_v48  ;;  %3294 = vmatprep.subr.bf16.mxu0 %v3293_v50  ;;  %v1540_v48 = vld [vmem:[%s4530_s22 + $0xdc8] sm:$0xff]  ;;  %v1510_v50 = vld [vmem:[%s4530_s22 + $0xcd8] sm:$0xff] }
 0x3b7   : > { %3326 = vmatprep.subr.bf16.mxu1 %v3325_v13  ;;  %2515 = vmatprep.mubr.f32.mxu0 %v1092_v51  ;;  %v1542_v13 = vld [vmem:[%s4530_s22 + $0xdd8] sm:$0xff]  ;;  %v3311_v51 = vpack.c.bf16 %v1475_v45, %v1443_v44  ;;  %v3313_v52 = vpack.c.bf16 %v1540_v48, %v1508_v47  ;;  %v1255_v45 = vld [vmem:[%s4530_s22 + $0x4e0] sm:$0xff]  ;;  %v1289_v47 = vld [vmem:[%s4530_s22 + $0x5f0] sm:$0xff] }
 0x3b8   : > { %2585 = vmatprep.mubr.f32.mxu1 %v1094_v0  ;;  %v3343_v0 = vpack.c.bf16 %v1477_v10, %v1445_v46  ;;  %v3345_v17 = vpack.c.bf16 %v1542_v13, %v1510_v50  ;;  %v1287_v46 = vld [vmem:[%s4530_s22 + $0x5e0] sm:$0xff]  ;;  %v1257_v10 = vld [vmem:[%s4530_s22 + $0x4f0] sm:$0xff]  ;;  %v1320_v48 = vld [vmem:[%s4530_s22 + $0x6e8] sm:$0xff] }
 0x3b9   : > { %v1352_v50 = vld [vmem:[%s4530_s22 + $0x7e8] sm:$0xff]  ;;  %v1322_v13 = vld [vmem:[%s4530_s22 + $0x6f8] sm:$0xff] }
 0x3bd   : > { %3296 = vmatpush1.bf16.xpose.msra.mxu0 %v3295_v20  ;;  %v1574_v20 = vld [vmem:[%s4530_s22 + $0xed8] sm:$0xff] }
 0x3be   : > { %3328 = vmatpush1.bf16.xpose.msra.mxu1 %v3327_v58  ;;  %3298 = vmatprep.subr.bf16.mxu0 %v3297_v59  ;;  %v1606_v58 = vld [vmem:[%s4530_s22 + $0xfd8] sm:$0xff]  ;;  %v3315_v59 = vpack.c.bf16 %v1539_v54, %v1507_v53  ;;  %v1319_v54 = vld [vmem:[%s4530_s22 + $0x6e0] sm:$0xff] }
 0x3bf   : > { %3330 = vmatprep.subr.bf16.mxu1 %v3329_v60  ;;  %v3347_v60 = vpack.c.bf16 %v1541_v18, %v1509_v55  ;;  %v3349_v62 = vpack.c.bf16 %v1606_v58, %v1574_v20  ;;  %v1351_v55 = vld [vmem:[%s4530_s22 + $0x7e0] sm:$0xff]  ;;  %v1321_v18 = vld [vmem:[%s4530_s22 + $0x6f0] sm:$0xff]  ;;  %v1384_v20 = vld [vmem:[%s4530_s22 + $0x8e8] sm:$0xff] }
 0x3c0   : > { %v1416_v58 = vld [vmem:[%s4530_s22 + $0x9e8] sm:$0xff]  ;;  %v3399_v4 = vpack.c.bf16 %v1353_v57, %v1321_v18 }
 0x3c1   : > { %v3369_v5 = vpack.c.bf16 %v1416_v58, %v1384_v20 }
 0x3c5   : > { %3300 = vmatpush1.bf16.xpose.msra.mxu0 %v3299_v6  ;;  %v1130_v6 = vld [vmem:[%s4530_s22 + $0xf8] sm:$0xff] }
 0x3c6   : > { %3332 = vmatpush1.bf16.xpose.msra.mxu1 %v3331_v7  ;;  %3302 = vmatprep.subr.bf16.mxu0 %v3301_v11  ;;  %v1162_v7 = vld [vmem:[%s4530_s22 + $0x1f8] sm:$0xff]  ;;  %v3319_v11 = vpack.c.bf16 %v1603_v1, %v1571_v63 }
 0x3c7   : > { %v1957_v19 = vpop.f32.mrb[4].mxu0  ;;  %3334 = vmatprep.subr.bf16.mxu1 %v3333_v12  ;;  %v3351_v12 = vpack.c.bf16 %v1605_v3, %v1573_v2  ;;  %v3385_v15 = vpack.c.bf16 %v1162_v7, %v1130_v6  ;;  %v1418_v63 = vld [vmem:[%s4530_s22 + $0x9f8] sm:$0xff]  ;;  %v3367_v2 = vpack.c.bf16 %v1351_v55, %v1319_v54  ;;  %v1415_v7 = vld [vmem:[%s4530_s22 + $0x9e0] sm:$0xff] }
 0x3c8   : > { %v1958_v24 = vadd.f32 %v1957_v19, %v4976_v49  ;;  %v1959_v25 = vpop.f32.mrb[5].mxu0  ;;  %v2027_v26 = vpop.f32.mrb[4].mxu1  ;;  %v1379_v49 = vld [vmem:[%s4530_s22 + $0x8c0] sm:$0xff] }
 0x3c9   : > { %v2029_v29 = vpop.f32.mrb[5].mxu1  ;;  %v3307_v41 = vpack.c.bf16 %v1411_v34, %v1379_v49  ;;  %v1159_v19 = vld [vmem:[%s4530_s22 + $0x1e0] sm:$0xff]  ;;  %v1194_v25 = vld [vmem:[%s4530_s22 + $0x2f8] sm:$0xff] }
 0x3ca   : > { %v5047_v31 = vadd.f32 %v2027_v26, %v1958_v24  ;;  %v1224_v24 = vld [vmem:[%s4530_s22 + $0x3e8] sm:$0xff]  ;;  %v1226_v26 = vld [vmem:[%s4530_s22 + $0x3f8] sm:$0xff]  ;;  %v3355_v28 = vpack.c.bf16 %v1159_v19, %v1127_v16  ;;  %v1093_v29 = vld [vmem:[%s4528_s30 + $0xd0] sm:$0xff] }
 0x3cb   : > { %v1098_v49 = vld [vmem:[%s4528_s30 + $0xf8] sm:$0xff]  ;;  %v1191_v34 = vld [vmem:[%s4530_s22 + $0x2e0] sm:$0xff] }
 0x3cc   : > { %v1450_v16 = vld [vmem:[%s4530_s22 + $0xaf8] sm:$0xff] }
 0x3cd   : > { %3304 = vmatpush1.bf16.xpose.msra.mxu0 %v3303_v30  ;;  %v3387_v30 = vpack.c.bf16 %v1161_v22, %v1129_v21  ;;  %v1482_v19 = vld [vmem:[%s4530_s22 + $0xbf8] sm:$0xff] }
 0x3ce   : > { %3336 = vmatpush1.bf16.xpose.msra.mxu1 %v3335_v32  ;;  %3306 = vmatprep.subr.bf16.mxu0 %v3305_v33  ;;  %v3357_v32 = vpack.c.bf16 %v1224_v24, %v1192_v23  ;;  %v3389_v33 = vpack.c.bf16 %v1226_v26, %v1194_v25  ;;  %v3405_v24 = vpack.c.bf16 %v1482_v19, %v1450_v16  ;;  %v1447_v25 = vld [vmem:[%s4530_s22 + $0xae0] sm:$0xff] }
 0x3cf   : > { %3338 = vmatprep.subr.bf16.mxu1 %v3337_v8  ;;  %v1096_v8 = vld [vmem:[%s4528_s30 + $0xe8] sm:$0xff]  ;;  %v1479_v26 = vld [vmem:[%s4530_s22 + $0xbe0] sm:$0xff] }
 0x3d5   : > { %3308 = vmatpush1.bf16.xpose.msra.mxu0 %v3307_v41  ;;  %v1290_v41 = vld [vmem:[%s4530_s22 + $0x5f8] sm:$0xff] }
 0x3d6   : > { %3340 = vmatpush1.bf16.xpose.msra.mxu1 %v3339_v42  ;;  %3310 = vmatprep.subr.bf16.mxu0 %v3309_v9  ;;  %v3359_v42 = vpack.c.bf16 %v1223_v35, %v1191_v34  ;;  %v3391_v9 = vpack.c.bf16 %v1225_v37, %v1193_v36  ;;  %v3393_v44 = vpack.c.bf16 %v1290_v41, %v1258_v40  ;;  %v1511_v36 = vld [vmem:[%s4530_s22 + $0xce0] sm:$0xff]  ;;  %v1576_v40 = vld [vmem:[%s4530_s22 + $0xee8] sm:$0xff] }
 0x3d7   : > { %3342 = vmatprep.subr.bf16.mxu1 %v3341_v43  ;;  %v3361_v43 = vpack.c.bf16 %v1288_v39, %v1256_v38  ;;  %v1543_v37 = vld [vmem:[%s4530_s22 + $0xde0] sm:$0xff]  ;;  %v1513_v38 = vld [vmem:[%s4530_s22 + $0xcf0] sm:$0xff]  ;;  %v1608_v41 = vld [vmem:[%s4530_s22 + $0xfe8] sm:$0xff] }
 0x3d8   : > { %v1545_v39 = vld [vmem:[%s4530_s22 + $0xdf0] sm:$0xff] }
 0x3dd   : > { %3312 = vmatpush1.bf16.xpose.msra.mxu0 %v3311_v51  ;;  %v1354_v51 = vld [vmem:[%s4530_s22 + $0x7f8] sm:$0xff] }
 0x3de   : > { %3344 = vmatpush1.bf16.xpose.msra.mxu1 %v3343_v0  ;;  %3314 = vmatprep.subr.bf16.mxu0 %v3313_v52  ;;  %v3363_v0 = vpack.c.bf16 %v1287_v46, %v1255_v45  ;;  %v3395_v52 = vpack.c.bf16 %v1289_v47, %v1257_v10  ;;  %v3397_v53 = vpack.c.bf16 %v1354_v51, %v1322_v13  ;;  %v1575_v10 = vld [vmem:[%s4530_s22 + $0xee0] sm:$0xff] }
 0x3df   : > { %3346 = vmatprep.subr.bf16.mxu1 %v3345_v17  ;;  %v3365_v17 = vpack.c.bf16 %v1352_v50, %v1320_v48  ;;  %v3381_v45 = vpack.c.bf16 %v1608_v41, %v1576_v40  ;;  %v1607_v47 = vld [vmem:[%s4530_s22 + $0xfe0] sm:$0xff]  ;;  %v1577_v48 = vld [vmem:[%s4530_s22 + $0xef0] sm:$0xff] }
 0x3e0   : > { %v1609_v50 = vld [vmem:[%s4530_s22 + $0xff0] sm:$0xff]  ;;  %v3383_v13 = vpack.c.bf16 %v1607_v47, %v1575_v10 }
 0x3e1   : > { %v3415_v51 = vpack.c.bf16 %v1609_v50, %v1577_v48 }
 0x3e5   : > { %3316 = vmatpush1.bf16.xpose.msra.mxu0 %v3315_v59 }
 0x3e6   : > { %3348 = vmatpush1.bf16.xpose.msra.mxu1 %v3347_v60  ;;  %3318 = vmatprep.subr.bf16.mxu0 %v3317_v61 }
 0x3e7   : > { %3350 = vmatprep.subr.bf16.mxu1 %v3349_v62  ;;  %v1386_v62 = vld [vmem:[%s4530_s22 + $0x8f8] sm:$0xff] }
 0x3e8   : > { %v3401_v6 = vpack.c.bf16 %v1418_v63, %v1386_v62 }
 0x3ed   : > { %3320 = vmatpush1.bf16.xpose.msra.mxu0 %v3319_v11  ;;  %v1385_v11 = vld [vmem:[%s4530_s22 + $0x8f0] sm:$0xff] }
 0x3ee   : > { %3352 = vmatpush1.bf16.xpose.msra.mxu1 %v3351_v12  ;;  %3354 = vmatprep.subr.bf16.mxu0 %v3353_v14  ;;  %v1417_v12 = vld [vmem:[%s4530_s22 + $0x9f0] sm:$0xff]  ;;  %v1448_v14 = vld [vmem:[%s4530_s22 + $0xae8] sm:$0xff] }
 0x3ef   : > { %3386 = vmatprep.subr.bf16.mxu1 %v3385_v15  ;;  %v1480_v15 = vld [vmem:[%s4530_s22 + $0xbe8] sm:$0xff]  ;;  %v3403_v22 = vpack.c.bf16 %v1417_v12, %v1385_v11  ;;  %v1066_v11 = vld [vmem:[%s5174_s7] sm:$0xff] }
 0x3f0   : > { %v3373_v23 = vpack.c.bf16 %v1480_v15, %v1448_v14 }
 0x3f4   : > { %2516 = vmatmul.mubr.f32.vlgmr.msra.gmra.mrb[12].mxu0 %v1091_v27  ;;  %v1449_v27 = vld [vmem:[%s4530_s22 + $0xaf0] sm:$0xff] }
 0x3f5   : > { %3356 = vmatpush1.bf16.xpose.msra.mxu0 %v3355_v28  ;;  %2586 = vmatmul.mubr.f32.vlgmr.msra.gmra.mrb[12].mxu1 %v1093_v29  ;;  %v1481_v28 = vld [vmem:[%s4530_s22 + $0xbf0] sm:$0xff]  ;;  %v1512_v29 = vld [vmem:[%s4530_s22 + $0xce8] sm:$0xff] }
 0x3f6   : > { %3388 = vmatpush1.bf16.xpose.msra.mxu1 %v3387_v30  ;;  %3358 = vmatprep.subr.bf16.mxu0 %v3357_v32  ;;  %v1544_v30 = vld [vmem:[%s4530_s22 + $0xde8] sm:$0xff]  ;;  %v1514_v32 = vld [vmem:[%s4530_s22 + $0xcf8] sm:$0xff] }
 0x3f7   : > { %3390 = vmatprep.subr.bf16.mxu1 %v3389_v33  ;;  %2655 = vmatprep.mubr.f32.mxu0 %v1096_v8  ;;  %v1546_v33 = vld [vmem:[%s4530_s22 + $0xdf8] sm:$0xff]  ;;  %v3375_v8 = vpack.c.bf16 %v1479_v26, %v1447_v25  ;;  %v3377_v34 = vpack.c.bf16 %v1544_v30, %v1512_v29 }
 0x3f8   : > { %2725 = vmatprep.mubr.f32.mxu1 %v1098_v49  ;;  %v3407_v49 = vpack.c.bf16 %v1481_v28, %v1449_v27  ;;  %v3409_v35 = vpack.c.bf16 %v1546_v33, %v1514_v32 }
 0x3fd   : > { %3360 = vmatpush1.bf16.xpose.msra.mxu0 %v3359_v42  ;;  %v1578_v42 = vld [vmem:[%s4530_s22 + $0xef8] sm:$0xff] }
 0x3fe   : > { %3392 = vmatpush1.bf16.xpose.msra.mxu1 %v3391_v9  ;;  %3362 = vmatprep.subr.bf16.mxu0 %v3361_v43  ;;  %v1610_v9 = vld [vmem:[%s4530_s22 + $0xff8] sm:$0xff]  ;;  %v3379_v43 = vpack.c.bf16 %v1543_v37, %v1511_v36 }
 0x3ff   : > { %3394 = vmatprep.subr.bf16.mxu1 %v3393_v44  ;;  %v3411_v44 = vpack.c.bf16 %v1545_v39, %v1513_v38  ;;  %v3413_v46 = vpack.c.bf16 %v1610_v9, %v1578_v42 }
 0x405   : > { %3364 = vmatpush1.bf16.xpose.msra.mxu0 %v3363_v0  ;;  %v1095_v0 = vld [vmem:[%s4528_s30 + $0xe0] sm:$0xff] }
 0x406   : > { %3396 = vmatpush1.bf16.xpose.msra.mxu1 %v3395_v52  ;;  %3366 = vmatprep.subr.bf16.mxu0 %v3365_v17  ;;  %v1097_v52 = vld [vmem:[%s4528_s30 + $0xf0] sm:$0xff] }
 0x407   : > { %v2097_v56 = vpop.f32.mrb[6].mxu0  ;;  %3398 = vmatprep.subr.bf16.mxu1 %v3397_v53 }
 0x408   : > { %v2098_v59 = vadd.f32 %v2097_v56, %v5047_v31  ;;  %v2099_v60 = vpop.f32.mrb[7].mxu0  ;;  %v2167_v61 = vpop.f32.mrb[6].mxu1  ;;  %v1383_v31 = vld [vmem:[%s4530_s22 + $0x8e0] sm:$0xff] }
 0x409   : > { %v2169_v1 = vpop.f32.mrb[7].mxu1  ;;  %v3371_v21 = vpack.c.bf16 %v1415_v7, %v1383_v31 }
 0x40a   : > { %v5118_v3 = vadd.f32 %v2167_v61, %v2098_v59 }
 0x40d   : > { %3368 = vmatpush1.bf16.xpose.msra.mxu0 %v3367_v2 }
 0x40e   : > { %3400 = vmatpush1.bf16.xpose.msra.mxu1 %v3399_v4  ;;  %3370 = vmatprep.subr.bf16.mxu0 %v3369_v5 }
 0x40f   : > { %3402 = vmatprep.subr.bf16.mxu1 %v3401_v6 }
 0x415   : > { %3372 = vmatpush1.bf16.xpose.msra.mxu0 %v3371_v21 }
 0x416   : > { %3404 = vmatpush1.bf16.xpose.msra.mxu1 %v3403_v22  ;;  %3374 = vmatprep.subr.bf16.mxu0 %v3373_v23 }
 0x417   : > { %3406 = vmatprep.subr.bf16.mxu1 %v3405_v24 }
 0x41d   : > { %3376 = vmatpush1.bf16.xpose.msra.mxu0 %v3375_v8 }
 0x41e   : > { %3408 = vmatpush1.bf16.xpose.msra.mxu1 %v3407_v49  ;;  %3378 = vmatprep.subr.bf16.mxu0 %v3377_v34 }
 0x41f   : > { %3410 = vmatprep.subr.bf16.mxu1 %v3409_v35 }
 0x425   : > { %3380 = vmatpush1.bf16.xpose.msra.mxu0 %v3379_v43 }
 0x426   : > { %3412 = vmatpush1.bf16.xpose.msra.mxu1 %v3411_v44  ;;  %3382 = vmatprep.subr.bf16.mxu0 %v3381_v45 }
 0x427   : > { %3414 = vmatprep.subr.bf16.mxu1 %v3413_v46 }
 0x42d   : > { %3384 = vmatpush1.bf16.xpose.msra.mxu0 %v3383_v13 }
 0x42e   : > { %3416 = vmatpush1.bf16.xpose.msra.mxu1 %v3415_v51 }
 0x434   : > { %2656 = vmatmul.mubr.f32.vlgmr.msra.gmra.mrb[14].mxu0 %v1095_v0 }
 0x435   : > { %2726 = vmatmul.mubr.f32.vlgmr.msra.gmra.mrb[14].mxu1 %v1097_v52 }
 0x447   : > { %v2237_v17 = vpop.f32.mrb[8].mxu0 }
 0x448   : > { %v2238_v53 = vadd.f32 %v2237_v17, %v5118_v3  ;;  %v2239_v54 = vpop.f32.mrb[9].mxu0  ;;  %v2307_v55 = vpop.f32.mrb[8].mxu1 }
 0x449   : > { %v2309_v18 = vpop.f32.mrb[9].mxu1 }
 0x44a   : > { %v2308_v56 = vadd.f32 %v2307_v55, %v2238_v53 }
 0x487   : > { %v2377_v57 = vpop.f32.mrb[10].mxu0 }
 0x488   : > { %v2378_v20 = vadd.f32 %v2377_v57, %v2308_v56  ;;  %v2379_v58 = vpop.f32.mrb[11].mxu0  ;;  %v2447_v59 = vpop.f32.mrb[10].mxu1 }
 0x489   : > { %v2449_v60 = vpop.f32.mrb[11].mxu1 }
 0x48a   : > { %v2448_v61 = vadd.f32 %v2447_v59, %v2378_v20 }
 0x4c7   : > { %v2517_v62 = vpop.f32.mrb[12].mxu0 }
 0x4c8   : > { %v2518_v63 = vadd.f32 %v2517_v62, %v2448_v61  ;;  %v2519_v1 = vpop.f32.mrb[13].mxu0  ;;  %v2587_v2 = vpop.f32.mrb[12].mxu1 }
 0x4c9   : > { %v2589_v4 = vpop.f32.mrb[13].mxu1 }
 0x4ca   : > { %v2588_v5 = vadd.f32 %v2587_v2, %v2518_v63 }
 0x507   : > { %v2657_v6 = vpop.f32.mrb[14].mxu0 }
 0x508   : > { %v2658_v31 = vadd.f32 %v2657_v6, %v2588_v5  ;;  %v2659_v7 = vpop.f32.mrb[15].mxu0  ;;  %v2727_v3 = vpop.f32.mrb[14].mxu1 }
 0x509   : > { %v2729_v12 = vpop.f32.mrb[15].mxu1 }
 0x50a   : > { %v2728_v14 = vadd.f32 %v2727_v3, %v2658_v31 }
 0x50c   : > { %v2731_v15 = vadd.f32 %v2728_v14, %v1066_v11 }
 0x50e   : > { %2732 = vst [vmem:[%s5174_s7] sm:$0xff] %v2731_v15 }
 0x50f PF: > { %p14_p0 = scmp.ge.s32.totalorder %s3837_s28, 6   ;;  %s5195_s24 = smov %s3692_s25 }
 0x510   : > { %s5196_s25 = smov %s3846_s8  ;;  %s5197_s26 = smov %s3837_s28 }
 0x511   :  { %16 = sbr.rel (!%p14_p0) target bundleno = 4 (0x4), region = 214 }

</bundles_post_ra>
